<compile_context>
chip_gen: v5e
topology: v5e:2x2
jax: 0.10.0
libtpu: 0.0.40
codegen_flags: <defaults>
</compile_context>

<pallas_src>
import jax
import jax.numpy as jnp
from jax.experimental import pallas as pl
from jax.experimental.pallas import tpu as pltpu

C = 32 * 32                    # 1024: split size inside ShuffleAttention2d
NUM_HEADS = 3
HEAD_DIM = 64
QKV = NUM_HEADS * HEAD_DIM     # 192
N_CHUNKS = 3
N_FEAT = N_CHUNKS * C          # 3072
NUM_CLASSES = 10
NUM_CLASSES_PAD = 128          # lane-dense output width
NUM_BLOCKS = 4
NEG_INF = -1e30


# ----------------------------------------------------------------------------
# Fused kernel, grid = (NUM_BLOCKS,).  Activation layout: chunk-major rows
# (row r = c*B + b, 1024 lanes), carried across grid steps in a VMEM scratch.
# ----------------------------------------------------------------------------
def fused_testnet_kernel(x_ref, wqkv_ref, bqkv_ref, wo_ref, bo_ref,
                         hw_ref, hb_ref, o_ref, y_ref):
    blk = pl.program_id(0)
    nb = x_ref.shape[0]
    B = nb // N_CHUNKS

    @pl.when(blk == 0)
    def _():
        y_ref[...] = x_ref[...].astype(jnp.float32)   # upcast bf16 input once

    y = y_ref[...]                               # (3B, 1024) f32, chunk-major
    wqkv = wqkv_ref[...]                         # (1024, 576) bf16 (Q scaled)
    wo = wo_ref[...]                             # (192, 1024) bf16
    bqkv = bqkv_ref[...]                         # (1, 576) f32
    bo = bo_ref[...]                             # (1, 1024) f32

    # Fused Q/K/V projection for all 3 chunks at once (one MXU pass).
    qkv = jnp.dot(y.astype(jnp.bfloat16), wqkv,
                  preferred_element_type=jnp.float32) + bqkv              # (3B, 576)

    new_rows = []
    for c in range(N_CHUNKS):                    # static unroll over chunks
        rows = slice(c * B, (c + 1) * B)
        qkv_c = qkv[rows, :]                     # (B, 576)
        y_c = y[rows, :]                         # (B, 1024)
        delta = None
        for h in range(NUM_HEADS):               # static unroll over heads
            lo = h * HEAD_DIM
            qh = qkv_c[:, lo:lo + HEAD_DIM].astype(jnp.bfloat16)
            kh = qkv_c[:, QKV + lo:QKV + lo + HEAD_DIM].astype(jnp.bfloat16)
            vh = qkv_c[:, 2 * QKV + lo:2 * QKV + lo + HEAD_DIM].astype(jnp.bfloat16)
            # scores over the pseudo-sequence (batch) axis, per chunk: (B, B)
            s = jax.lax.dot_general(qh, kh, (((1,), (1,)), ((), ())),
                                    preferred_element_type=jnp.float32)
            s = s - jnp.max(s, axis=-1, keepdims=True)
            p = jnp.exp(s)
            p = p * pl.reciprocal(jnp.sum(p, axis=-1, keepdims=True), approx=True)
            ctx = jnp.dot(p.astype(jnp.bfloat16), vh,
                          preferred_element_type=jnp.float32)              # (B, 64)
            # per-head output projection, accumulated (avoids the 3x64 lane concat)
            contrib = jnp.dot(ctx.astype(jnp.bfloat16), wo[lo:lo + HEAD_DIM, :],
                              preferred_element_type=jnp.float32)          # (B, 1024)
            delta = contrib if delta is None else delta + contrib
        new_rows.append(y_c + delta + bo)        # out-proj bias + fused residual

    # carry updated activation to the next block's grid step
    y_ref[...] = jnp.concatenate(new_rows, axis=0)

    # ---- head on the last step: Linear(3072, 10) + log_softmax (padded lanes) ----
    @pl.when(blk == NUM_BLOCKS - 1)
    def _():
        logits = hb_ref[...]                                               # (1, 128)
        for c in range(N_CHUNKS):
            logits = logits + jnp.dot(new_rows[c].astype(jnp.bfloat16), hw_ref[c],
                                      preferred_element_type=jnp.float32)  # (B, 128)
        col = jax.lax.broadcasted_iota(jnp.int32, logits.shape, 1)
        logits = jnp.where(col < NUM_CLASSES, logits, NEG_INF)   # mask pad lanes
        m = jnp.max(logits, axis=-1, keepdims=True)
        z = logits - m
        lse = jnp.log(jnp.sum(jnp.exp(z), axis=-1, keepdims=True))
        o_ref[...] = z - lse


def _cost_estimate(B):
    nb = N_CHUNKS * B
    proj = 2 * nb * C * (3 * QKV)                                   # qkv projection
    attn = N_CHUNKS * NUM_HEADS * (2 * B * B * HEAD_DIM * 2)        # QK^T + P@V
    outp = N_CHUNKS * NUM_HEADS * (2 * B * HEAD_DIM * C)            # out projection
    head = 2 * B * N_FEAT * NUM_CLASSES_PAD
    flops = NUM_BLOCKS * (proj + attn + outp) + head
    transc = NUM_BLOCKS * N_CHUNKS * NUM_HEADS * B * B + 2 * B * NUM_CLASSES_PAD
    weight_bytes = (NUM_BLOCKS * (C * 3 * QKV + QKV * C) * 2        # bf16 weights
                    + NUM_BLOCKS * (3 * QKV + C) * 4                # f32 biases
                    + N_FEAT * NUM_CLASSES_PAD * 2 + NUM_CLASSES_PAD * 4)
    act_bytes = nb * C * 2 + B * NUM_CLASSES_PAD * 4
    return pl.CostEstimate(flops=flops, transcendentals=transc,
                           bytes_accessed=weight_bytes + act_bytes)


def fused_forward(x2, params):
    nb = x2.shape[0]
    B = nb // N_CHUNKS
    return pl.pallas_call(
        fused_testnet_kernel,
        out_shape=jax.ShapeDtypeStruct((B, NUM_CLASSES_PAD), jnp.float32),
        grid_spec=pltpu.PrefetchScalarGridSpec(
            num_scalar_prefetch=0,
            grid=(NUM_BLOCKS,),
            in_specs=[
                pl.BlockSpec((nb, C), lambda blk: (0, 0)),                   # x (bf16)
                pl.BlockSpec((None, C, 3 * QKV), lambda blk: (blk, 0, 0)),   # wqkv[blk]
                pl.BlockSpec((None, 1, 3 * QKV), lambda blk: (blk, 0, 0)),   # bqkv[blk]
                pl.BlockSpec((None, QKV, C), lambda blk: (blk, 0, 0)),       # wo[blk]
                pl.BlockSpec((None, 1, C), lambda blk: (blk, 0, 0)),         # bo[blk]
                pl.BlockSpec((N_CHUNKS, C, NUM_CLASSES_PAD), lambda blk: (0, 0, 0)),  # head_w
                pl.BlockSpec((1, NUM_CLASSES_PAD), lambda blk: (0, 0)),      # head_b
            ],
            out_specs=pl.BlockSpec((B, NUM_CLASSES_PAD), lambda blk: (0, 0)),
            scratch_shapes=[pltpu.VMEM((nb, C), jnp.float32)],               # carried y
        ),
        compiler_params=pltpu.CompilerParams(
            dimension_semantics=("arbitrary",),          # steps are sequentially dependent
            vmem_limit_bytes=32 * 1024 * 1024),
        cost_estimate=_cost_estimate(B),
    )(x2, params["wqkv"], params["bqkv"], params["wo"], params["bo"],
      params["head_w"], params["head_b"])


# ----------------------------------------------------------------------------
# Parameter init (deterministic, synthetic) and full forward.
# ----------------------------------------------------------------------------
def init_params(key):
    keys = jax.random.split(key, 3)
    s_in = 1.0 / (C ** 0.5)
    s_o = 1.0 / (QKV ** 0.5)
    scale = 1.0 / (HEAD_DIM ** 0.5)
    wqkv = jax.random.normal(keys[0], (NUM_BLOCKS, C, 3 * QKV), jnp.float32) * s_in
    wqkv = wqkv.at[:, :, :QKV].multiply(scale)        # fold 1/sqrt(head_dim) into Q
    wqkv = wqkv.astype(jnp.bfloat16)
    wo = (jax.random.normal(keys[1], (NUM_BLOCKS, QKV, C), jnp.float32)
          * s_o).astype(jnp.bfloat16)
    bqkv = jnp.zeros((NUM_BLOCKS, 1, 3 * QKV), jnp.float32)
    bo = jnp.zeros((NUM_BLOCKS, 1, C), jnp.float32)
    hw = jax.random.normal(keys[2], (N_FEAT, NUM_CLASSES), jnp.float32) \
        * (1.0 / (N_FEAT ** 0.5))
    hw_pad = jnp.zeros((N_FEAT, NUM_CLASSES_PAD), jnp.float32)
    hw_pad = hw_pad.at[:, :NUM_CLASSES].set(hw)
    head_w = hw_pad.reshape(N_CHUNKS, C, NUM_CLASSES_PAD).astype(jnp.bfloat16)
    head_b = jnp.zeros((1, NUM_CLASSES_PAD), jnp.float32)
    return {"wqkv": wqkv, "bqkv": bqkv, "wo": wo, "bo": bo,
            "head_w": head_w, "head_b": head_b}


@jax.jit
def test_net_forward(x_img, params):
    B = x_img.shape[0]
    # flatten per batch -> (B, 3, 1024), then chunk-major rows: row r = c*B + b
    x2 = jnp.transpose(x_img.reshape(B, N_CHUNKS, C), (1, 0, 2)).reshape(N_CHUNKS * B, C)
    out = fused_forward(x2.astype(jnp.bfloat16), params)   # (B, 128) padded log-probs
    return out[:, :NUM_CLASSES]                            # (B, 10)


if __name__ == "__main__":
    key = jax.random.PRNGKey(0)
    k_x, k_p = jax.random.split(key)
    # batch=2, channels=3, spatial=32x32 (required by Linear(32*32*3, 10))
    x = jax.random.normal(k_x, (2, 3, 32, 32), jnp.float32)
    params = init_params(k_p)

    out = test_net_forward(x, params)
    out = jax.block_until_ready(out)

    assert out.shape == (2, NUM_CLASSES)
    # log_softmax rows must sum to ~1 in prob space
    assert bool(jnp.allclose(jnp.sum(jnp.exp(out), axis=-1), 1.0, atol=1e-4))
    print("KERNEL_OK")
</pallas_src>

<mosaic_0001>
module attributes {stable_mosaic.version = 11 : i64} {
  func.func @fused_testnet_kernel(%arg0: i32, %arg1: memref<6x1024xbf16, #tpu.memory_space<vmem>>, %arg2: memref<1x1024x576xbf16, #tpu.memory_space<vmem>>, %arg3: memref<1x1x576xf32, #tpu.memory_space<vmem>>, %arg4: memref<1x192x1024xbf16, #tpu.memory_space<vmem>>, %arg5: memref<1x1x1024xf32, #tpu.memory_space<vmem>>, %arg6: memref<3x1024x128xbf16, #tpu.memory_space<vmem>>, %arg7: memref<1x128xf32, #tpu.memory_space<vmem>>, %arg8: memref<2x128xf32, #tpu.memory_space<vmem>>, %arg9: memref<6x1024xf32, #tpu.memory_space<vmem>>) attributes {dimension_semantics = [#tpu.dimension_semantics<arbitrary>], iteration_bounds = array<i64: 4>, scalar_prefetch = 0 : i64, scratch_operands = 1 : i64, tpu.core_type = #tpu.core_type<tc>, window_params = [{pipeline_mode = #tpu.pipeline_mode<synchronous>, transform_indices = @transform_0, window_bounds = array<i64: 6, 1024>}, {transform_indices = @transform_1, window_bounds = array<i64: 1, 1024, 576>}, {transform_indices = @transform_2, window_bounds = array<i64: 1, 1, 576>}, {transform_indices = @transform_3, window_bounds = array<i64: 1, 192, 1024>}, {transform_indices = @transform_4, window_bounds = array<i64: 1, 1, 1024>}, {pipeline_mode = #tpu.pipeline_mode<synchronous>, transform_indices = @transform_5, window_bounds = array<i64: 3, 1024, 128>}, {pipeline_mode = #tpu.pipeline_mode<synchronous>, transform_indices = @transform_6, window_bounds = array<i64: 1, 128>}, {pipeline_mode = #tpu.pipeline_mode<synchronous>, transform_indices = @transform_7, window_bounds = array<i64: 2, 128>}]} {
    %c0_i32 = arith.constant 0 : i32
    %0 = arith.cmpi eq, %arg0, %c0_i32 : i32
    %1 = arith.extui %0 : i1 to i32
    %c0_i32_0 = arith.constant 0 : i32
    %2 = arith.cmpi ne, %1, %c0_i32_0 : i32
    scf.if %2 {
      %c0_62 = arith.constant 0 : index
      %c0_63 = arith.constant 0 : index
      %240 = vector.load %arg1[%c0_62, %c0_63] : memref<6x1024xbf16, #tpu.memory_space<vmem>>, vector<6x1024xbf16>
      %241 = arith.extf %240 : vector<6x1024xbf16> to vector<6x1024xf32>
      %c0_64 = arith.constant 0 : index
      %c0_65 = arith.constant 0 : index
      %242 = vector.load %arg9[%c0_64, %c0_65] : memref<6x1024xf32, #tpu.memory_space<vmem>>, vector<6x1024xf32>
      tpu.vector_store %arg9[%c0_64, %c0_65], %241 {strides = array<i32>} : memref<6x1024xf32, #tpu.memory_space<vmem>>, vector<6x1024xf32>,
    } else {
    }
    %c0 = arith.constant 0 : index
    %c0_1 = arith.constant 0 : index
    %3 = vector.load %arg9[%c0, %c0_1] : memref<6x1024xf32, #tpu.memory_space<vmem>>, vector<6x1024xf32>
    %c0_2 = arith.constant 0 : index
    %c0_3 = arith.constant 0 : index
    %c0_4 = arith.constant 0 : index
    %4 = vector.load %arg2[%c0_2, %c0_3, %c0_4] : memref<1x1024x576xbf16, #tpu.memory_space<vmem>>, vector<1x1024x576xbf16>
    %5 = vector.shape_cast %4 : vector<1x1024x576xbf16> to vector<1024x576xbf16>
    %c0_5 = arith.constant 0 : index
    %c0_6 = arith.constant 0 : index
    %c0_7 = arith.constant 0 : index
    %6 = vector.load %arg4[%c0_5, %c0_6, %c0_7] : memref<1x192x1024xbf16, #tpu.memory_space<vmem>>, vector<1x192x1024xbf16>
    %7 = vector.shape_cast %6 : vector<1x192x1024xbf16> to vector<192x1024xbf16>
    %c0_8 = arith.constant 0 : index
    %c0_9 = arith.constant 0 : index
    %c0_10 = arith.constant 0 : index
    %8 = vector.load %arg3[%c0_8, %c0_9, %c0_10] : memref<1x1x576xf32, #tpu.memory_space<vmem>>, vector<1x1x576xf32>
    %9 = vector.shape_cast %8 : vector<1x1x576xf32> to vector<1x576xf32>
    %c0_11 = arith.constant 0 : index
    %c0_12 = arith.constant 0 : index
    %c0_13 = arith.constant 0 : index
    %10 = vector.load %arg5[%c0_11, %c0_12, %c0_13] : memref<1x1x1024xf32, #tpu.memory_space<vmem>>, vector<1x1x1024xf32>
    %11 = vector.shape_cast %10 : vector<1x1x1024xf32> to vector<1x1024xf32>
    %12 = arith.truncf %3 : vector<6x1024xf32> to vector<6x1024xbf16>
    %cst = arith.constant dense<0.000000e+00> : vector<6x576xf32>
    %13 = tpu.matmul %12, %5, %cst {dimension_numbers = #tpu.dot_dimension_numbers<[1], [0], [0], [1], [0, 0, 1, 1], [], []>} : vector<6x1024xbf16>, vector<1024x576xbf16>, vector<6x576xf32> -> vector<6x576xf32>
    %14 = vector.broadcast %9 : vector<1x576xf32> to vector<6x576xf32>
    %15 = arith.addf %13, %14 : vector<6x576xf32>
    %16 = vector.extract_strided_slice %15 {offsets = [0, 0], sizes = [2, 576], strides = [1, 1]} : vector<6x576xf32> to vector<2x576xf32>
    %17 = vector.extract_strided_slice %3 {offsets = [0, 0], sizes = [2, 1024], strides = [1, 1]} : vector<6x1024xf32> to vector<2x1024xf32>
    %18 = vector.extract_strided_slice %16 {offsets = [0, 0], sizes = [2, 64], strides = [1, 1]} : vector<2x576xf32> to vector<2x64xf32>
    %19 = arith.truncf %18 : vector<2x64xf32> to vector<2x64xbf16>
    %20 = vector.extract_strided_slice %16 {offsets = [0, 192], sizes = [2, 64], strides = [1, 1]} : vector<2x576xf32> to vector<2x64xf32>
    %21 = arith.truncf %20 : vector<2x64xf32> to vector<2x64xbf16>
    %22 = vector.extract_strided_slice %16 {offsets = [0, 384], sizes = [2, 64], strides = [1, 1]} : vector<2x576xf32> to vector<2x64xf32>
    %23 = arith.truncf %22 : vector<2x64xf32> to vector<2x64xbf16>
    %cst_14 = arith.constant dense<0.000000e+00> : vector<2x2xf32>
    %24 = tpu.matmul %19, %21, %cst_14 {dimension_numbers = #tpu.dot_dimension_numbers<[1], [1], [0], [0], [0, 0, 1, 0], [], []>} : vector<2x64xbf16>, vector<2x64xbf16>, vector<2x2xf32> -> vector<2x2xf32>
    %cst_15 = arith.constant dense<0xFF800000> : vector<2xf32>
    %25 = vector.multi_reduction <maximumf>, %24, %cst_15 [1] : vector<2x2xf32> to vector<2xf32>
    %26 = vector.shape_cast %25 : vector<2xf32> to vector<2x1xf32>
    %27 = vector.broadcast %26 : vector<2x1xf32> to vector<2x2xf32>
    %28 = arith.subf %24, %27 : vector<2x2xf32>
    %29 = math.exp %28 : vector<2x2xf32>
    %cst_16 = arith.constant dense<0.000000e+00> : vector<2xf32>
    %30 = vector.multi_reduction <add>, %29, %cst_16 [1] : vector<2x2xf32> to vector<2xf32>
    %31 = vector.shape_cast %30 : vector<2xf32> to vector<2x1xf32>
    %32 = tpu.reciprocal %31 {approx = true} : vector<2x1xf32> -> vector<2x1xf32>
    %33 = vector.broadcast %32 : vector<2x1xf32> to vector<2x2xf32>
    %34 = arith.mulf %29, %33 : vector<2x2xf32>
    %35 = arith.truncf %34 : vector<2x2xf32> to vector<2x2xbf16>
    %cst_17 = arith.constant dense<0.000000e+00> : vector<2x64xf32>
    %36 = tpu.matmul %35, %23, %cst_17 {dimension_numbers = #tpu.dot_dimension_numbers<[1], [0], [0], [1], [0, 0, 1, 1], [], []>} : vector<2x2xbf16>, vector<2x64xbf16>, vector<2x64xf32> -> vector<2x64xf32>
    %37 = arith.truncf %36 : vector<2x64xf32> to vector<2x64xbf16>
    %38 = vector.extract_strided_slice %7 {offsets = [0, 0], sizes = [64, 1024], strides = [1, 1]} : vector<192x1024xbf16> to vector<64x1024xbf16>
    %cst_18 = arith.constant dense<0.000000e+00> : vector<2x1024xf32>
    %39 = tpu.matmul %37, %38, %cst_18 {dimension_numbers = #tpu.dot_dimension_numbers<[1], [0], [0], [1], [0, 0, 1, 1], [], []>} : vector<2x64xbf16>, vector<64x1024xbf16>, vector<2x1024xf32> -> vector<2x1024xf32>
    %40 = vector.extract_strided_slice %16 {offsets = [0, 64], sizes = [2, 64], strides = [1, 1]} : vector<2x576xf32> to vector<2x64xf32>
    %41 = arith.truncf %40 : vector<2x64xf32> to vector<2x64xbf16>
    %42 = vector.extract_strided_slice %16 {offsets = [0, 256], sizes = [2, 64], strides = [1, 1]} : vector<2x576xf32> to vector<2x64xf32>
    %43 = arith.truncf %42 : vector<2x64xf32> to vector<2x64xbf16>
    %44 = vector.extract_strided_slice %16 {offsets = [0, 448], sizes = [2, 64], strides = [1, 1]} : vector<2x576xf32> to vector<2x64xf32>
    %45 = arith.truncf %44 : vector<2x64xf32> to vector<2x64xbf16>
    %cst_19 = arith.constant dense<0.000000e+00> : vector<2x2xf32>
    %46 = tpu.matmul %41, %43, %cst_19 {dimension_numbers = #tpu.dot_dimension_numbers<[1], [1], [0], [0], [0, 0, 1, 0], [], []>} : vector<2x64xbf16>, vector<2x64xbf16>, vector<2x2xf32> -> vector<2x2xf32>
    %cst_20 = arith.constant dense<0xFF800000> : vector<2xf32>
    %47 = vector.multi_reduction <maximumf>, %46, %cst_20 [1] : vector<2x2xf32> to vector<2xf32>
    %48 = vector.shape_cast %47 : vector<2xf32> to vector<2x1xf32>
    %49 = vector.broadcast %48 : vector<2x1xf32> to vector<2x2xf32>
    %50 = arith.subf %46, %49 : vector<2x2xf32>
    %51 = math.exp %50 : vector<2x2xf32>
    %cst_21 = arith.constant dense<0.000000e+00> : vector<2xf32>
    %52 = vector.multi_reduction <add>, %51, %cst_21 [1] : vector<2x2xf32> to vector<2xf32>
    %53 = vector.shape_cast %52 : vector<2xf32> to vector<2x1xf32>
    %54 = tpu.reciprocal %53 {approx = true} : vector<2x1xf32> -> vector<2x1xf32>
    %55 = vector.broadcast %54 : vector<2x1xf32> to vector<2x2xf32>
    %56 = arith.mulf %51, %55 : vector<2x2xf32>
    %57 = arith.truncf %56 : vector<2x2xf32> to vector<2x2xbf16>
    %cst_22 = arith.constant dense<0.000000e+00> : vector<2x64xf32>
    %58 = tpu.matmul %57, %45, %cst_22 {dimension_numbers = #tpu.dot_dimension_numbers<[1], [0], [0], [1], [0, 0, 1, 1], [], []>} : vector<2x2xbf16>, vector<2x64xbf16>, vector<2x64xf32> -> vector<2x64xf32>
    %59 = arith.truncf %58 : vector<2x64xf32> to vector<2x64xbf16>
    %60 = vector.extract_strided_slice %7 {offsets = [64, 0], sizes = [64, 1024], strides = [1, 1]} : vector<192x1024xbf16> to vector<64x1024xbf16>
    %cst_23 = arith.constant dense<0.000000e+00> : vector<2x1024xf32>
    %61 = tpu.matmul %59, %60, %cst_23 {dimension_numbers = #tpu.dot_dimension_numbers<[1], [0], [0], [1], [0, 0, 1, 1], [], []>} : vector<2x64xbf16>, vector<64x1024xbf16>, vector<2x1024xf32> -> vector<2x1024xf32>
    %62 = arith.addf %39, %61 : vector<2x1024xf32>
    %63 = vector.extract_strided_slice %16 {offsets = [0, 128], sizes = [2, 64], strides = [1, 1]} : vector<2x576xf32> to vector<2x64xf32>
    %64 = arith.truncf %63 : vector<2x64xf32> to vector<2x64xbf16>
    %65 = vector.extract_strided_slice %16 {offsets = [0, 320], sizes = [2, 64], strides = [1, 1]} : vector<2x576xf32> to vector<2x64xf32>
    %66 = arith.truncf %65 : vector<2x64xf32> to vector<2x64xbf16>
    %67 = vector.extract_strided_slice %16 {offsets = [0, 512], sizes = [2, 64], strides = [1, 1]} : vector<2x576xf32> to vector<2x64xf32>
    %68 = arith.truncf %67 : vector<2x64xf32> to vector<2x64xbf16>
    %cst_24 = arith.constant dense<0.000000e+00> : vector<2x2xf32>
    %69 = tpu.matmul %64, %66, %cst_24 {dimension_numbers = #tpu.dot_dimension_numbers<[1], [1], [0], [0], [0, 0, 1, 0], [], []>} : vector<2x64xbf16>, vector<2x64xbf16>, vector<2x2xf32> -> vector<2x2xf32>
    %cst_25 = arith.constant dense<0xFF800000> : vector<2xf32>
    %70 = vector.multi_reduction <maximumf>, %69, %cst_25 [1] : vector<2x2xf32> to vector<2xf32>
    %71 = vector.shape_cast %70 : vector<2xf32> to vector<2x1xf32>
    %72 = vector.broadcast %71 : vector<2x1xf32> to vector<2x2xf32>
    %73 = arith.subf %69, %72 : vector<2x2xf32>
    %74 = math.exp %73 : vector<2x2xf32>
    %cst_26 = arith.constant dense<0.000000e+00> : vector<2xf32>
    %75 = vector.multi_reduction <add>, %74, %cst_26 [1] : vector<2x2xf32> to vector<2xf32>
    %76 = vector.shape_cast %75 : vector<2xf32> to vector<2x1xf32>
    %77 = tpu.reciprocal %76 {approx = true} : vector<2x1xf32> -> vector<2x1xf32>
    %78 = vector.broadcast %77 : vector<2x1xf32> to vector<2x2xf32>
    %79 = arith.mulf %74, %78 : vector<2x2xf32>
    %80 = arith.truncf %79 : vector<2x2xf32> to vector<2x2xbf16>
    %cst_27 = arith.constant dense<0.000000e+00> : vector<2x64xf32>
    %81 = tpu.matmul %80, %68, %cst_27 {dimension_numbers = #tpu.dot_dimension_numbers<[1], [0], [0], [1], [0, 0, 1, 1], [], []>} : vector<2x2xbf16>, vector<2x64xbf16>, vector<2x64xf32> -> vector<2x64xf32>
    %82 = arith.truncf %81 : vector<2x64xf32> to vector<2x64xbf16>
    %83 = vector.extract_strided_slice %7 {offsets = [128, 0], sizes = [64, 1024], strides = [1, 1]} : vector<192x1024xbf16> to vector<64x1024xbf16>
    %cst_28 = arith.constant dense<0.000000e+00> : vector<2x1024xf32>
    %84 = tpu.matmul %82, %83, %cst_28 {dimension_numbers = #tpu.dot_dimension_numbers<[1], [0], [0], [1], [0, 0, 1, 1], [], []>} : vector<2x64xbf16>, vector<64x1024xbf16>, vector<2x1024xf32> -> vector<2x1024xf32>
    %85 = arith.addf %62, %84 : vector<2x1024xf32>
    %86 = arith.addf %17, %85 : vector<2x1024xf32>
    %87 = vector.broadcast %11 : vector<1x1024xf32> to vector<2x1024xf32>
    %88 = arith.addf %86, %87 : vector<2x1024xf32>
    %89 = vector.extract_strided_slice %15 {offsets = [2, 0], sizes = [2, 576], strides = [1, 1]} : vector<6x576xf32> to vector<2x576xf32>
    %90 = vector.extract_strided_slice %3 {offsets = [2, 0], sizes = [2, 1024], strides = [1, 1]} : vector<6x1024xf32> to vector<2x1024xf32>
    %91 = vector.extract_strided_slice %89 {offsets = [0, 0], sizes = [2, 64], strides = [1, 1]} : vector<2x576xf32> to vector<2x64xf32>
    %92 = arith.truncf %91 : vector<2x64xf32> to vector<2x64xbf16>
    %93 = vector.extract_strided_slice %89 {offsets = [0, 192], sizes = [2, 64], strides = [1, 1]} : vector<2x576xf32> to vector<2x64xf32>
    %94 = arith.truncf %93 : vector<2x64xf32> to vector<2x64xbf16>
    %95 = vector.extract_strided_slice %89 {offsets = [0, 384], sizes = [2, 64], strides = [1, 1]} : vector<2x576xf32> to vector<2x64xf32>
    %96 = arith.truncf %95 : vector<2x64xf32> to vector<2x64xbf16>
    %cst_29 = arith.constant dense<0.000000e+00> : vector<2x2xf32>
    %97 = tpu.matmul %92, %94, %cst_29 {dimension_numbers = #tpu.dot_dimension_numbers<[1], [1], [0], [0], [0, 0, 1, 0], [], []>} : vector<2x64xbf16>, vector<2x64xbf16>, vector<2x2xf32> -> vector<2x2xf32>
    %cst_30 = arith.constant dense<0xFF800000> : vector<2xf32>
    %98 = vector.multi_reduction <maximumf>, %97, %cst_30 [1] : vector<2x2xf32> to vector<2xf32>
    %99 = vector.shape_cast %98 : vector<2xf32> to vector<2x1xf32>
    %100 = vector.broadcast %99 : vector<2x1xf32> to vector<2x2xf32>
    %101 = arith.subf %97, %100 : vector<2x2xf32>
    %102 = math.exp %101 : vector<2x2xf32>
    %cst_31 = arith.constant dense<0.000000e+00> : vector<2xf32>
    %103 = vector.multi_reduction <add>, %102, %cst_31 [1] : vector<2x2xf32> to vector<2xf32>
    %104 = vector.shape_cast %103 : vector<2xf32> to vector<2x1xf32>
    %105 = tpu.reciprocal %104 {approx = true} : vector<2x1xf32> -> vector<2x1xf32>
    %106 = vector.broadcast %105 : vector<2x1xf32> to vector<2x2xf32>
    %107 = arith.mulf %102, %106 : vector<2x2xf32>
    %108 = arith.truncf %107 : vector<2x2xf32> to vector<2x2xbf16>
    %cst_32 = arith.constant dense<0.000000e+00> : vector<2x64xf32>
    %109 = tpu.matmul %108, %96, %cst_32 {dimension_numbers = #tpu.dot_dimension_numbers<[1], [0], [0], [1], [0, 0, 1, 1], [], []>} : vector<2x2xbf16>, vector<2x64xbf16>, vector<2x64xf32> -> vector<2x64xf32>
    %110 = arith.truncf %109 : vector<2x64xf32> to vector<2x64xbf16>
    %111 = vector.extract_strided_slice %7 {offsets = [0, 0], sizes = [64, 1024], strides = [1, 1]} : vector<192x1024xbf16> to vector<64x1024xbf16>
    %cst_33 = arith.constant dense<0.000000e+00> : vector<2x1024xf32>
    %112 = tpu.matmul %110, %111, %cst_33 {dimension_numbers = #tpu.dot_dimension_numbers<[1], [0], [0], [1], [0, 0, 1, 1], [], []>} : vector<2x64xbf16>, vector<64x1024xbf16>, vector<2x1024xf32> -> vector<2x1024xf32>
    %113 = vector.extract_strided_slice %89 {offsets = [0, 64], sizes = [2, 64], strides = [1, 1]} : vector<2x576xf32> to vector<2x64xf32>
    %114 = arith.truncf %113 : vector<2x64xf32> to vector<2x64xbf16>
    %115 = vector.extract_strided_slice %89 {offsets = [0, 256], sizes = [2, 64], strides = [1, 1]} : vector<2x576xf32> to vector<2x64xf32>
    %116 = arith.truncf %115 : vector<2x64xf32> to vector<2x64xbf16>
    %117 = vector.extract_strided_slice %89 {offsets = [0, 448], sizes = [2, 64], strides = [1, 1]} : vector<2x576xf32> to vector<2x64xf32>
    %118 = arith.truncf %117 : vector<2x64xf32> to vector<2x64xbf16>
    %cst_34 = arith.constant dense<0.000000e+00> : vector<2x2xf32>
    %119 = tpu.matmul %114, %116, %cst_34 {dimension_numbers = #tpu.dot_dimension_numbers<[1], [1], [0], [0], [0, 0, 1, 0], [], []>} : vector<2x64xbf16>, vector<2x64xbf16>, vector<2x2xf32> -> vector<2x2xf32>
    %cst_35 = arith.constant dense<0xFF800000> : vector<2xf32>
    %120 = vector.multi_reduction <maximumf>, %119, %cst_35 [1] : vector<2x2xf32> to vector<2xf32>
    %121 = vector.shape_cast %120 : vector<2xf32> to vector<2x1xf32>
    %122 = vector.broadcast %121 : vector<2x1xf32> to vector<2x2xf32>
    %123 = arith.subf %119, %122 : vector<2x2xf32>
    %124 = math.exp %123 : vector<2x2xf32>
    %cst_36 = arith.constant dense<0.000000e+00> : vector<2xf32>
    %125 = vector.multi_reduction <add>, %124, %cst_36 [1] : vector<2x2xf32> to vector<2xf32>
    %126 = vector.shape_cast %125 : vector<2xf32> to vector<2x1xf32>
    %127 = tpu.reciprocal %126 {approx = true} : vector<2x1xf32> -> vector<2x1xf32>
    %128 = vector.broadcast %127 : vector<2x1xf32> to vector<2x2xf32>
    %129 = arith.mulf %124, %128 : vector<2x2xf32>
    %130 = arith.truncf %129 : vector<2x2xf32> to vector<2x2xbf16>
    %cst_37 = arith.constant dense<0.000000e+00> : vector<2x64xf32>
    %131 = tpu.matmul %130, %118, %cst_37 {dimension_numbers = #tpu.dot_dimension_numbers<[1], [0], [0], [1], [0, 0, 1, 1], [], []>} : vector<2x2xbf16>, vector<2x64xbf16>, vector<2x64xf32> -> vector<2x64xf32>
    %132 = arith.truncf %131 : vector<2x64xf32> to vector<2x64xbf16>
    %133 = vector.extract_strided_slice %7 {offsets = [64, 0], sizes = [64, 1024], strides = [1, 1]} : vector<192x1024xbf16> to vector<64x1024xbf16>
    %cst_38 = arith.constant dense<0.000000e+00> : vector<2x1024xf32>
    %134 = tpu.matmul %132, %133, %cst_38 {dimension_numbers = #tpu.dot_dimension_numbers<[1], [0], [0], [1], [0, 0, 1, 1], [], []>} : vector<2x64xbf16>, vector<64x1024xbf16>, vector<2x1024xf32> -> vector<2x1024xf32>
    %135 = arith.addf %112, %134 : vector<2x1024xf32>
    %136 = vector.extract_strided_slice %89 {offsets = [0, 128], sizes = [2, 64], strides = [1, 1]} : vector<2x576xf32> to vector<2x64xf32>
    %137 = arith.truncf %136 : vector<2x64xf32> to vector<2x64xbf16>
    %138 = vector.extract_strided_slice %89 {offsets = [0, 320], sizes = [2, 64], strides = [1, 1]} : vector<2x576xf32> to vector<2x64xf32>
    %139 = arith.truncf %138 : vector<2x64xf32> to vector<2x64xbf16>
    %140 = vector.extract_strided_slice %89 {offsets = [0, 512], sizes = [2, 64], strides = [1, 1]} : vector<2x576xf32> to vector<2x64xf32>
    %141 = arith.truncf %140 : vector<2x64xf32> to vector<2x64xbf16>
    %cst_39 = arith.constant dense<0.000000e+00> : vector<2x2xf32>
    %142 = tpu.matmul %137, %139, %cst_39 {dimension_numbers = #tpu.dot_dimension_numbers<[1], [1], [0], [0], [0, 0, 1, 0], [], []>} : vector<2x64xbf16>, vector<2x64xbf16>, vector<2x2xf32> -> vector<2x2xf32>
    %cst_40 = arith.constant dense<0xFF800000> : vector<2xf32>
    %143 = vector.multi_reduction <maximumf>, %142, %cst_40 [1] : vector<2x2xf32> to vector<2xf32>
    %144 = vector.shape_cast %143 : vector<2xf32> to vector<2x1xf32>
    %145 = vector.broadcast %144 : vector<2x1xf32> to vector<2x2xf32>
    %146 = arith.subf %142, %145 : vector<2x2xf32>
    %147 = math.exp %146 : vector<2x2xf32>
    %cst_41 = arith.constant dense<0.000000e+00> : vector<2xf32>
    %148 = vector.multi_reduction <add>, %147, %cst_41 [1] : vector<2x2xf32> to vector<2xf32>
    %149 = vector.shape_cast %148 : vector<2xf32> to vector<2x1xf32>
    %150 = tpu.reciprocal %149 {approx = true} : vector<2x1xf32> -> vector<2x1xf32>
    %151 = vector.broadcast %150 : vector<2x1xf32> to vector<2x2xf32>
    %152 = arith.mulf %147, %151 : vector<2x2xf32>
    %153 = arith.truncf %152 : vector<2x2xf32> to vector<2x2xbf16>
    %cst_42 = arith.constant dense<0.000000e+00> : vector<2x64xf32>
    %154 = tpu.matmul %153, %141, %cst_42 {dimension_numbers = #tpu.dot_dimension_numbers<[1], [0], [0], [1], [0, 0, 1, 1], [], []>} : vector<2x2xbf16>, vector<2x64xbf16>, vector<2x64xf32> -> vector<2x64xf32>
    %155 = arith.truncf %154 : vector<2x64xf32> to vector<2x64xbf16>
    %156 = vector.extract_strided_slice %7 {offsets = [128, 0], sizes = [64, 1024], strides = [1, 1]} : vector<192x1024xbf16> to vector<64x1024xbf16>
    %cst_43 = arith.constant dense<0.000000e+00> : vector<2x1024xf32>
    %157 = tpu.matmul %155, %156, %cst_43 {dimension_numbers = #tpu.dot_dimension_numbers<[1], [0], [0], [1], [0, 0, 1, 1], [], []>} : vector<2x64xbf16>, vector<64x1024xbf16>, vector<2x1024xf32> -> vector<2x1024xf32>
    %158 = arith.addf %135, %157 : vector<2x1024xf32>
    %159 = arith.addf %90, %158 : vector<2x1024xf32>
    %160 = vector.broadcast %11 : vector<1x1024xf32> to vector<2x1024xf32>
    %161 = arith.addf %159, %160 : vector<2x1024xf32>
    %162 = vector.extract_strided_slice %15 {offsets = [4, 0], sizes = [2, 576], strides = [1, 1]} : vector<6x576xf32> to vector<2x576xf32>
    %163 = vector.extract_strided_slice %3 {offsets = [4, 0], sizes = [2, 1024], strides = [1, 1]} : vector<6x1024xf32> to vector<2x1024xf32>
    %164 = vector.extract_strided_slice %162 {offsets = [0, 0], sizes = [2, 64], strides = [1, 1]} : vector<2x576xf32> to vector<2x64xf32>
    %165 = arith.truncf %164 : vector<2x64xf32> to vector<2x64xbf16>
    %166 = vector.extract_strided_slice %162 {offsets = [0, 192], sizes = [2, 64], strides = [1, 1]} : vector<2x576xf32> to vector<2x64xf32>
    %167 = arith.truncf %166 : vector<2x64xf32> to vector<2x64xbf16>
    %168 = vector.extract_strided_slice %162 {offsets = [0, 384], sizes = [2, 64], strides = [1, 1]} : vector<2x576xf32> to vector<2x64xf32>
    %169 = arith.truncf %168 : vector<2x64xf32> to vector<2x64xbf16>
    %cst_44 = arith.constant dense<0.000000e+00> : vector<2x2xf32>
    %170 = tpu.matmul %165, %167, %cst_44 {dimension_numbers = #tpu.dot_dimension_numbers<[1], [1], [0], [0], [0, 0, 1, 0], [], []>} : vector<2x64xbf16>, vector<2x64xbf16>, vector<2x2xf32> -> vector<2x2xf32>
    %cst_45 = arith.constant dense<0xFF800000> : vector<2xf32>
    %171 = vector.multi_reduction <maximumf>, %170, %cst_45 [1] : vector<2x2xf32> to vector<2xf32>
    %172 = vector.shape_cast %171 : vector<2xf32> to vector<2x1xf32>
    %173 = vector.broadcast %172 : vector<2x1xf32> to vector<2x2xf32>
    %174 = arith.subf %170, %173 : vector<2x2xf32>
    %175 = math.exp %174 : vector<2x2xf32>
    %cst_46 = arith.constant dense<0.000000e+00> : vector<2xf32>
    %176 = vector.multi_reduction <add>, %175, %cst_46 [1] : vector<2x2xf32> to vector<2xf32>
    %177 = vector.shape_cast %176 : vector<2xf32> to vector<2x1xf32>
    %178 = tpu.reciprocal %177 {approx = true} : vector<2x1xf32> -> vector<2x1xf32>
    %179 = vector.broadcast %178 : vector<2x1xf32> to vector<2x2xf32>
    %180 = arith.mulf %175, %179 : vector<2x2xf32>
    %181 = arith.truncf %180 : vector<2x2xf32> to vector<2x2xbf16>
    %cst_47 = arith.constant dense<0.000000e+00> : vector<2x64xf32>
    %182 = tpu.matmul %181, %169, %cst_47 {dimension_numbers = #tpu.dot_dimension_numbers<[1], [0], [0], [1], [0, 0, 1, 1], [], []>} : vector<2x2xbf16>, vector<2x64xbf16>, vector<2x64xf32> -> vector<2x64xf32>
    %183 = arith.truncf %182 : vector<2x64xf32> to vector<2x64xbf16>
    %184 = vector.extract_strided_slice %7 {offsets = [0, 0], sizes = [64, 1024], strides = [1, 1]} : vector<192x1024xbf16> to vector<64x1024xbf16>
    %cst_48 = arith.constant dense<0.000000e+00> : vector<2x1024xf32>
    %185 = tpu.matmul %183, %184, %cst_48 {dimension_numbers = #tpu.dot_dimension_numbers<[1], [0], [0], [1], [0, 0, 1, 1], [], []>} : vector<2x64xbf16>, vector<64x1024xbf16>, vector<2x1024xf32> -> vector<2x1024xf32>
    %186 = vector.extract_strided_slice %162 {offsets = [0, 64], sizes = [2, 64], strides = [1, 1]} : vector<2x576xf32> to vector<2x64xf32>
    %187 = arith.truncf %186 : vector<2x64xf32> to vector<2x64xbf16>
    %188 = vector.extract_strided_slice %162 {offsets = [0, 256], sizes = [2, 64], strides = [1, 1]} : vector<2x576xf32> to vector<2x64xf32>
    %189 = arith.truncf %188 : vector<2x64xf32> to vector<2x64xbf16>
    %190 = vector.extract_strided_slice %162 {offsets = [0, 448], sizes = [2, 64], strides = [1, 1]} : vector<2x576xf32> to vector<2x64xf32>
    %191 = arith.truncf %190 : vector<2x64xf32> to vector<2x64xbf16>
    %cst_49 = arith.constant dense<0.000000e+00> : vector<2x2xf32>
    %192 = tpu.matmul %187, %189, %cst_49 {dimension_numbers = #tpu.dot_dimension_numbers<[1], [1], [0], [0], [0, 0, 1, 0], [], []>} : vector<2x64xbf16>, vector<2x64xbf16>, vector<2x2xf32> -> vector<2x2xf32>
    %cst_50 = arith.constant dense<0xFF800000> : vector<2xf32>
    %193 = vector.multi_reduction <maximumf>, %192, %cst_50 [1] : vector<2x2xf32> to vector<2xf32>
    %194 = vector.shape_cast %193 : vector<2xf32> to vector<2x1xf32>
    %195 = vector.broadcast %194 : vector<2x1xf32> to vector<2x2xf32>
    %196 = arith.subf %192, %195 : vector<2x2xf32>
    %197 = math.exp %196 : vector<2x2xf32>
    %cst_51 = arith.constant dense<0.000000e+00> : vector<2xf32>
    %198 = vector.multi_reduction <add>, %197, %cst_51 [1] : vector<2x2xf32> to vector<2xf32>
    %199 = vector.shape_cast %198 : vector<2xf32> to vector<2x1xf32>
    %200 = tpu.reciprocal %199 {approx = true} : vector<2x1xf32> -> vector<2x1xf32>
    %201 = vector.broadcast %200 : vector<2x1xf32> to vector<2x2xf32>
    %202 = arith.mulf %197, %201 : vector<2x2xf32>
    %203 = arith.truncf %202 : vector<2x2xf32> to vector<2x2xbf16>
    %cst_52 = arith.constant dense<0.000000e+00> : vector<2x64xf32>
    %204 = tpu.matmul %203, %191, %cst_52 {dimension_numbers = #tpu.dot_dimension_numbers<[1], [0], [0], [1], [0, 0, 1, 1], [], []>} : vector<2x2xbf16>, vector<2x64xbf16>, vector<2x64xf32> -> vector<2x64xf32>
    %205 = arith.truncf %204 : vector<2x64xf32> to vector<2x64xbf16>
    %206 = vector.extract_strided_slice %7 {offsets = [64, 0], sizes = [64, 1024], strides = [1, 1]} : vector<192x1024xbf16> to vector<64x1024xbf16>
    %cst_53 = arith.constant dense<0.000000e+00> : vector<2x1024xf32>
    %207 = tpu.matmul %205, %206, %cst_53 {dimension_numbers = #tpu.dot_dimension_numbers<[1], [0], [0], [1], [0, 0, 1, 1], [], []>} : vector<2x64xbf16>, vector<64x1024xbf16>, vector<2x1024xf32> -> vector<2x1024xf32>
    %208 = arith.addf %185, %207 : vector<2x1024xf32>
    %209 = vector.extract_strided_slice %162 {offsets = [0, 128], sizes = [2, 64], strides = [1, 1]} : vector<2x576xf32> to vector<2x64xf32>
    %210 = arith.truncf %209 : vector<2x64xf32> to vector<2x64xbf16>
    %211 = vector.extract_strided_slice %162 {offsets = [0, 320], sizes = [2, 64], strides = [1, 1]} : vector<2x576xf32> to vector<2x64xf32>
    %212 = arith.truncf %211 : vector<2x64xf32> to vector<2x64xbf16>
    %213 = vector.extract_strided_slice %162 {offsets = [0, 512], sizes = [2, 64], strides = [1, 1]} : vector<2x576xf32> to vector<2x64xf32>
    %214 = arith.truncf %213 : vector<2x64xf32> to vector<2x64xbf16>
    %cst_54 = arith.constant dense<0.000000e+00> : vector<2x2xf32>
    %215 = tpu.matmul %210, %212, %cst_54 {dimension_numbers = #tpu.dot_dimension_numbers<[1], [1], [0], [0], [0, 0, 1, 0], [], []>} : vector<2x64xbf16>, vector<2x64xbf16>, vector<2x2xf32> -> vector<2x2xf32>
    %cst_55 = arith.constant dense<0xFF800000> : vector<2xf32>
    %216 = vector.multi_reduction <maximumf>, %215, %cst_55 [1] : vector<2x2xf32> to vector<2xf32>
    %217 = vector.shape_cast %216 : vector<2xf32> to vector<2x1xf32>
    %218 = vector.broadcast %217 : vector<2x1xf32> to vector<2x2xf32>
    %219 = arith.subf %215, %218 : vector<2x2xf32>
    %220 = math.exp %219 : vector<2x2xf32>
    %cst_56 = arith.constant dense<0.000000e+00> : vector<2xf32>
    %221 = vector.multi_reduction <add>, %220, %cst_56 [1] : vector<2x2xf32> to vector<2xf32>
    %222 = vector.shape_cast %221 : vector<2xf32> to vector<2x1xf32>
    %223 = tpu.reciprocal %222 {approx = true} : vector<2x1xf32> -> vector<2x1xf32>
    %224 = vector.broadcast %223 : vector<2x1xf32> to vector<2x2xf32>
    %225 = arith.mulf %220, %224 : vector<2x2xf32>
    %226 = arith.truncf %225 : vector<2x2xf32> to vector<2x2xbf16>
    %cst_57 = arith.constant dense<0.000000e+00> : vector<2x64xf32>
    %227 = tpu.matmul %226, %214, %cst_57 {dimension_numbers = #tpu.dot_dimension_numbers<[1], [0], [0], [1], [0, 0, 1, 1], [], []>} : vector<2x2xbf16>, vector<2x64xbf16>, vector<2x64xf32> -> vector<2x64xf32>
    %228 = arith.truncf %227 : vector<2x64xf32> to vector<2x64xbf16>
    %229 = vector.extract_strided_slice %7 {offsets = [128, 0], sizes = [64, 1024], strides = [1, 1]} : vector<192x1024xbf16> to vector<64x1024xbf16>
    %cst_58 = arith.constant dense<0.000000e+00> : vector<2x1024xf32>
    %230 = tpu.matmul %228, %229, %cst_58 {dimension_numbers = #tpu.dot_dimension_numbers<[1], [0], [0], [1], [0, 0, 1, 1], [], []>} : vector<2x64xbf16>, vector<64x1024xbf16>, vector<2x1024xf32> -> vector<2x1024xf32>
    %231 = arith.addf %208, %230 : vector<2x1024xf32>
    %232 = arith.addf %163, %231 : vector<2x1024xf32>
    %233 = vector.broadcast %11 : vector<1x1024xf32> to vector<2x1024xf32>
    %234 = arith.addf %232, %233 : vector<2x1024xf32>
    %235 = tpu.concatenate %88, %161, %234 in 0 : vector<2x1024xf32>, vector<2x1024xf32>, vector<2x1024xf32> -> vector<6x1024xf32>
    %c0_59 = arith.constant 0 : index
    %c0_60 = arith.constant 0 : index
    %236 = vector.load %arg9[%c0_59, %c0_60] : memref<6x1024xf32, #tpu.memory_space<vmem>>, vector<6x1024xf32>
    tpu.vector_store %arg9[%c0_59, %c0_60], %235 {strides = array<i32>} : memref<6x1024xf32, #tpu.memory_space<vmem>>, vector<6x1024xf32>,
    %c3_i32 = arith.constant 3 : i32
    %237 = arith.cmpi eq, %arg0, %c3_i32 : i32
    %238 = arith.extui %237 : i1 to i32
    %c0_i32_61 = arith.constant 0 : i32
    %239 = arith.cmpi ne, %238, %c0_i32_61 : i32
    scf.if %239 {
      %c0_62 = arith.constant 0 : index
      %c0_63 = arith.constant 0 : index
      %240 = vector.load %arg7[%c0_62, %c0_63] : memref<1x128xf32, #tpu.memory_space<vmem>>, vector<1x128xf32>
      %241 = arith.truncf %88 : vector<2x1024xf32> to vector<2x1024xbf16>
      %c0_64 = arith.constant 0 : index
      %c0_65 = arith.constant 0 : index
      %c0_66 = arith.constant 0 : index
      %242 = vector.load %arg6[%c0_64, %c0_65, %c0_66] : memref<3x1024x128xbf16, #tpu.memory_space<vmem>>, vector<1x1024x128xbf16>
      %243 = vector.shape_cast %242 : vector<1x1024x128xbf16> to vector<1024x128xbf16>
      %cst_67 = arith.constant dense<0.000000e+00> : vector<2x128xf32>
      %244 = tpu.matmul %241, %243, %cst_67 {dimension_numbers = #tpu.dot_dimension_numbers<[1], [0], [0], [1], [0, 0, 1, 1], [], []>} : vector<2x1024xbf16>, vector<1024x128xbf16>, vector<2x128xf32> -> vector<2x128xf32>
      %245 = vector.broadcast %240 : vector<1x128xf32> to vector<2x128xf32>
      %246 = arith.addf %245, %244 : vector<2x128xf32>
      %247 = arith.truncf %161 : vector<2x1024xf32> to vector<2x1024xbf16>
      %c1 = arith.constant 1 : index
      %c0_68 = arith.constant 0 : index
      %c0_69 = arith.constant 0 : index
      %248 = vector.load %arg6[%c1, %c0_68, %c0_69] : memref<3x1024x128xbf16, #tpu.memory_space<vmem>>, vector<1x1024x128xbf16>
      %249 = vector.shape_cast %248 : vector<1x1024x128xbf16> to vector<1024x128xbf16>
      %cst_70 = arith.constant dense<0.000000e+00> : vector<2x128xf32>
      %250 = tpu.matmul %247, %249, %cst_70 {dimension_numbers = #tpu.dot_dimension_numbers<[1], [0], [0], [1], [0, 0, 1, 1], [], []>} : vector<2x1024xbf16>, vector<1024x128xbf16>, vector<2x128xf32> -> vector<2x128xf32>
      %251 = arith.addf %246, %250 : vector<2x128xf32>
      %252 = arith.truncf %234 : vector<2x1024xf32> to vector<2x1024xbf16>
      %c2 = arith.constant 2 : index
      %c0_71 = arith.constant 0 : index
      %c0_72 = arith.constant 0 : index
      %253 = vector.load %arg6[%c2, %c0_71, %c0_72] : memref<3x1024x128xbf16, #tpu.memory_space<vmem>>, vector<1x1024x128xbf16>
      %254 = vector.shape_cast %253 : vector<1x1024x128xbf16> to vector<1024x128xbf16>
      %cst_73 = arith.constant dense<0.000000e+00> : vector<2x128xf32>
      %255 = tpu.matmul %252, %254, %cst_73 {dimension_numbers = #tpu.dot_dimension_numbers<[1], [0], [0], [1], [0, 0, 1, 1], [], []>} : vector<2x1024xbf16>, vector<1024x128xbf16>, vector<2x128xf32> -> vector<2x128xf32>
      %256 = arith.addf %251, %255 : vector<2x128xf32>
      %257 = tpu.iota {dimensions = array<i32: 1>} : vector<2x128xi32>
      %c10_i32 = arith.constant 10 : i32
      %258 = vector.broadcast %c10_i32 : i32 to vector<2x128xi32>
      %259 = arith.cmpi slt, %257, %258 : vector<2x128xi32>
      %cst_74 = arith.constant -1.000000e+30 : f32
      %260 = vector.broadcast %cst_74 : f32 to vector<2x128xf32>
      %261 = arith.select %259, %256, %260 : vector<2x128xi1>, vector<2x128xf32>
      %cst_75 = arith.constant dense<0xFF800000> : vector<2xf32>
      %262 = vector.multi_reduction <maximumf>, %261, %cst_75 [1] : vector<2x128xf32> to vector<2xf32>
      %263 = vector.shape_cast %262 : vector<2xf32> to vector<2x1xf32>
      %264 = vector.broadcast %263 : vector<2x1xf32> to vector<2x128xf32>
      %265 = arith.subf %261, %264 : vector<2x128xf32>
      %266 = math.exp %265 : vector<2x128xf32>
      %cst_76 = arith.constant dense<0.000000e+00> : vector<2xf32>
      %267 = vector.multi_reduction <add>, %266, %cst_76 [1] : vector<2x128xf32> to vector<2xf32>
      %268 = vector.shape_cast %267 : vector<2xf32> to vector<2x1xf32>
      %269 = math.log %268 : vector<2x1xf32>
      %270 = vector.broadcast %269 : vector<2x1xf32> to vector<2x128xf32>
      %271 = arith.subf %265, %270 : vector<2x128xf32>
      %c0_77 = arith.constant 0 : index
      %c0_78 = arith.constant 0 : index
      %272 = vector.load %arg8[%c0_77, %c0_78] : memref<2x128xf32, #tpu.memory_space<vmem>>, vector<2x128xf32>
      tpu.vector_store %arg8[%c0_77, %c0_78], %271 {strides = array<i32>} : memref<2x128xf32, #tpu.memory_space<vmem>>, vector<2x128xf32>,
    } else {
    }
    return
  }
  func.func @transform_0(%arg0: i32) -> (i32, i32) {
    %c0_i32 = arith.constant 0 : i32
    %c0_i32_0 = arith.constant 0 : i32
    %c0_i32_1 = arith.constant 0 : i32
    return %c0_i32, %c0_i32_0 : i32, i32
  }
  func.func @transform_1(%arg0: i32) -> (i32, i32, i32) {
    %c0_i32 = arith.constant 0 : i32
    %c0_i32_0 = arith.constant 0 : i32
    %c0_i32_1 = arith.constant 0 : i32
    return %arg0, %c0_i32, %c0_i32_0 : i32, i32, i32
  }
  func.func @transform_2(%arg0: i32) -> (i32, i32, i32) {
    %c0_i32 = arith.constant 0 : i32
    %c0_i32_0 = arith.constant 0 : i32
    %c0_i32_1 = arith.constant 0 : i32
    return %arg0, %c0_i32, %c0_i32_0 : i32, i32, i32
  }
  func.func @transform_3(%arg0: i32) -> (i32, i32, i32) {
    %c0_i32 = arith.constant 0 : i32
    %c0_i32_0 = arith.constant 0 : i32
    %c0_i32_1 = arith.constant 0 : i32
    return %arg0, %c0_i32, %c0_i32_0 : i32, i32, i32
  }
  func.func @transform_4(%arg0: i32) -> (i32, i32, i32) {
    %c0_i32 = arith.constant 0 : i32
    %c0_i32_0 = arith.constant 0 : i32
    %c0_i32_1 = arith.constant 0 : i32
    return %arg0, %c0_i32, %c0_i32_0 : i32, i32, i32
  }
  func.func @transform_5(%arg0: i32) -> (i32, i32, i32) {
    %c0_i32 = arith.constant 0 : i32
    %c0_i32_0 = arith.constant 0 : i32
    %c0_i32_1 = arith.constant 0 : i32
    %c0_i32_2 = arith.constant 0 : i32
    return %c0_i32, %c0_i32_0, %c0_i32_1 : i32, i32, i32
  }
  func.func @transform_6(%arg0: i32) -> (i32, i32) {
    %c0_i32 = arith.constant 0 : i32
    %c0_i32_0 = arith.constant 0 : i32
    %c0_i32_1 = arith.constant 0 : i32
    return %c0_i32, %c0_i32_0 : i32, i32
  }
  func.func @transform_7(%arg0: i32) -> (i32, i32) {
    %c0_i32 = arith.constant 0 : i32
    %c0_i32_0 = arith.constant 0 : i32
    %c0_i32_1 = arith.constant 0 : i32
    return %c0_i32, %c0_i32_0 : i32, i32
  }
}

</mosaic_0001>

<bundles_post_ra>
// kernel: test_net_forward.1
= control target key start
LH: loop header
LB: loop body
LE: loop exit
PB: predicated region body
PF: predicated region fallthrough
CT: control target
= control target key end

     0   :  { %12 = vsyncpa [#allocation4], 0  ;;  %s10734_s24 = smov 0   ;;  %s13329_s0 = inlined_call_operand.vmem [shape: bf16[6,1024], index: 0, kind: input, shape index: {}]   ;;  %s13330_s1 = inlined_call_operand.vmem [shape: bf16[4,1024,576], index: 1, kind: input, shape index: {}]   ;;  %s13331_s2 = inlined_call_operand.vmem [shape: f32[4,1,576], index: 2, kind: input, shape index: {}]   ;;  %s13332_s3 = inlined_call_operand.vmem [shape: bf16[4,192,1024], index: 3, kind: input, shape index: {}]   ;;  %s13333_s4 = inlined_call_operand.vmem [shape: f32[4,1,1024], index: 4, kind: input, shape index: {}]   ;;  %s13334_s5 = inlined_call_operand.vmem [shape: bf16[3,1024,128], index: 5, kind: input, shape index: {}]   ;;  %s13335_s6 = inlined_call_operand.vmem [shape: f32[1,128], index: 6, kind: input, shape index: {}]   ;;  %s13336_s7 = inlined_call_operand.hbm [shape: f32[2,128], index: 7, kind: output, shape index: {}]  }
   0x1 LB: > { %s10740_s25 = sadd.s32 4294967295, %s10690_s24   ;;  %p7187_p0 = scmp.ge.s32.totalorder %s10690_s24, 1  ;;  %s10690_s24 = sphi %s10734_s24, %s18_s24  }
   0x2   : > { %p261_p1 = scmp.lt.s32.totalorder %s10690_s24, 5 }
   0x4   : > { %p262_p2 = pnand %p7187_p0, %p261_p1 }
   0x6   : > { %265 = sbr.rel (%p262_p2) target bundleno = 4495 (0x118f), region = 48 }
   0xb   : > { %p301_p3 = scmp.lt.s32.totalorder %s10740_s25, 3  ;;  %p7191_p4 = scmp.ne.s32.totalorder %s10740_s25, 0 }
   0xd   : > { %s302_s26 = scalar_select %p301_p3, %s10740_s25, 3 }
   0xf   : > { %s10583_s27 = smul.u32 2560, %s302_s26  ;;  %s7190_s28 = sshll.u32 %s302_s26, 3 }
  0x10   : > { %s10584_s29 = smul.u32 5, %s302_s26  ;;  %s10749_s9 = scalar_lea.vmem %s13333_s4, %s7190_s28 }
  0x11   : > { %s10754_s12 = scalar_lea.vmem %s13330_s1, %s10583_s27  ;;  %s10585_s13 = smul.u32 768, %s302_s26 }
  0x12   : > { %s10759_s16 = scalar_lea.vmem %s13331_s2, %s10584_s29  ;;  %323 = sbr.rel (%p7191_p4) target bundleno = 34 (0x22), region = 52 }
  0x13   : > { %s10764_s19 = scalar_lea.vmem %s13332_s3, %s10585_s13 }
  0x17   : > { %v324_v0 = vld [vmem:[%s13329_s0] sm:$0x77]  ;;  %v325_v1 = vld [vmem:[%s13329_s0 + $0x8] sm:$0x77]  ;;  %v326_v2 = vld [vmem:[%s13329_s0 + $0x10] sm:$0x77] }
  0x18   : > { %v328_v3 = vunpack.c.l.bf16 %v324_v0  ;;  %v329_v4 = vunpack.c.h.bf16 %v324_v0  ;;  %v330_v5 = vunpack.c.l.bf16 %v325_v1  ;;  %v331_v6 = vunpack.c.h.bf16 %v325_v1  ;;  %v327_v7 = vld [vmem:[%s13329_s0 + $0x18] sm:$0x77] }
  0x19   : > { %v332_v8 = vunpack.c.l.bf16 %v326_v2  ;;  %v333_v9 = vunpack.c.h.bf16 %v326_v2  ;;  %v334_v10 = vunpack.c.l.bf16 %v327_v7  ;;  %v335_v11 = vunpack.c.h.bf16 %v327_v7 }
  0x1a   : > { %336 = vst [vmem:[#allocation2 + $0x30] sm:$0x3f] %v328_v3 }
  0x1b   : > { %337 = vst [vmem:[#allocation2] sm:$0x3f] %v329_v4 }
  0x1c   : > { %338 = vst [vmem:[#allocation2 + $0x18] sm:$0x3f] %v330_v5 }
  0x1d   : > { %339 = vst [vmem:[#allocation2 + $0x10] sm:$0x3f] %v331_v6 }
  0x1e   : > { %340 = vst [vmem:[#allocation2 + $0x8] sm:$0x3f] %v332_v8 }
  0x1f   : > { %341 = vst [vmem:[#allocation2 + $0x20] sm:$0x3f] %v333_v9 }
  0x20   : > { %342 = vst [vmem:[#allocation2 + $0x28] sm:$0x3f] %v334_v10 }
  0x21   : > { %343 = vst [vmem:[#allocation2 + $0x38] sm:$0x3f] %v335_v11 }
  0x22 PF: > { %v7334_v12 = vld [vmem:[%s10754_s12 + $0x118] sm:$0xf]  ;;  %v10012_v13 = vld [vmem:[%s10754_s12 + $0x128] sm:$0xf0]  ;;  %v7314_v23 = vld [vmem:[%s10754_s12 + $0xf0] sm:$0xf] }
  0x23   : > { %v7494_v14 = vld [vmem:[%s10754_s12 + $0x258] sm:$0xf]  ;;  %v7335_v15 = vor.u32 %v10012_v13, %v7334_v12  ;;  %v10052_v16 = vld [vmem:[%s10754_s12 + $0x268] sm:$0xf0]  ;;  %v10007_v25 = vld [vmem:[%s10754_s12 + $0x100] sm:$0xf0] }
  0x24   : > { %v7654_v17 = vld [vmem:[%s10754_s12 + $0x398] sm:$0xf]  ;;  %v10092_v18 = vld [vmem:[%s10754_s12 + $0x3a8] sm:$0xf0]  ;;  %v7495_v19 = vor.u32 %v10052_v16, %v7494_v14  ;;  %v7474_v26 = vld [vmem:[%s10754_s12 + $0x230] sm:$0xf]  ;;  %v7315_v28 = vor.u32 %v10007_v25, %v7314_v23 }
  0x25   : > { %v7655_v20 = vor.u32 %v10092_v18, %v7654_v17  ;;  %v7814_v21 = vld [vmem:[%s10754_s12 + $0x4d8] sm:$0xf]  ;;  %v10132_v22 = vld [vmem:[%s10754_s12 + $0x4e8] sm:$0xf0]  ;;  %2517 = vmatpush.bf16.msra.mxu0 %v7335_v15  ;;  %v10047_v27 = vld [vmem:[%s10754_s12 + $0x240] sm:$0xf0] }
  0x26   : > { %v7815_v24 = vor.u32 %v10132_v22, %v7814_v21  ;;  %2530 = vmatpush.bf16.msra.mxu1 %v7495_v19  ;;  %v7475_v29 = vor.u32 %v10047_v27, %v7474_v26  ;;  %v7634_v30 = vld [vmem:[%s10754_s12 + $0x370] sm:$0xf]  ;;  %v10087_v31 = vld [vmem:[%s10754_s12 + $0x380] sm:$0xf0]  ;;  %v7294_v35 = vld [vmem:[%s10754_s12 + $0xc8] sm:$0xf] }
  0x27   : > { %2543 = vmatpush.bf16.msra.mxu2 %v7655_v20  ;;  %v7794_v32 = vld [vmem:[%s10754_s12 + $0x4b0] sm:$0xf]  ;;  %v7635_v33 = vor.u32 %v10087_v31, %v7634_v30  ;;  %v10127_v34 = vld [vmem:[%s10754_s12 + $0x4c0] sm:$0xf0]  ;;  %v10002_v36 = vld [vmem:[%s10754_s12 + $0xd8] sm:$0xf0] }
  0x28   : > { %2556 = vmatpush.bf16.msra.mxu3 %v7815_v24  ;;  %v7795_v37 = vor.u32 %v10127_v34, %v7794_v32  ;;  %v7454_v38 = vld [vmem:[%s10754_s12 + $0x208] sm:$0xf]  ;;  %v10042_v39 = vld [vmem:[%s10754_s12 + $0x218] sm:$0xf0]  ;;  %v7295_v41 = vor.u32 %v10002_v36, %v7294_v35  ;;  %v7274_v47 = vld [vmem:[%s10754_s12 + $0xa0] sm:$0xf] }
  0x29   : > { %v7614_v40 = vld [vmem:[%s10754_s12 + $0x348] sm:$0xf]  ;;  %2518 = vmatpush.bf16.msra.mxu0 %v7315_v28  ;;  %v10082_v42 = vld [vmem:[%s10754_s12 + $0x358] sm:$0xf0]  ;;  %v7455_v45 = vor.u32 %v10042_v39, %v7454_v38  ;;  %v9997_v48 = vld [vmem:[%s10754_s12 + $0xb0] sm:$0xf0] }
  0x2a   : > { %v7774_v43 = vld [vmem:[%s10754_s12 + $0x488] sm:$0xf]  ;;  %v10122_v44 = vld [vmem:[%s10754_s12 + $0x498] sm:$0xf0]  ;;  %2531 = vmatpush.bf16.msra.mxu1 %v7475_v29  ;;  %v7615_v46 = vor.u32 %v10082_v42, %v7614_v40  ;;  %v7434_v49 = vld [vmem:[%s10754_s12 + $0x1e0] sm:$0xf]  ;;  %v7275_v56 = vor.u32 %v9997_v48, %v7274_v47 }
  0x2b   : > { %2544 = vmatpush.bf16.msra.mxu2 %v7635_v33  ;;  %v7775_v50 = vor.u32 %v10122_v44, %v7774_v43  ;;  %v10037_v51 = vld [vmem:[%s10754_s12 + $0x1f0] sm:$0xf0]  ;;  %v7594_v52 = vld [vmem:[%s10754_s12 + $0x320] sm:$0xf]  ;;  %v7254_v59 = vld [vmem:[%s10754_s12 + $0x78] sm:$0xf] }
  0x2c   : > { %2557 = vmatpush.bf16.msra.mxu3 %v7795_v37  ;;  %v10077_v53 = vld [vmem:[%s10754_s12 + $0x330] sm:$0xf0]  ;;  %v7754_v54 = vld [vmem:[%s10754_s12 + $0x460] sm:$0xf]  ;;  %v7435_v57 = vor.u32 %v10037_v51, %v7434_v49  ;;  %v9992_v60 = vld [vmem:[%s10754_s12 + $0x88] sm:$0xf0] }
  0x2d   : > { %v10117_v55 = vld [vmem:[%s10754_s12 + $0x470] sm:$0xf0]  ;;  %2519 = vmatpush.bf16.msra.mxu0 %v7295_v41  ;;  %v7595_v58 = vor.u32 %v10077_v53, %v7594_v52  ;;  %v7414_v61 = vld [vmem:[%s10754_s12 + $0x1b8] sm:$0xf]  ;;  %v10032_v63 = vld [vmem:[%s10754_s12 + $0x1c8] sm:$0xf0]  ;;  %v7255_v4 = vor.u32 %v9992_v60, %v7254_v59 }
  0x2e   : > { %2532 = vmatpush.bf16.msra.mxu1 %v7455_v45  ;;  %v7755_v62 = vor.u32 %v10117_v55, %v7754_v54  ;;  %v7574_v0 = vld [vmem:[%s10754_s12 + $0x2f8] sm:$0xf]  ;;  %v10072_v1 = vld [vmem:[%s10754_s12 + $0x308] sm:$0xf0]  ;;  %v7415_v5 = vor.u32 %v10032_v63, %v7414_v61  ;;  %v7234_v7 = vld [vmem:[%s10754_s12 + $0x50] sm:$0xf] }
  0x2f   : > { %2545 = vmatpush.bf16.msra.mxu2 %v7615_v46  ;;  %v7734_v2 = vld [vmem:[%s10754_s12 + $0x438] sm:$0xf]  ;;  %v10112_v3 = vld [vmem:[%s10754_s12 + $0x448] sm:$0xf0]  ;;  %v7575_v6 = vor.u32 %v10072_v1, %v7574_v0  ;;  %v9987_v8 = vld [vmem:[%s10754_s12 + $0x60] sm:$0xf0] }
  0x30   : > { %2558 = vmatpush.bf16.msra.mxu3 %v7775_v50  ;;  %v7394_v9 = vld [vmem:[%s10754_s12 + $0x190] sm:$0xf]  ;;  %v7735_v10 = vor.u32 %v10112_v3, %v7734_v2  ;;  %v10027_v11 = vld [vmem:[%s10754_s12 + $0x1a0] sm:$0xf0]  ;;  %v7235_v16 = vor.u32 %v9987_v8, %v7234_v7  ;;  %v7214_v19 = vld [vmem:[%s10754_s12 + $0x28] sm:$0xf] }
  0x31   : > { %2520 = vmatpush.bf16.msra.mxu0 %v7275_v56  ;;  %v7554_v12 = vld [vmem:[%s10754_s12 + $0x2d0] sm:$0xf]  ;;  %v10067_v13 = vld [vmem:[%s10754_s12 + $0x2e0] sm:$0xf0]  ;;  %v7395_v17 = vor.u32 %v10027_v11, %v7394_v9  ;;  %v9982_v20 = vld [vmem:[%s10754_s12 + $0x38] sm:$0xf0] }
  0x32   : > { %2533 = vmatpush.bf16.msra.mxu1 %v7435_v57  ;;  %v7714_v14 = vld [vmem:[%s10754_s12 + $0x410] sm:$0xf]  ;;  %v10107_v15 = vld [vmem:[%s10754_s12 + $0x420] sm:$0xf0]  ;;  %v7555_v18 = vor.u32 %v10067_v13, %v7554_v12  ;;  %v7374_v21 = vld [vmem:[%s10754_s12 + $0x168] sm:$0xf]  ;;  %v7215_v28 = vor.u32 %v9982_v20, %v7214_v19 }
  0x33   : > { %2546 = vmatpush.bf16.msra.mxu2 %v7595_v58  ;;  %v7715_v22 = vor.u32 %v10107_v15, %v7714_v14  ;;  %v10022_v23 = vld [vmem:[%s10754_s12 + $0x178] sm:$0xf0]  ;;  %v7534_v24 = vld [vmem:[%s10754_s12 + $0x2a8] sm:$0xf]  ;;  %v7194_v29 = vld [vmem:[%s10754_s12] sm:$0xf] }
  0x34   : > { %2559 = vmatpush.bf16.msra.mxu3 %v7755_v62  ;;  %v10062_v25 = vld [vmem:[%s10754_s12 + $0x2b8] sm:$0xf0]  ;;  %v7694_v26 = vld [vmem:[%s10754_s12 + $0x3e8] sm:$0xf]  ;;  %v9977_v30 = vld [vmem:[%s10754_s12 + $0x10] sm:$0xf0]  ;;  %v7375_v31 = vor.u32 %v10022_v23, %v7374_v21 }
  0x35   : > { %2521 = vmatpush.bf16.msra.mxu0 %v7255_v4  ;;  %v10102_v27 = vld [vmem:[%s10754_s12 + $0x3f8] sm:$0xf0]  ;;  %v7535_v32 = vor.u32 %v10062_v25, %v7534_v24  ;;  %v7354_v33 = vld [vmem:[%s10754_s12 + $0x140] sm:$0xf]  ;;  %v10017_v34 = vld [vmem:[%s10754_s12 + $0x150] sm:$0xf0]  ;;  %v7195_v43 = vor.u32 %v9977_v30, %v7194_v29 }
  0x36   : > { %2534 = vmatpush.bf16.msra.mxu1 %v7415_v5  ;;  %v7514_v35 = vld [vmem:[%s10754_s12 + $0x280] sm:$0xf]  ;;  %v7695_v36 = vor.u32 %v10102_v27, %v7694_v26  ;;  %v10057_v37 = vld [vmem:[%s10754_s12 + $0x290] sm:$0xf0]  ;;  %v7974_v40 = vld [vmem:[%s10754_s12 + $0x618] sm:$0xf]  ;;  %v7355_v47 = vor.u32 %v10017_v34, %v7354_v33 }
  0x37   : > { %2547 = vmatpush.bf16.msra.mxu2 %v7575_v6  ;;  %v7674_v38 = vld [vmem:[%s10754_s12 + $0x3c0] sm:$0xf]  ;;  %v10097_v39 = vld [vmem:[%s10754_s12 + $0x3d0] sm:$0xf0]  ;;  %v10172_v41 = vld [vmem:[%s10754_s12 + $0x628] sm:$0xf0]  ;;  %v7515_v48 = vor.u32 %v10057_v37, %v7514_v35 }
  0x38   : > { %2560 = vmatpush.bf16.msra.mxu3 %v7735_v10  ;;  %v8134_v42 = vld [vmem:[%s10754_s12 + $0x758] sm:$0xf]  ;;  %v10212_v44 = vld [vmem:[%s10754_s12 + $0x768] sm:$0xf0]  ;;  %v7675_v51 = vor.u32 %v10097_v39, %v7674_v38  ;;  %v7975_v52 = vor.u32 %v10172_v41, %v7974_v40  ;;  %v7954_v55 = vld [vmem:[%s10754_s12 + $0x5f0] sm:$0xf] }
  0x39   : > { %2522 = vmatpush.bf16.msra.mxu0 %v7235_v16  ;;  %v8294_v45 = vld [vmem:[%s10754_s12 + $0x898] sm:$0xf]  ;;  %v10252_v46 = vld [vmem:[%s10754_s12 + $0x8a8] sm:$0xf0]  ;;  %v8135_v53 = vor.u32 %v10212_v44, %v8134_v42  ;;  %v10167_v56 = vld [vmem:[%s10754_s12 + $0x600] sm:$0xf0] }
  0x3a   : > { %2535 = vmatpush.bf16.msra.mxu1 %v7395_v17  ;;  %v8454_v49 = vld [vmem:[%s10754_s12 + $0x9d8] sm:$0xf]  ;;  %v10292_v50 = vld [vmem:[%s10754_s12 + $0x9e8] sm:$0xf0]  ;;  %v8295_v54 = vor.u32 %v10252_v46, %v8294_v45  ;;  %v8114_v57 = vld [vmem:[%s10754_s12 + $0x730] sm:$0xf]  ;;  %v7955_v0 = vor.u32 %v10167_v56, %v7954_v55 }
  0x3b   : > { %2548 = vmatpush.bf16.msra.mxu2 %v7555_v18  ;;  %v8455_v58 = vor.u32 %v10292_v50, %v8454_v49  ;;  %v10207_v59 = vld [vmem:[%s10754_s12 + $0x740] sm:$0xf0]  ;;  %v8274_v60 = vld [vmem:[%s10754_s12 + $0x870] sm:$0xf]  ;;  %v7934_v1 = vld [vmem:[%s10754_s12 + $0x5c8] sm:$0xf] }
  0x3c   : > { %2561 = vmatpush.bf16.msra.mxu3 %v7715_v22  ;;  %v10247_v61 = vld [vmem:[%s10754_s12 + $0x880] sm:$0xf0]  ;;  %v8434_v62 = vld [vmem:[%s10754_s12 + $0x9b0] sm:$0xf]  ;;  %v8115_v2 = vor.u32 %v10207_v59, %v8114_v57  ;;  %v10162_v4 = vld [vmem:[%s10754_s12 + $0x5d8] sm:$0xf0] }
  0x3d   : > { %2523 = vmatpush.bf16.msra.mxu0 %v7215_v28  ;;  %v10287_v63 = vld [vmem:[%s10754_s12 + $0x9c0] sm:$0xf0]  ;;  %v8275_v3 = vor.u32 %v10247_v61, %v8274_v60  ;;  %v8094_v5 = vld [vmem:[%s10754_s12 + $0x708] sm:$0xf]  ;;  %v10202_v6 = vld [vmem:[%s10754_s12 + $0x718] sm:$0xf0]  ;;  %v7935_v12 = vor.u32 %v10162_v4, %v7934_v1 }
  0x3e   : > { %2536 = vmatpush.bf16.msra.mxu1 %v7375_v31  ;;  %v8435_v7 = vor.u32 %v10287_v63, %v8434_v62  ;;  %v8254_v8 = vld [vmem:[%s10754_s12 + $0x848] sm:$0xf]  ;;  %v10242_v9 = vld [vmem:[%s10754_s12 + $0x858] sm:$0xf0]  ;;  %v8095_v13 = vor.u32 %v10202_v6, %v8094_v5  ;;  %v7914_v14 = vld [vmem:[%s10754_s12 + $0x5a0] sm:$0xf] }
  0x3f   : > { %2549 = vmatpush.bf16.msra.mxu2 %v7535_v32  ;;  %v8414_v10 = vld [vmem:[%s10754_s12 + $0x988] sm:$0xf]  ;;  %v10282_v11 = vld [vmem:[%s10754_s12 + $0x998] sm:$0xf0]  ;;  %v344_v16 = vld [vmem:[#allocation2 + $0x30] sm:$0x3f]  ;;  %v8255_v17 = vor.u32 %v10242_v9, %v8254_v8 }
  0x40   : > { %2562 = vmatpush.bf16.msra.mxu3 %v7695_v36  ;;  %v346_v15 = vld [vmem:[#allocation2 + $0x18] sm:$0x3f]  ;;  %v10157_v18 = vld [vmem:[%s10754_s12 + $0x5b0] sm:$0xf0]  ;;  %v8074_v19 = vld [vmem:[%s10754_s12 + $0x6e0] sm:$0xf]  ;;  %v10872_v21 = vpack.c.bf16 %v344_v16, %v344_v16  ;;  %v8415_v23 = vor.u32 %v10282_v11, %v8414_v10 }
  0x41   : > { %2524 = vmatpush.bf16.msra.mxu0 %v7195_v43  ;;  %v10870_v20 = vpack.c.bf16 %v346_v15, %v346_v15  ;;  %v347_v22 = vld [vmem:[#allocation2 + $0x10] sm:$0x3f]  ;;  %v8234_v25 = vld [vmem:[%s10754_s12 + $0x820] sm:$0xf]  ;;  %v7915_v30 = vor.u32 %v10157_v18, %v7914_v14  ;;  %v7894_v34 = vld [vmem:[%s10754_s12 + $0x578] sm:$0xf] }
  0x42   : > { %2537 = vmatpush.bf16.msra.mxu1 %v7355_v47  ;;  %v10197_v24 = vld [vmem:[%s10754_s12 + $0x6f0] sm:$0xf0]  ;;  %v10877_v27 = vpack.c.bf16 %v347_v22, %v347_v22  ;;  %v8394_v28 = vld [vmem:[%s10754_s12 + $0x960] sm:$0xf]  ;;  %v10152_v35 = vld [vmem:[%s10754_s12 + $0x588] sm:$0xf0] }
  0x43   : > { %2550 = vmatpush.bf16.msra.mxu2 %v7515_v48  ;;  %v10237_v26 = vld [vmem:[%s10754_s12 + $0x830] sm:$0xf0]  ;;  %v345_v31 = vld [vmem:[#allocation2] sm:$0x3f]  ;;  %v8075_v32 = vor.u32 %v10197_v24, %v8074_v19  ;;  %v8054_v36 = vld [vmem:[%s10754_s12 + $0x6b8] sm:$0xf]  ;;  %v7895_v44 = vor.u32 %v10152_v35, %v7894_v34 }
  0x44   : > { %2563 = vmatpush.bf16.msra.mxu3 %v7675_v51  ;;  %v10277_v29 = vld [vmem:[%s10754_s12 + $0x970] sm:$0xf0]  ;;  %2525 = vmatmul.bf16.vlgmr.msra.gmra.mxu0 %v10872_v21  ;;  %v8235_v33 = vor.u32 %v10237_v26, %v8234_v25  ;;  %v10887_v37 = vpack.c.bf16 %v345_v31, %v345_v31  ;;  %v10192_v39 = vld [vmem:[%s10754_s12 + $0x6c8] sm:$0xf0]  ;;  %v8214_v40 = vld [vmem:[%s10754_s12 + $0x7f8] sm:$0xf] }
  0x45   : > { %2569 = vmatpush.bf16.msrb.mxu0 %v7975_v52  ;;  %v8395_v38 = vor.u32 %v10277_v29, %v8394_v28  ;;  %v10232_v41 = vld [vmem:[%s10754_s12 + $0x808] sm:$0xf0]  ;;  %v8374_v42 = vld [vmem:[%s10754_s12 + $0x938] sm:$0xf]  ;;  %v8055_v45 = vor.u32 %v10192_v39, %v8054_v36  ;;  %v7874_v47 = vld [vmem:[%s10754_s12 + $0x550] sm:$0xf] }
  0x46   : > { %2582 = vmatpush.bf16.msrb.mxu1 %v8135_v53  ;;  %2551 = vmatmul.bf16.vlgmr.msra.gmra.mxu2 %v10870_v20  ;;  %v10272_v43 = vld [vmem:[%s10754_s12 + $0x948] sm:$0xf0]  ;;  %v8215_v46 = vor.u32 %v10232_v41, %v8214_v40  ;;  %v10147_v48 = vld [vmem:[%s10754_s12 + $0x560] sm:$0xf0]  ;;  %v8034_v49 = vld [vmem:[%s10754_s12 + $0x690] sm:$0xf] }
  0x47   : > { %2595 = vmatpush.bf16.msrb.mxu2 %v8295_v54  ;;  %2564 = vmatmul.bf16.vlgmr.msra.gmra.mxu3 %v10877_v27  ;;  %v8375_v50 = vor.u32 %v10272_v43, %v8374_v42  ;;  %v10187_v51 = vld [vmem:[%s10754_s12 + $0x6a0] sm:$0xf0]  ;;  %v8194_v52 = vld [vmem:[%s10754_s12 + $0x7d0] sm:$0xf]  ;;  %v7875_v56 = vor.u32 %v10147_v48, %v7874_v47  ;;  %v7854_v59 = vld [vmem:[%s10754_s12 + $0x528] sm:$0xf] }
  0x48   : > { %2608 = vmatpush.bf16.msrb.mxu3 %v8455_v58  ;;  %2538 = vmatmul.bf16.vlgmr.msra.gmra.mxu1 %v10887_v37  ;;  %v10227_v53 = vld [vmem:[%s10754_s12 + $0x7e0] sm:$0xf0]  ;;  %v8354_v54 = vld [vmem:[%s10754_s12 + $0x910] sm:$0xf]  ;;  %v8035_v57 = vor.u32 %v10187_v51, %v8034_v49  ;;  %v10142_v60 = vld [vmem:[%s10754_s12 + $0x538] sm:$0xf0] }
  0x49   : > { %2570 = vmatpush.bf16.msrb.mxu0 %v7955_v0  ;;  %v10267_v55 = vld [vmem:[%s10754_s12 + $0x920] sm:$0xf0]  ;;  %v8195_v58 = vor.u32 %v10227_v53, %v8194_v52  ;;  %v8014_v61 = vld [vmem:[%s10754_s12 + $0x668] sm:$0xf]  ;;  %v10182_v63 = vld [vmem:[%s10754_s12 + $0x678] sm:$0xf0]  ;;  %v7855_v4 = vor.u32 %v10142_v60, %v7854_v59 }
  0x4a   : > { %2583 = vmatpush.bf16.msrb.mxu1 %v8115_v2  ;;  %v8355_v62 = vor.u32 %v10267_v55, %v8354_v54  ;;  %v8174_v0 = vld [vmem:[%s10754_s12 + $0x7a8] sm:$0xf]  ;;  %v10222_v1 = vld [vmem:[%s10754_s12 + $0x7b8] sm:$0xf0]  ;;  %v7834_v5 = vld [vmem:[%s10754_s12 + $0x500] sm:$0xf] }
  0x4b   : > { %2596 = vmatpush.bf16.msrb.mxu2 %v8275_v3  ;;  %v8334_v2 = vld [vmem:[%s10754_s12 + $0x8e8] sm:$0xf]  ;;  %v10262_v3 = vld [vmem:[%s10754_s12 + $0x8f8] sm:$0xf0]  ;;  %v10137_v6 = vld [vmem:[%s10754_s12 + $0x510] sm:$0xf0]  ;;  %v8175_v8 = vor.u32 %v10222_v1, %v8174_v0 }
  0x4c   : > { %2609 = vmatpush.bf16.msrb.mxu3 %v8435_v7  ;;  %v8015_v7 = vor.u32 %v10182_v63, %v8014_v61  ;;  %v7994_v9 = vld [vmem:[%s10754_s12 + $0x640] sm:$0xf]  ;;  %v10177_v10 = vld [vmem:[%s10754_s12 + $0x650] sm:$0xf0]  ;;  %v10010_v16 = vld [vmem:[%s10754_s12 + $0x11c] sm:$0xf]  ;;  %v7835_v19 = vor.u32 %v10137_v6, %v7834_v5 }
  0x4d   : > { %2571 = vmatpush.bf16.msrb.mxu0 %v7935_v12  ;;  %v8154_v11 = vld [vmem:[%s10754_s12 + $0x780] sm:$0xf]  ;;  %v8335_v12 = vor.u32 %v10262_v3, %v8334_v2  ;;  %v10257_v15 = vld [vmem:[%s10754_s12 + $0x8d0] sm:$0xf0]  ;;  %v10050_v18 = vld [vmem:[%s10754_s12 + $0x25c] sm:$0xf]  ;;  %v7995_v25 = vor.u32 %v10177_v10, %v7994_v9 }
  0x4e   : > { %2584 = vmatpush.bf16.msrb.mxu1 %v8095_v13  ;;  %v10217_v13 = vld [vmem:[%s10754_s12 + $0x790] sm:$0xf0]  ;;  %v8314_v14 = vld [vmem:[%s10754_s12 + $0x8c0] sm:$0xf]  ;;  %v7496_v22 = vld [vmem:[%s10754_s12 + $0x26c] sm:$0xf0] }
  0x4f   : > { %2597 = vmatpush.bf16.msrb.mxu2 %v8255_v17  ;;  %v7336_v17 = vld [vmem:[%s10754_s12 + $0x12c] sm:$0xf0]  ;;  %v8155_v26 = vor.u32 %v10217_v13, %v8154_v11  ;;  %v10130_v28 = vld [vmem:[%s10754_s12 + $0x4dc] sm:$0xf]  ;;  %v8315_v31 = vor.u32 %v10257_v15, %v8314_v14  ;;  %v348_v34 = vld [vmem:[#allocation2 + $0x8] sm:$0x3f]  ;;  %v7499_v36 = vor.u32 %v10050_v18, %v7496_v22 }
  0x50   : > { %2610 = vmatpush.bf16.msrb.mxu3 %v8415_v23  ;;  %v10090_v23 = vld [vmem:[%s10754_s12 + $0x39c] sm:$0xf]  ;;  %v7656_v24 = vld [vmem:[%s10754_s12 + $0x3ac] sm:$0xf0]  ;;  %v7316_v39 = vld [vmem:[%s10754_s12 + $0x104] sm:$0xf0]  ;;  %v10937_v49 = vpack.c.bf16 %v348_v34, %v348_v34 }
  0x51   : > { %2572 = vmatpush.bf16.msrb.mxu0 %v7915_v30  ;;  %v7816_v29 = vld [vmem:[%s10754_s12 + $0x4ec] sm:$0xf0]  ;;  %v350_v30 = vld [vmem:[#allocation2 + $0x28] sm:$0x3f]  ;;  %v351_v35 = vld [vmem:[#allocation2 + $0x38] sm:$0x3f] }
  0x52   : > { %2585 = vmatpush.bf16.msrb.mxu1 %v8075_v32  ;;  %v7339_v32 = vor.u32 %v10010_v16, %v7336_v17  ;;  %v10045_v40 = vld [vmem:[%s10754_s12 + $0x234] sm:$0xf]  ;;  %v349_v41 = vld [vmem:[#allocation2 + $0x20] sm:$0x3f]  ;;  %v7819_v42 = vor.u32 %v10130_v28, %v7816_v29  ;;  %v7476_v43 = vld [vmem:[%s10754_s12 + $0x244] sm:$0xf0] }
  0x53   : > { %2598 = vmatpush.bf16.msrb.mxu2 %v8235_v33  ;;  %v10005_v33 = vld [vmem:[%s10754_s12 + $0xf4] sm:$0xf]  ;;  %v7796_v48 = vld [vmem:[%s10754_s12 + $0x4c4] sm:$0xf0]  ;;  %v10941_v52 = vpack.c.bf16 %v349_v41, %v349_v41  ;;  %v7479_v53 = vor.u32 %v10045_v40, %v7476_v43  ;;  %v10000_v55 = vld [vmem:[%s10754_s12 + $0xcc] sm:$0xf] }
  0x54   : > { %2611 = vmatpush.bf16.msrb.mxu3 %v8395_v38  ;;  %v7659_v38 = vor.u32 %v10090_v23, %v7656_v24  ;;  %v10125_v47 = vld [vmem:[%s10754_s12 + $0x4b4] sm:$0xf]  ;;  %v7319_v51 = vor.u32 %v10005_v33, %v7316_v39  ;;  %v7456_v59 = vld [vmem:[%s10754_s12 + $0x21c] sm:$0xf0]  ;;  %v10080_v60 = vld [vmem:[%s10754_s12 + $0x34c] sm:$0xf] }
  0x55   : > { %2573 = vmatpush.bf16.msrb.mxu0 %v7895_v44  ;;  %v10085_v44 = vld [vmem:[%s10754_s12 + $0x374] sm:$0xf]  ;;  %v7616_v61 = vld [vmem:[%s10754_s12 + $0x35c] sm:$0xf0]  ;;  %v9995_v3 = vld [vmem:[%s10754_s12 + $0xa4] sm:$0xf] }
  0x56   : > { %2586 = vmatpush.bf16.msrb.mxu1 %v8055_v45  ;;  %v7636_v45 = vld [vmem:[%s10754_s12 + $0x384] sm:$0xf0]  ;;  %v7776_v63 = vld [vmem:[%s10754_s12 + $0x49c] sm:$0xf0]  ;;  %v7619_v2 = vor.u32 %v10080_v60, %v7616_v61  ;;  %v10035_v5 = vld [vmem:[%s10754_s12 + $0x1e4] sm:$0xf] }
  0x57   : > { %2599 = vmatpush.bf16.msrb.mxu2 %v8215_v46  ;;  %v10933_v46 = vpack.c.bf16 %v350_v30, %v350_v30  ;;  %v7639_v54 = vor.u32 %v10085_v44, %v7636_v45  ;;  %v7596_v9 = vld [vmem:[%s10754_s12 + $0x334] sm:$0xf0]  ;;  %v10115_v10 = vld [vmem:[%s10754_s12 + $0x464] sm:$0xf]  ;;  %v9990_v15 = vld [vmem:[%s10754_s12 + $0x7c] sm:$0xf] }
  0x58   : > { %2612 = vmatpush.bf16.msrb.mxu3 %v8375_v50  ;;  %v10939_v50 = vpack.c.bf16 %v351_v35, %v351_v35  ;;  %v7756_v11 = vld [vmem:[%s10754_s12 + $0x474] sm:$0xf0]  ;;  %v7256_v16 = vld [vmem:[%s10754_s12 + $0x8c] sm:$0xf0]  ;;  %v10030_v17 = vld [vmem:[%s10754_s12 + $0x1bc] sm:$0xf] }
  0x59   : > { %2574 = vmatpush.bf16.msrb.mxu0 %v7875_v56  ;;  %v7296_v56 = vld [vmem:[%s10754_s12 + $0xdc] sm:$0xf0]  ;;  %v7759_v18 = vor.u32 %v10115_v10, %v7756_v11  ;;  %v10070_v22 = vld [vmem:[%s10754_s12 + $0x2fc] sm:$0xf]  ;;  %v7576_v23 = vld [vmem:[%s10754_s12 + $0x30c] sm:$0xf0] }
  0x5a   : > { %2587 = vmatpush.bf16.msrb.mxu1 %v8035_v57  ;;  %v10040_v57 = vld [vmem:[%s10754_s12 + $0x20c] sm:$0xf]  ;;  %v7299_v0 = vor.u32 %v10000_v55, %v7296_v56  ;;  %v10110_v24 = vld [vmem:[%s10754_s12 + $0x43c] sm:$0xf]  ;;  %v7579_v29 = vor.u32 %v10070_v22, %v7576_v23  ;;  %v9985_v30 = vld [vmem:[%s10754_s12 + $0x54] sm:$0xf] }
  0x5b   : > { %2600 = vmatpush.bf16.msrb.mxu2 %v8195_v58  ;;  %v7799_v58 = vor.u32 %v10125_v47, %v7796_v48  ;;  %v7459_v1 = vor.u32 %v10040_v57, %v7456_v59  ;;  %v7396_v34 = vld [vmem:[%s10754_s12 + $0x1a4] sm:$0xf0]  ;;  %v10065_v35 = vld [vmem:[%s10754_s12 + $0x2d4] sm:$0xf]  ;;  %v9980_v43 = vld [vmem:[%s10754_s12 + $0x2c] sm:$0xf] }
  0x5c   : > { %2613 = vmatpush.bf16.msrb.mxu3 %v8355_v62  ;;  %v10120_v62 = vld [vmem:[%s10754_s12 + $0x48c] sm:$0xf]  ;;  %v7716_v39 = vld [vmem:[%s10754_s12 + $0x424] sm:$0xf0]  ;;  %v7216_v44 = vld [vmem:[%s10754_s12 + $0x3c] sm:$0xf0] }
  0x5d   : > { %2575 = vmatpush.bf16.msrb.mxu0 %v7855_v4  ;;  %v7276_v4 = vld [vmem:[%s10754_s12 + $0xb4] sm:$0xf0]  ;;  %v7779_v6 = vor.u32 %v10120_v62, %v7776_v63  ;;  %v10020_v45 = vld [vmem:[%s10754_s12 + $0x16c] sm:$0xf]  ;;  %v7376_v48 = vld [vmem:[%s10754_s12 + $0x17c] sm:$0xf0]  ;;  %v7219_v56 = vor.u32 %v9980_v43, %v7216_v44 }
  0x5e   : > { %2588 = vmatpush.bf16.msrb.mxu1 %v8015_v7  ;;  %v7436_v7 = vld [vmem:[%s10754_s12 + $0x1f4] sm:$0xf0]  ;;  %v7696_v55 = vld [vmem:[%s10754_s12 + $0x3fc] sm:$0xf0]  ;;  %v9975_v57 = vld [vmem:[%s10754_s12 + $0x4] sm:$0xf]  ;;  %v7379_v59 = vor.u32 %v10020_v45, %v7376_v48 }
  0x5f   : > { %2601 = vmatpush.bf16.msrb.mxu2 %v8175_v8  ;;  %v10075_v8 = vld [vmem:[%s10754_s12 + $0x324] sm:$0xf]  ;;  %v7439_v13 = vor.u32 %v10035_v5, %v7436_v7  ;;  %v7356_v62 = vld [vmem:[%s10754_s12 + $0x154] sm:$0xf0]  ;;  %v7976_v5 = vld [vmem:[%s10754_s12 + $0x62c] sm:$0xf0] }
  0x60   : > { %2614 = vmatpush.bf16.msrb.mxu3 %v8335_v12  ;;  %v7279_v12 = vor.u32 %v9995_v3, %v7276_v4  ;;  %v7599_v14 = vor.u32 %v10075_v8, %v7596_v9  ;;  %v10015_v61 = vld [vmem:[%s10754_s12 + $0x144] sm:$0xf]  ;;  %v7676_v3 = vld [vmem:[%s10754_s12 + $0x3d4] sm:$0xf0]  ;;  %v10170_v4 = vld [vmem:[%s10754_s12 + $0x61c] sm:$0xf] }
  0x61   : > { %2576 = vmatpush.bf16.msrb.mxu0 %v7835_v19  ;;  %v7416_v19 = vld [vmem:[%s10754_s12 + $0x1cc] sm:$0xf0]  ;;  %v10055_v63 = vld [vmem:[%s10754_s12 + $0x284] sm:$0xf]  ;;  %v10250_v9 = vld [vmem:[%s10754_s12 + $0x89c] sm:$0xf]  ;;  %v7359_v11 = vor.u32 %v10015_v61, %v7356_v62 }
  0x62   : > { %2589 = vmatpush.bf16.msrb.mxu1 %v7995_v25  ;;  %v7736_v25 = vld [vmem:[%s10754_s12 + $0x44c] sm:$0xf0]  ;;  %v7419_v28 = vor.u32 %v10030_v17, %v7416_v19  ;;  %v10165_v19 = vld [vmem:[%s10754_s12 + $0x5f4] sm:$0xf]  ;;  %v7956_v22 = vld [vmem:[%s10754_s12 + $0x604] sm:$0xf0] }
  0x63   : > { %2602 = vmatpush.bf16.msrb.mxu2 %v8155_v26  ;;  %v7259_v26 = vor.u32 %v9990_v15, %v7256_v16  ;;  %v7739_v33 = vor.u32 %v10110_v24, %v7736_v25  ;;  %v8136_v8 = vld [vmem:[%s10754_s12 + $0x76c] sm:$0xf0]  ;;  %v7979_v16 = vor.u32 %v10170_v4, %v7976_v5  ;;  %v10205_v23 = vld [vmem:[%s10754_s12 + $0x734] sm:$0xf]  ;;  %v8116_v25 = vld [vmem:[%s10754_s12 + $0x744] sm:$0xf0] }
  0x64   : > { %2615 = vmatpush.bf16.msrb.mxu3 %v8315_v31  ;;  %2577 = vmatmul.bf16.vlgmr.msrb.gmra.mxu0 %v10937_v49  ;;  %v7236_v31 = vld [vmem:[%s10754_s12 + $0x64] sm:$0xf0]  ;;  %v8296_v10 = vld [vmem:[%s10754_s12 + $0x8ac] sm:$0xf0]  ;;  %v8416_v43 = vld [vmem:[%s10754_s12 + $0x99c] sm:$0xf0] }
  0x65   : > { %2621 = vmatpush.bf16.msra.mxu0 %v7339_v32  ;;  %2590 = vmatmul.bf16.vlgmr.msrb.gmra.mxu1 %v10941_v52  ;;  %v10025_v32 = vld [vmem:[%s10754_s12 + $0x194] sm:$0xf]  ;;  %v7239_v40 = vor.u32 %v9985_v30, %v7236_v31  ;;  %v8436_v30 = vld [vmem:[%s10754_s12 + $0x9c4] sm:$0xf0]  ;;  %v7959_v31 = vor.u32 %v10165_v19, %v7956_v22  ;;  %v10155_v48 = vld [vmem:[%s10754_s12 + $0x5a4] sm:$0xf] }
  0x66   : > { %2634 = vmatpush.bf16.msra.mxu1 %v7499_v36  ;;  %2603 = vmatmul.bf16.vlgmr.msrb.gmra.mxu2 %v10933_v46  ;;  %v7556_v36 = vld [vmem:[%s10754_s12 + $0x2e4] sm:$0xf0]  ;;  %v7399_v41 = vor.u32 %v10025_v32, %v7396_v34  ;;  %v8119_v32 = vor.u32 %v10205_v23, %v8116_v25  ;;  %v10160_v34 = vld [vmem:[%s10754_s12 + $0x5cc] sm:$0xf]  ;;  %v10230_v4 = vld [vmem:[%s10754_s12 + $0x7fc] sm:$0xf] }
  0x67   : > { %2647 = vmatpush.bf16.msra.mxu2 %v7659_v38  ;;  %2616 = vmatmul.bf16.vlgmr.msrb.gmra.mxu3 %v10939_v50  ;;  %v10105_v38 = vld [vmem:[%s10754_s12 + $0x414] sm:$0xf]  ;;  %v8216_v5 = vld [vmem:[%s10754_s12 + $0x80c] sm:$0xf0]  ;;  %v8356_v19 = vld [vmem:[%s10754_s12 + $0x924] sm:$0xf0] }
  0x68   : > { %2660 = vmatpush.bf16.msra.mxu3 %v7819_v42  ;;  %v7559_v42 = vor.u32 %v10065_v35, %v7556_v36  ;;  %v7719_v47 = vor.u32 %v10105_v38, %v7716_v39  ;;  %v7936_v35 = vld [vmem:[%s10754_s12 + $0x5dc] sm:$0xf0]  ;;  %v10200_v36 = vld [vmem:[%s10754_s12 + $0x70c] sm:$0xf]  ;;  %s10692_s30 = smov 64   ;;  %vm3043_vm0 = vcmask 523264  }
  0x69   : > { %2622 = vmatpush.bf16.msra.mxu0 %v7319_v51  ;;  %v10060_v51 = vld [vmem:[%s10754_s12 + $0x2ac] sm:$0xf]  ;;  %v8096_v39 = vld [vmem:[%s10754_s12 + $0x71c] sm:$0xf0]  ;;  %v7939_v44 = vor.u32 %v10160_v34, %v7936_v35  ;;  %vm3080_vm1 = vcmask 1040384   ;;  %vm3063_vm2 = vcmask 9216  }
  0x6a   : > { %2635 = vmatpush.bf16.msra.mxu1 %v7479_v53  ;;  %v7536_v53 = vld [vmem:[%s10754_s12 + $0x2bc] sm:$0xf0]  ;;  %v8099_v45 = vor.u32 %v10200_v36, %v8096_v39  ;;  %v10140_v25 = vld [vmem:[%s10754_s12 + $0x52c] sm:$0xf]  ;;  %v10135_v36 = vld [vmem:[%s10754_s12 + $0x504] sm:$0xf] }
  0x6b   : > { %2648 = vmatpush.bf16.msra.mxu2 %v7639_v54  ;;  %v10100_v54 = vld [vmem:[%s10754_s12 + $0x3ec] sm:$0xf]  ;;  %v7539_v60 = vor.u32 %v10060_v51, %v7536_v53  ;;  %v7916_v51 = vld [vmem:[%s10754_s12 + $0x5b4] sm:$0xf0]  ;;  %v10195_v53 = vld [vmem:[%s10754_s12 + $0x6e4] sm:$0xf] }
  0x6c   : > { %2661 = vmatpush.bf16.msra.mxu3 %v7799_v58  ;;  %v7196_v58 = vld [vmem:[%s10754_s12 + $0x14] sm:$0xf0]  ;;  %v8336_v34 = vld [vmem:[%s10754_s12 + $0x8fc] sm:$0xf0]  ;;  %vm3076_vm3 = vcmask 15360   ;;  %vm5124_vm4 = vcmask 1041408  }
  0x6d   : > { %2623 = vmatpush.bf16.msra.mxu0 %v7299_v0  ;;  %v7699_v0 = vor.u32 %v10100_v54, %v7696_v55  ;;  %v7199_v7 = vor.u32 %v9975_v57, %v7196_v58  ;;  %v8076_v55 = vld [vmem:[%s10754_s12 + $0x6f4] sm:$0xf0]  ;;  %v10275_v58 = vld [vmem:[%s10754_s12 + $0x964] sm:$0xf]  ;;  %vm5133_vm5 = vcmask 1043456   ;;  %p8946_p5 = scmp.ne.s32.totalorder %s10740_s25, 3 }
  0x6e   : > { %2636 = vmatpush.bf16.msra.mxu1 %v7459_v1  ;;  %v7516_v1 = vld [vmem:[%s10754_s12 + $0x294] sm:$0xf0]  ;;  %v8079_v61 = vor.u32 %v10195_v53, %v8076_v55  ;;  %v10093_v53 = vld [vmem:[%s10754_s12 + $0x3b0] sm:$0xf0]  ;;  %v7822_v55 = vld [vmem:[%s10754_s12 + $0x4e0] sm:$0xf] }
  0x6f   : > { %2649 = vmatpush.bf16.msra.mxu2 %v7619_v2  ;;  %v10095_v2 = vld [vmem:[%s10754_s12 + $0x3c4] sm:$0xf]  ;;  %v8236_v57 = vld [vmem:[%s10754_s12 + $0x834] sm:$0xf0] }
  0x70   : > { %2662 = vmatpush.bf16.msra.mxu3 %v7779_v6  ;;  %v10210_v6 = vld [vmem:[%s10754_s12 + $0x75c] sm:$0xf]  ;;  %v7679_v15 = vor.u32 %v10095_v2, %v7676_v3  ;;  %v8056_v3 = vld [vmem:[%s10754_s12 + $0x6cc] sm:$0xf0] }
  0x71   : > { %2624 = vmatpush.bf16.msra.mxu0 %v7279_v12  ;;  %v7519_v12 = vor.u32 %v10055_v63, %v7516_v1  ;;  %v8139_v17 = vor.u32 %v10210_v6, %v8136_v8  ;;  %v10150_v63 = vld [vmem:[%s10754_s12 + $0x57c] sm:$0xf] }
  0x72   : > { %2637 = vmatpush.bf16.msra.mxu1 %v7439_v13  ;;  %v10290_v13 = vld [vmem:[%s10754_s12 + $0x9dc] sm:$0xf] }
  0x73   : > { %2650 = vmatpush.bf16.msra.mxu2 %v7599_v14  ;;  %v8456_v14 = vld [vmem:[%s10754_s12 + $0x9ec] sm:$0xf0]  ;;  %v10190_v1 = vld [vmem:[%s10754_s12 + $0x6bc] sm:$0xf] }
  0x74   : > { %2663 = vmatpush.bf16.msra.mxu3 %v7759_v18  ;;  %v8299_v18 = vor.u32 %v10250_v9, %v8296_v10  ;;  %v8459_v24 = vor.u32 %v10290_v13, %v8456_v14  ;;  %v10270_v6 = vld [vmem:[%s10754_s12 + $0x93c] sm:$0xf]  ;;  %v8059_v9 = vor.u32 %v10190_v1, %v8056_v3  ;;  %v8219_v10 = vor.u32 %v10230_v4, %v8216_v5  ;;  %v10185_v13 = vld [vmem:[%s10754_s12 + $0x694] sm:$0xf]  ;;  %v10088_v3 = vld [vmem:[%s10754_s12 + $0x388] sm:$0xf0] }
  0x75   : > { %2625 = vmatpush.bf16.msra.mxu0 %v7259_v26  ;;  %v10245_v26 = vld [vmem:[%s10754_s12 + $0x874] sm:$0xf]  ;;  %v7802_v4 = vld [vmem:[%s10754_s12 + $0x4b8] sm:$0xf]  ;;  %v10128_v5 = vld [vmem:[%s10754_s12 + $0x4c8] sm:$0xf0] }
  0x76   : > { %2638 = vmatpush.bf16.msra.mxu1 %v7419_v28  ;;  %v8276_v28 = vld [vmem:[%s10754_s12 + $0x884] sm:$0xf0]  ;;  %v10053_v1 = vld [vmem:[%s10754_s12 + $0x270] sm:$0xf0] }
  0x77   : > { %2651 = vmatpush.bf16.msra.mxu2 %v7579_v29  ;;  %v10285_v29 = vld [vmem:[%s10754_s12 + $0x9b4] sm:$0xf] }
  0x78   : > { %2664 = vmatpush.bf16.msra.mxu3 %v7739_v33  ;;  %v8279_v33 = vor.u32 %v10245_v26, %v8276_v28  ;;  %v8439_v38 = vor.u32 %v10285_v29, %v8436_v30  ;;  %v7856_v26 = vld [vmem:[%s10754_s12 + $0x53c] sm:$0xf0]  ;;  %v10180_v28 = vld [vmem:[%s10754_s12 + $0x66c] sm:$0xf] }
  0x79   : > { %2626 = vmatpush.bf16.msra.mxu0 %v7239_v40  ;;  %v10240_v40 = vld [vmem:[%s10754_s12 + $0x84c] sm:$0xf]  ;;  %v8016_v30 = vld [vmem:[%s10754_s12 + $0x67c] sm:$0xf0]  ;;  %v7859_v35 = vor.u32 %v10140_v25, %v7856_v26  ;;  %v7462_v25 = vld [vmem:[%s10754_s12 + $0x210] sm:$0xf] }
  0x7a   : > { %2639 = vmatpush.bf16.msra.mxu1 %v7399_v41  ;;  %v8256_v41 = vld [vmem:[%s10754_s12 + $0x85c] sm:$0xf0] }
  0x7b   : > { %2652 = vmatpush.bf16.msra.mxu2 %v7559_v42  ;;  %v10280_v42 = vld [vmem:[%s10754_s12 + $0x98c] sm:$0xf] }
  0x7c   : > { %2665 = vmatpush.bf16.msra.mxu3 %v7719_v47  ;;  %v8259_v47 = vor.u32 %v10240_v40, %v8256_v41  ;;  %v8419_v54 = vor.u32 %v10280_v42, %v8416_v43  ;;  %v7836_v40 = vld [vmem:[%s10754_s12 + $0x514] sm:$0xf0]  ;;  %v10175_v41 = vld [vmem:[%s10754_s12 + $0x644] sm:$0xf] }
  0x7d   : > { %2627 = vmatpush.bf16.msra.mxu0 %v7219_v56  ;;  %v10235_v56 = vld [vmem:[%s10754_s12 + $0x824] sm:$0xf]  ;;  %v7996_v42 = vld [vmem:[%s10754_s12 + $0x654] sm:$0xf0] }
  0x7e   : > { %2640 = vmatpush.bf16.msra.mxu1 %v7379_v59  ;;  %v8396_v59 = vld [vmem:[%s10754_s12 + $0x974] sm:$0xf0]  ;;  %v8239_v62 = vor.u32 %v10235_v56, %v8236_v57  ;;  %v10133_v56 = vld [vmem:[%s10754_s12 + $0x4f0] sm:$0xf0]  ;;  %v7999_v57 = vor.u32 %v10175_v41, %v7996_v42  ;;  %v10038_v41 = vld [vmem:[%s10754_s12 + $0x1f8] sm:$0xf0] }
  0x7f   : > { %2653 = vmatpush.bf16.msra.mxu2 %v7539_v60  ;;  %v7919_v60 = vor.u32 %v10155_v48, %v7916_v51  ;;  %v8399_v2 = vor.u32 %v10275_v58, %v8396_v59  ;;  %v8316_v48 = vld [vmem:[%s10754_s12 + $0x8d4] sm:$0xf0]  ;;  %v7662_v51 = vld [vmem:[%s10754_s12 + $0x3a0] sm:$0xf] }
  0x80   : > { %2666 = vmatpush.bf16.msra.mxu3 %v7699_v0  ;;  %v7896_v0 = vld [vmem:[%s10754_s12 + $0x58c] sm:$0xf0]  ;;  %v7582_v42 = vld [vmem:[%s10754_s12 + $0x300] sm:$0xf] }
  0x81   : > { %2628 = vmatpush.bf16.msra.mxu0 %v7199_v7  ;;  %v8376_v7 = vld [vmem:[%s10754_s12 + $0x94c] sm:$0xf0]  ;;  %v7899_v8 = vor.u32 %v10150_v63, %v7896_v0  ;;  %v7502_v63 = vld [vmem:[%s10754_s12 + $0x260] sm:$0xf]  ;;  %v7823_v0 = vor.u32 %v10133_v56, %v7822_v55 }
  0x82   : > { %2641 = vmatpush.bf16.msra.mxu1 %v7359_v11  ;;  %v10145_v11 = vld [vmem:[%s10754_s12 + $0x554] sm:$0xf]  ;;  %v8379_v14 = vor.u32 %v10270_v6, %v8376_v7  ;;  %v7503_v7 = vor.u32 %v10053_v1, %v7502_v63  ;;  %v7422_v55 = vld [vmem:[%s10754_s12 + $0x1c0] sm:$0xf]  ;;  %v7242_v1 = vld [vmem:[%s10754_s12 + $0x58] sm:$0xf] }
  0x83   : > { %2654 = vmatpush.bf16.msra.mxu2 %v7519_v12  ;;  %v7876_v12 = vld [vmem:[%s10754_s12 + $0x564] sm:$0xf0] }
  0x84   : > { %2667 = vmatpush.bf16.msra.mxu3 %v7679_v15  ;;  %2629 = vmatmul.bf16.vlgmr.msra.gmra.mxu0 %v10872_v21  ;;  %v8036_v15 = vld [vmem:[%s10754_s12 + $0x6a4] sm:$0xf0]  ;;  %v7879_v22 = vor.u32 %v10145_v11, %v7876_v12  ;;  %v7482_v11 = vld [vmem:[%s10754_s12 + $0x238] sm:$0xf]  ;;  %v7803_v12 = vor.u32 %v10128_v5, %v7802_v4  ;;  %v10028_v5 = vld [vmem:[%s10754_s12 + $0x1a8] sm:$0xf0] }
  0x85   : > { %2673 = vmatpush.bf16.msrb.mxu0 %v7979_v16  ;;  %2642 = vmatmul.bf16.vlgmr.msra.gmra.mxu1 %v10887_v37  ;;  %v10225_v16 = vld [vmem:[%s10754_s12 + $0x7d4] sm:$0xf]  ;;  %v8039_v23 = vor.u32 %v10185_v13, %v8036_v15  ;;  %v10048_v13 = vld [vmem:[%s10754_s12 + $0x248] sm:$0xf0]  ;;  %v10083_v15 = vld [vmem:[%s10754_s12 + $0x360] sm:$0xf0] }
  0x86   : > { %2686 = vmatpush.bf16.msrb.mxu1 %v8139_v17  ;;  %2655 = vmatmul.bf16.vlgmr.msra.gmra.mxu2 %v10870_v20  ;;  %v8196_v17 = vld [vmem:[%s10754_s12 + $0x7e4] sm:$0xf0] }
  0x87   : > { %2699 = vmatpush.bf16.msrb.mxu2 %v8299_v18  ;;  %2668 = vmatmul.bf16.vlgmr.msra.gmra.mxu3 %v10877_v27  ;;  %v10265_v18 = vld [vmem:[%s10754_s12 + $0x914] sm:$0xf] }
  0x88   : > { %2712 = vmatpush.bf16.msrb.mxu3 %v8459_v24  ;;  %v8199_v24 = vor.u32 %v10225_v16, %v8196_v17  ;;  %v8359_v29 = vor.u32 %v10265_v18, %v8356_v19  ;;  %v7782_v16 = vld [vmem:[%s10754_s12 + $0x490] sm:$0xf]  ;;  %v10123_v17 = vld [vmem:[%s10754_s12 + $0x4a0] sm:$0xf0]  ;;  %v7483_v19 = vor.u32 %v10048_v13, %v7482_v11 }
  0x89   : > { %2674 = vmatpush.bf16.msrb.mxu0 %v7959_v31  ;;  %v10220_v31 = vld [vmem:[%s10754_s12 + $0x7ac] sm:$0xf]  ;;  %v7783_v26 = vor.u32 %v10123_v17, %v7782_v16  ;;  %v7222_v11 = vld [vmem:[%s10754_s12 + $0x30] sm:$0xf]  ;;  %v10023_v16 = vld [vmem:[%s10754_s12 + $0x180] sm:$0xf0] }
  0x8a   : > { %2687 = vmatpush.bf16.msrb.mxu1 %v8119_v32  ;;  %v8176_v32 = vld [vmem:[%s10754_s12 + $0x7bc] sm:$0xf0] }
  0x8b   : > { %2700 = vmatpush.bf16.msrb.mxu2 %v8279_v33  ;;  %v10260_v33 = vld [vmem:[%s10754_s12 + $0x8ec] sm:$0xf]  ;;  %v8179_v39 = vor.u32 %v10220_v31, %v8176_v32  ;;  %v7762_v31 = vld [vmem:[%s10754_s12 + $0x468] sm:$0xf]  ;;  %v10118_v32 = vld [vmem:[%s10754_s12 + $0x478] sm:$0xf0] }
  0x8c   : > { %2713 = vmatpush.bf16.msrb.mxu3 %v8439_v38  ;;  %v8019_v38 = vor.u32 %v10180_v28, %v8016_v30  ;;  %v8339_v43 = vor.u32 %v10260_v33, %v8336_v34  ;;  %v10043_v28 = vld [vmem:[%s10754_s12 + $0x220] sm:$0xf0]  ;;  %v10078_v30 = vld [vmem:[%s10754_s12 + $0x338] sm:$0xf0] }
  0x8d   : > { %2675 = vmatpush.bf16.msrb.mxu0 %v7939_v44  ;;  %v10215_v44 = vld [vmem:[%s10754_s12 + $0x784] sm:$0xf]  ;;  %v7463_v34 = vor.u32 %v10043_v28, %v7462_v25  ;;  %v10098_v25 = vld [vmem:[%s10754_s12 + $0x3d8] sm:$0xf0]  ;;  %v7202_v28 = vld [vmem:[%s10754_s12 + $0x8] sm:$0xf] }
  0x8e   : > { %2688 = vmatpush.bf16.msrb.mxu1 %v8099_v45  ;;  %v8156_v45 = vld [vmem:[%s10754_s12 + $0x794] sm:$0xf0] }
  0x8f   : > { %2701 = vmatpush.bf16.msrb.mxu2 %v8259_v47  ;;  %v10255_v47 = vld [vmem:[%s10754_s12 + $0x8c4] sm:$0xf]  ;;  %v8159_v58 = vor.u32 %v10215_v44, %v8156_v45  ;;  %v7742_v44 = vld [vmem:[%s10754_s12 + $0x440] sm:$0xf]  ;;  %v10113_v45 = vld [vmem:[%s10754_s12 + $0x450] sm:$0xf0] }
  0x90   : > { %2714 = vmatpush.bf16.msrb.mxu3 %v8419_v54  ;;  %v7839_v54 = vor.u32 %v10135_v36, %v7836_v40  ;;  %v8319_v59 = vor.u32 %v10255_v47, %v8316_v48  ;;  %v7282_v36 = vld [vmem:[%s10754_s12 + $0xa8] sm:$0xf]  ;;  %v7763_v40 = vor.u32 %v10118_v32, %v7762_v31  ;;  %v7743_v56 = vor.u32 %v10113_v45, %v7742_v44  ;;  %v8282_v44 = vld [vmem:[%s10754_s12 + $0x878] sm:$0xf]  ;;  %v10248_v45 = vld [vmem:[%s10754_s12 + $0x888] sm:$0xf0] }
  0x91   : > { %2676 = vmatpush.bf16.msrb.mxu0 %v7919_v60  ;;  %v7663_v60 = vor.u32 %v10093_v53, %v7662_v51  ;;  %v7262_v53 = vld [vmem:[%s10754_s12 + $0x80] sm:$0xf] }
  0x92   : > { %2689 = vmatpush.bf16.msrb.mxu1 %v8079_v61  ;;  %v7342_v61 = vld [vmem:[%s10754_s12 + $0x120] sm:$0xf] }
  0x93   : > { %2702 = vmatpush.bf16.msrb.mxu2 %v8239_v62  ;;  %v10013_v62 = vld [vmem:[%s10754_s12 + $0x130] sm:$0xf0] }
  0x94   : > { %2715 = vmatpush.bf16.msrb.mxu3 %v8399_v2  ;;  %v7642_v2 = vld [vmem:[%s10754_s12 + $0x378] sm:$0xf]  ;;  %v7343_v6 = vor.u32 %v10013_v62, %v7342_v61  ;;  %v10108_v61 = vld [vmem:[%s10754_s12 + $0x428] sm:$0xf0] }
  0x95   : > { %2677 = vmatpush.bf16.msrb.mxu0 %v7899_v8  ;;  %v7643_v8 = vor.u32 %v10088_v3, %v7642_v2  ;;  %v9988_v2 = vld [vmem:[%s10754_s12 + $0x68] sm:$0xf0]  ;;  %v7402_v3 = vld [vmem:[%s10754_s12 + $0x198] sm:$0xf] }
  0x96   : > { %2690 = vmatpush.bf16.msrb.mxu1 %v8059_v9  ;;  %v7322_v9 = vld [vmem:[%s10754_s12 + $0xf8] sm:$0xf] }
  0x97   : > { %2703 = vmatpush.bf16.msrb.mxu2 %v8219_v10  ;;  %v10008_v10 = vld [vmem:[%s10754_s12 + $0x108] sm:$0xf0] }
  0x98   : > { %2716 = vmatpush.bf16.msrb.mxu3 %v8379_v14  ;;  %v7622_v14 = vld [vmem:[%s10754_s12 + $0x350] sm:$0xf]  ;;  %v7323_v18 = vor.u32 %v10008_v10, %v7322_v9  ;;  %v10103_v9 = vld [vmem:[%s10754_s12 + $0x400] sm:$0xf0]  ;;  %v7243_v10 = vor.u32 %v9988_v2, %v7242_v1 }
  0x99   : > { %2678 = vmatpush.bf16.msrb.mxu0 %v7879_v22  ;;  %v7623_v22 = vor.u32 %v10083_v15, %v7622_v14  ;;  %v9983_v14 = vld [vmem:[%s10754_s12 + $0x40] sm:$0xf0]  ;;  %v7382_v15 = vld [vmem:[%s10754_s12 + $0x170] sm:$0xf] }
  0x9a   : > { %2691 = vmatpush.bf16.msrb.mxu1 %v8039_v23  ;;  %v7302_v23 = vld [vmem:[%s10754_s12 + $0xd0] sm:$0xf]  ;;  %v7383_v31 = vor.u32 %v10023_v16, %v7382_v15  ;;  %v10283_v1 = vld [vmem:[%s10754_s12 + $0x9a0] sm:$0xf0] }
  0x9b   : > { %2704 = vmatpush.bf16.msrb.mxu2 %v8199_v24  ;;  %v10003_v24 = vld [vmem:[%s10754_s12 + $0xe0] sm:$0xf0] }
  0x9c   : > { %2717 = vmatpush.bf16.msrb.mxu3 %v8359_v29  ;;  %v7602_v29 = vld [vmem:[%s10754_s12 + $0x328] sm:$0xf]  ;;  %v7303_v33 = vor.u32 %v10003_v24, %v7302_v23  ;;  %v10253_v23 = vld [vmem:[%s10754_s12 + $0x8b0] sm:$0xf0] }
  0x9d   : > { %2679 = vmatpush.bf16.msrb.mxu0 %v7859_v35  ;;  %v7603_v35 = vor.u32 %v10078_v30, %v7602_v29  ;;  %v7682_v24 = vld [vmem:[%s10754_s12 + $0x3c8] sm:$0xf]  ;;  %v8462_v29 = vld [vmem:[%s10754_s12 + $0x9e0] sm:$0xf]  ;;  %v10293_v30 = vld [vmem:[%s10754_s12 + $0x9f0] sm:$0xf0] }
  0x9e   : > { %2692 = vmatpush.bf16.msrb.mxu1 %v8019_v38  ;;  %v9998_v38 = vld [vmem:[%s10754_s12 + $0xb8] sm:$0xf0] }
  0x9f   : > { %2705 = vmatpush.bf16.msrb.mxu2 %v8179_v39  ;;  %v7442_v39 = vld [vmem:[%s10754_s12 + $0x1e8] sm:$0xf]  ;;  %v7283_v47 = vor.u32 %v9998_v38, %v7282_v36  ;;  %v7683_v38 = vor.u32 %v10098_v25, %v7682_v24  ;;  %v8222_v24 = vld [vmem:[%s10754_s12 + $0x800] sm:$0xf]  ;;  %v10233_v25 = vld [vmem:[%s10754_s12 + $0x810] sm:$0xf0] }
  0xa0   : > { %2718 = vmatpush.bf16.msrb.mxu3 %v8339_v43  ;;  %v10073_v43 = vld [vmem:[%s10754_s12 + $0x310] sm:$0xf0]  ;;  %v7443_v48 = vor.u32 %v10038_v41, %v7442_v39  ;;  %v7362_v39 = vld [vmem:[%s10754_s12 + $0x148] sm:$0xf]  ;;  %v8142_v41 = vld [vmem:[%s10754_s12 + $0x760] sm:$0xf] }
  0xa1   : > { %2680 = vmatpush.bf16.msrb.mxu0 %v7839_v54  ;;  %v7583_v51 = vor.u32 %v10073_v43, %v7582_v42  ;;  %v9993_v54 = vld [vmem:[%s10754_s12 + $0x90] sm:$0xf0]  ;;  %v8463_v42 = vor.u32 %v10293_v30, %v8462_v29 }
  0xa2   : > { %2693 = vmatpush.bf16.msrb.mxu1 %v7999_v57  ;;  %v10033_v57 = vld [vmem:[%s10754_s12 + $0x1d0] sm:$0xf0]  ;;  %v7263_v62 = vor.u32 %v9993_v54, %v7262_v53 }
  0xa3   : > { %2706 = vmatpush.bf16.msrb.mxu2 %v8159_v58  ;;  %v7562_v58 = vld [vmem:[%s10754_s12 + $0x2d8] sm:$0xf]  ;;  %v7423_v63 = vor.u32 %v10033_v57, %v7422_v55  ;;  %v10213_v43 = vld [vmem:[%s10754_s12 + $0x770] sm:$0xf0] }
  0xa4   : > { %2719 = vmatpush.bf16.msrb.mxu3 %v8319_v59  ;;  %2681 = vmatmul.bf16.vlgmr.msrb.gmra.mxu0 %v10937_v49  ;;  %v10068_v59 = vld [vmem:[%s10754_s12 + $0x2e8] sm:$0xf0]  ;;  %v8143_v55 = vor.u32 %v10213_v43, %v8142_v41  ;;  %v7962_v57 = vld [vmem:[%s10754_s12 + $0x5f8] sm:$0xf] }
  0xa5   : > { %2694 = vmatmul.bf16.vlgmr.msrb.gmra.mxu1 %v10941_v52  ;;  %2725 = vmatpush.bf16.msra.mxu0 %v7343_v6  ;;  %v7542_v6 = vld [vmem:[%s10754_s12 + $0x2b0] sm:$0xf]  ;;  %v8362_v41 = vld [vmem:[%s10754_s12 + $0x918] sm:$0xf] }
  0xa6   : > { %2707 = vmatmul.bf16.vlgmr.msrb.gmra.mxu2 %v10933_v46  ;;  %2738 = vmatpush.bf16.msra.mxu1 %v7503_v7  ;;  %v10063_v7 = vld [vmem:[%s10754_s12 + $0x2c0] sm:$0xf0] }
  0xa7   : > { %2751 = vmatpush.bf16.msra.mxu2 %v7663_v60  ;;  %2720 = vmatmul.bf16.vlgmr.msrb.gmra.mxu3 %v10939_v50  ;;  %v7722_v60 = vld [vmem:[%s10754_s12 + $0x418] sm:$0xf]  ;;  %v7543_v13 = vor.u32 %v10063_v7, %v7542_v6  ;;  %v10163_v6 = vld [vmem:[%s10754_s12 + $0x5e0] sm:$0xf0]  ;;  %v8102_v7 = vld [vmem:[%s10754_s12 + $0x710] sm:$0xf] }
  0xa8   : > { %2764 = vmatpush.bf16.msra.mxu3 %v7823_v0  ;;  %v7563_v0 = vor.u32 %v10068_v59, %v7562_v58  ;;  %v7723_v4 = vor.u32 %v10108_v61, %v7722_v60  ;;  %v10168_v58 = vld [vmem:[%s10754_s12 + $0x608] sm:$0xf0]  ;;  %v8122_v59 = vld [vmem:[%s10754_s12 + $0x738] sm:$0xf] }
  0xa9   : > { %2726 = vmatpush.bf16.msra.mxu0 %v7323_v18  ;;  %v7522_v18 = vld [vmem:[%s10754_s12 + $0x288] sm:$0xf]  ;;  %v10208_v61 = vld [vmem:[%s10754_s12 + $0x748] sm:$0xf0]  ;;  %v7963_v2 = vor.u32 %v10168_v58, %v7962_v57  ;;  %v11186_v57 = vld [vmem:[%s10759_s16] sm:$0x1f] }
  0xaa   : > { %2739 = vmatpush.bf16.msra.mxu1 %v7483_v19  ;;  %v10058_v19 = vld [vmem:[%s10754_s12 + $0x298] sm:$0xf0] }
  0xab   : > { %2752 = vmatpush.bf16.msra.mxu2 %v7643_v8  ;;  %v7702_v8 = vld [vmem:[%s10754_s12 + $0x3f0] sm:$0xf]  ;;  %v7523_v32 = vor.u32 %v10058_v19, %v7522_v18  ;;  %v10158_v18 = vld [vmem:[%s10754_s12 + $0x5b8] sm:$0xf0]  ;;  %v8082_v19 = vld [vmem:[%s10754_s12 + $0x6e8] sm:$0xf] }
  0xac   : > { %2765 = vmatpush.bf16.msra.mxu3 %v7803_v12  ;;  %v7403_v12 = vor.u32 %v10028_v5, %v7402_v3  ;;  %v7703_v17 = vor.u32 %v10103_v9, %v7702_v8  ;;  %v8123_v3 = vor.u32 %v10208_v61, %v8122_v59  ;;  %v7942_v5 = vld [vmem:[%s10754_s12 + $0x5d0] sm:$0xf]  ;;  %v10203_v9 = vld [vmem:[%s10754_s12 + $0x720] sm:$0xf0] }
  0xad   : > { %2727 = vmatpush.bf16.msra.mxu0 %v7303_v33  ;;  %v9978_v33 = vld [vmem:[%s10754_s12 + $0x18] sm:$0xf0]  ;;  %v8103_v15 = vor.u32 %v10203_v9, %v8102_v7  ;;  %v8342_v59 = vld [vmem:[%s10754_s12 + $0x8f0] sm:$0xf] }
  0xae   : > { %2740 = vmatpush.bf16.msra.mxu1 %v7463_v34  ;;  %v7982_v34 = vld [vmem:[%s10754_s12 + $0x620] sm:$0xf]  ;;  %v10218_v9 = vld [vmem:[%s10754_s12 + $0x798] sm:$0xf0] }
  0xaf   : > { %2753 = vmatpush.bf16.msra.mxu2 %v7623_v22  ;;  %v8302_v22 = vld [vmem:[%s10754_s12 + $0x8a0] sm:$0xf] }
  0xb0   : > { %2766 = vmatpush.bf16.msra.mxu3 %v7783_v26  ;;  %v7223_v26 = vor.u32 %v9983_v14, %v7222_v11  ;;  %v8303_v36 = vor.u32 %v10253_v23, %v8302_v22  ;;  %v10238_v11 = vld [vmem:[%s10754_s12 + $0x838] sm:$0xf0]  ;;  %v7943_v14 = vor.u32 %v10163_v6, %v7942_v5  ;;  %v843_v5 = vperm.slane %v11186_v57, 0 }
  0xb1   : > { %2728 = vmatpush.bf16.msra.mxu0 %v7283_v47  ;;  %v7203_v47 = vor.u32 %v9978_v33, %v7202_v28  ;;  %v10198_v23 = vld [vmem:[%s10754_s12 + $0x6f8] sm:$0xf0]  ;;  %v10273_v28 = vld [vmem:[%s10754_s12 + $0x950] sm:$0xf0] }
  0xb2   : > { %2741 = vmatpush.bf16.msra.mxu1 %v7443_v48  ;;  %v8442_v48 = vld [vmem:[%s10754_s12 + $0x9b8] sm:$0xf]  ;;  %v8083_v30 = vor.u32 %v10198_v23, %v8082_v19  ;;  %v10153_v33 = vld [vmem:[%s10754_s12 + $0x590] sm:$0xf0]  ;;  %v10138_v23 = vld [vmem:[%s10754_s12 + $0x518] sm:$0xf0] }
  0xb3   : > { %2754 = vmatpush.bf16.msra.mxu2 %v7603_v35  ;;  %v10173_v35 = vld [vmem:[%s10754_s12 + $0x630] sm:$0xf0] }
  0xb4   : > { %2767 = vmatpush.bf16.msra.mxu3 %v7763_v40  ;;  %v10018_v40 = vld [vmem:[%s10754_s12 + $0x158] sm:$0xf0]  ;;  %v7983_v53 = vor.u32 %v10173_v35, %v7982_v34  ;;  %v8062_v34 = vld [vmem:[%s10754_s12 + $0x6c0] sm:$0xf] }
  0xb5   : > { %2729 = vmatpush.bf16.msra.mxu0 %v7263_v62  ;;  %v7363_v54 = vor.u32 %v10018_v40, %v7362_v39  ;;  %v8262_v62 = vld [vmem:[%s10754_s12 + $0x850] sm:$0xf]  ;;  %v10228_v39 = vld [vmem:[%s10754_s12 + $0x7e8] sm:$0xf0] }
  0xb6   : > { %2742 = vmatpush.bf16.msra.mxu1 %v7423_v63  ;;  %v10243_v63 = vld [vmem:[%s10754_s12 + $0x860] sm:$0xf0] }
  0xb7   : > { %2755 = vmatpush.bf16.msra.mxu2 %v7583_v51  ;;  %v10288_v51 = vld [vmem:[%s10754_s12 + $0x9c8] sm:$0xf0] }
  0xb8   : > { %2768 = vmatpush.bf16.msra.mxu3 %v7743_v56  ;;  %v8283_v56 = vor.u32 %v10248_v45, %v8282_v44  ;;  %v8443_v60 = vor.u32 %v10288_v51, %v8442_v48  ;;  %v7882_v44 = vld [vmem:[%s10754_s12 + $0x558] sm:$0xf]  ;;  %v10148_v48 = vld [vmem:[%s10754_s12 + $0x568] sm:$0xf0] }
  0xb9   : > { %2730 = vmatpush.bf16.msra.mxu0 %v7243_v10  ;;  %v8242_v10 = vld [vmem:[%s10754_s12 + $0x828] sm:$0xf]  ;;  %v8042_v51 = vld [vmem:[%s10754_s12 + $0x698] sm:$0xf]  ;;  %v7883_v61 = vor.u32 %v10148_v48, %v7882_v44  ;;  %v10126_v44 = vld [vmem:[%s10754_s12 + $0x4bc] sm:$0xf] }
  0xba   : > { %2743 = vmatpush.bf16.msra.mxu1 %v7403_v12  ;;  %v8402_v12 = vld [vmem:[%s10754_s12 + $0x968] sm:$0xf]  ;;  %v8243_v16 = vor.u32 %v10238_v11, %v8242_v10 }
  0xbb   : > { %2756 = vmatpush.bf16.msra.mxu2 %v7563_v0  ;;  %v8422_v0 = vld [vmem:[%s10754_s12 + $0x990] sm:$0xf]  ;;  %v8322_v10 = vld [vmem:[%s10754_s12 + $0x8c8] sm:$0xf] }
  0xbc   : > { %2769 = vmatpush.bf16.msra.mxu3 %v7723_v4  ;;  %v8263_v4 = vor.u32 %v10243_v63, %v8262_v62  ;;  %v8423_v8 = vor.u32 %v10283_v1, %v8422_v0  ;;  %v7862_v62 = vld [vmem:[%s10754_s12 + $0x530] sm:$0xf]  ;;  %v10143_v63 = vld [vmem:[%s10754_s12 + $0x540] sm:$0xf0] }
  0xbd   : > { %2731 = vmatpush.bf16.msra.mxu0 %v7223_v26  ;;  %v8382_v26 = vld [vmem:[%s10754_s12 + $0x940] sm:$0xf] }
  0xbe   : > { %2744 = vmatpush.bf16.msra.mxu1 %v7383_v31  ;;  %v8223_v31 = vor.u32 %v10233_v25, %v8222_v24  ;;  %v8383_v35 = vor.u32 %v10273_v28, %v8382_v26  ;;  %v8002_v26 = vld [vmem:[%s10754_s12 + $0x648] sm:$0xf]  ;;  %v10178_v28 = vld [vmem:[%s10754_s12 + $0x658] sm:$0xf0] }
  0xbf   : > { %2757 = vmatpush.bf16.msra.mxu2 %v7543_v13  ;;  %v10278_v13 = vld [vmem:[%s10754_s12 + $0x978] sm:$0xf0] }
  0xc0   : > { %2770 = vmatpush.bf16.msra.mxu3 %v7703_v17  ;;  %v7922_v17 = vld [vmem:[%s10754_s12 + $0x5a8] sm:$0xf]  ;;  %v8403_v22 = vor.u32 %v10278_v13, %v8402_v12  ;;  %v10258_v12 = vld [vmem:[%s10754_s12 + $0x8d8] sm:$0xf0]  ;;  %v10091_v13 = vld [vmem:[%s10754_s12 + $0x3a4] sm:$0xf] }
  0xc1   : > { %2732 = vmatpush.bf16.msra.mxu0 %v7203_v47  ;;  %v7923_v29 = vor.u32 %v10158_v18, %v7922_v17  ;;  %v2526_v40 = vpop.f32.mrf.mxu0  ;;  %v7824_v17 = vld [vmem:[%s10754_s12 + $0x4f4] sm:$0xf0]  ;;  %v8323_v25 = vor.u32 %v10258_v12, %v8322_v10  ;;  %v7464_v10 = vld [vmem:[%s10754_s12 + $0x224] sm:$0xf0]  ;;  %v10116_v12 = vld [vmem:[%s10754_s12 + $0x46c] sm:$0xf] }
  0xc2   : > { %2745 = vmatpush.bf16.msra.mxu1 %v7363_v54  ;;  %v2527_v24 = vadd.f32 %v2526_v40, %v843_v5  ;;  %v7504_v40 = vld [vmem:[%s10754_s12 + $0x274] sm:$0xf0]  ;;  %v7604_v5 = vld [vmem:[%s10754_s12 + $0x33c] sm:$0xf0] }
  0xc3   : > { %2758 = vmatpush.bf16.msra.mxu2 %v7523_v32  ;;  %v7902_v32 = vld [vmem:[%s10754_s12 + $0x580] sm:$0xf] }
  0xc4   : > { %2771 = vmatpush.bf16.msra.mxu3 %v7683_v38  ;;  %2733 = vmatmul.bf16.vlgmr.msra.gmra.mxu0 %v10872_v21  ;;  %v8202_v38 = vld [vmem:[%s10754_s12 + $0x7d8] sm:$0xf]  ;;  %v7903_v43 = vor.u32 %v10153_v33, %v7902_v32  ;;  %v7644_v32 = vld [vmem:[%s10754_s12 + $0x38c] sm:$0xf0]  ;;  %v10011_v33 = vld [vmem:[%s10754_s12 + $0x124] sm:$0xf] }
  0xc5   : > { %2777 = vmatpush.bf16.msrb.mxu0 %v7983_v53  ;;  %2746 = vmatmul.bf16.vlgmr.msra.gmra.mxu1 %v10887_v37  ;;  %v8203_v47 = vor.u32 %v10228_v39, %v8202_v38  ;;  %v10188_v53 = vld [vmem:[%s10754_s12 + $0x6a8] sm:$0xf0]  ;;  %v2539_v58 = vpop.f32.mrf.mxu1  ;;  %v10051_v39 = vld [vmem:[%s10754_s12 + $0x264] sm:$0xf] }
  0xc6   : > { %2759 = vmatmul.bf16.vlgmr.msra.gmra.mxu2 %v10870_v20  ;;  %2790 = vmatpush.bf16.msrb.mxu1 %v8143_v55  ;;  %v8182_v55 = vld [vmem:[%s10754_s12 + $0x7b0] sm:$0xf]  ;;  %v8043_v1 = vor.u32 %v10188_v53, %v8042_v51  ;;  %v10081_v51 = vld [vmem:[%s10754_s12 + $0x354] sm:$0xf]  ;;  %v7507_v53 = vor.u32 %v10051_v39, %v7504_v40  ;;  %v7264_v39 = vld [vmem:[%s10754_s12 + $0x94] sm:$0xf0] }
  0xc7   : > { %2803 = vmatpush.bf16.msrb.mxu2 %v8303_v36  ;;  %2772 = vmatmul.bf16.vlgmr.msra.gmra.mxu3 %v10877_v27  ;;  %v10193_v36 = vld [vmem:[%s10754_s12 + $0x6d0] sm:$0xf0] }
  0xc8   : > { %2816 = vmatpush.bf16.msrb.mxu3 %v8463_v42  ;;  %v10268_v42 = vld [vmem:[%s10754_s12 + $0x928] sm:$0xf0]  ;;  %v8063_v45 = vor.u32 %v10193_v36, %v8062_v34  ;;  %v7344_v34 = vld [vmem:[%s10754_s12 + $0x134] sm:$0xf0] }
  0xc9   : > { %2778 = vmatpush.bf16.msrb.mxu0 %v7963_v2  ;;  %v8363_v54 = vor.u32 %v10268_v42, %v8362_v41  ;;  %v11192_v0 = vpop.f32.mrf.mxu2  ;;  %v2528_v11 = vpop.f32.mrf.mxu0  ;;  %v8003_v41 = vor.u32 %v10178_v28, %v8002_v26  ;;  %v2540_v42 = vadd.f32 %v2539_v58, %v2527_v24  ;;  %v7347_v48 = vor.u32 %v10011_v33, %v7344_v34  ;;  %v10036_v24 = vld [vmem:[%s10754_s12 + $0x1ec] sm:$0xf]  ;;  %v10066_v33 = vld [vmem:[%s10754_s12 + $0x2dc] sm:$0xf] }
  0xca   : > { %2791 = vmatpush.bf16.msrb.mxu1 %v8123_v3  ;;  %v8022_v3 = vld [vmem:[%s10754_s12 + $0x670] sm:$0xf]  ;;  %v11197_v6 = vpop.f32.mrf.mxu3 }
  0xcb   : > { %2804 = vmatpush.bf16.msrb.mxu2 %v8283_v56  ;;  %v10223_v56 = vld [vmem:[%s10754_s12 + $0x7c0] sm:$0xf0] }
  0xcc   : > { %2817 = vmatpush.bf16.msrb.mxu3 %v8443_v60  ;;  %v10263_v60 = vld [vmem:[%s10754_s12 + $0x900] sm:$0xf0]  ;;  %v8183_v2 = vor.u32 %v10223_v56, %v8182_v55  ;;  %v10006_v55 = vld [vmem:[%s10754_s12 + $0xfc] sm:$0xf]  ;;  %v7324_v56 = vld [vmem:[%s10754_s12 + $0x10c] sm:$0xf0] }
  0xcd   : > { %2779 = vmatpush.bf16.msrb.mxu0 %v7943_v14  ;;  %v8343_v7 = vor.u32 %v10263_v60, %v8342_v59  ;;  %v7664_v14 = vld [vmem:[%s10754_s12 + $0x3b4] sm:$0xf0]  ;;  %v10046_v59 = vld [vmem:[%s10754_s12 + $0x23c] sm:$0xf]  ;;  %v7484_v60 = vld [vmem:[%s10754_s12 + $0x24c] sm:$0xf0] }
  0xce   : > { %2792 = vmatpush.bf16.msrb.mxu1 %v8103_v15  ;;  %v7863_v15 = vor.u32 %v10143_v63, %v7862_v62  ;;  %v10121_v62 = vld [vmem:[%s10754_s12 + $0x494] sm:$0xf]  ;;  %v7784_v63 = vld [vmem:[%s10754_s12 + $0x4a4] sm:$0xf0] }
  0xcf   : > { %2805 = vmatpush.bf16.msrb.mxu2 %v8263_v4  ;;  %v10183_v4 = vld [vmem:[%s10754_s12 + $0x680] sm:$0xf0] }
  0xd0   : > { %2818 = vmatpush.bf16.msrb.mxu3 %v8423_v8  ;;  %v8162_v8 = vld [vmem:[%s10754_s12 + $0x788] sm:$0xf]  ;;  %v8023_v18 = vor.u32 %v10183_v4, %v8022_v3  ;;  %v10076_v3 = vld [vmem:[%s10754_s12 + $0x32c] sm:$0xf]  ;;  %v7487_v4 = vor.u32 %v10046_v59, %v7484_v60  ;;  %v7244_v59 = vld [vmem:[%s10754_s12 + $0x6c] sm:$0xf0] }
  0xd1   : > { %2780 = vmatpush.bf16.msrb.mxu0 %v7923_v29  ;;  %v8163_v19 = vor.u32 %v10218_v9, %v8162_v8  ;;  %v2541_v29 = vpop.f32.mrf.mxu1  ;;  %v2554_v38 = vpop.f32.mrf.mxu2  ;;  %v7304_v8 = vld [vmem:[%s10754_s12 + $0xe4] sm:$0xf0]  ;;  %v10041_v9 = vld [vmem:[%s10754_s12 + $0x214] sm:$0xf] }
  0xd2   : > { %2793 = vmatpush.bf16.msrb.mxu1 %v8083_v30  ;;  %v7667_v30 = vor.u32 %v10091_v13, %v7664_v14  ;;  %v7764_v13 = vld [vmem:[%s10754_s12 + $0x47c] sm:$0xf0]  ;;  %v7607_v14 = vor.u32 %v10076_v3, %v7604_v5  ;;  %v10111_v29 = vld [vmem:[%s10754_s12 + $0x444] sm:$0xf]  ;;  %v10101_v3 = vld [vmem:[%s10754_s12 + $0x3f4] sm:$0xf] }
  0xd3   : > { %2806 = vmatpush.bf16.msrb.mxu2 %v8243_v16  ;;  %v10131_v16 = vld [vmem:[%s10754_s12 + $0x4e4] sm:$0xf] }
  0xd4   : > { %2819 = vmatpush.bf16.msrb.mxu3 %v8403_v22  ;;  %v7842_v22 = vld [vmem:[%s10754_s12 + $0x508] sm:$0xf]  ;;  %v9991_v38 = vld [vmem:[%s10754_s12 + $0x84] sm:$0xf] }
  0xd5   : > { %2781 = vmatpush.bf16.msrb.mxu0 %v7903_v43  ;;  %v7843_v36 = vor.u32 %v10138_v23, %v7842_v22  ;;  %v2567_v43 = vpop.f32.mrf.mxu3  ;;  %v7284_v22 = vld [vmem:[%s10754_s12 + $0xbc] sm:$0xf0] }
  0xd6   : > { %2794 = vmatpush.bf16.msrb.mxu1 %v8063_v45  ;;  %v7804_v45 = vld [vmem:[%s10754_s12 + $0x4cc] sm:$0xf0] }
  0xd7   : > { %2807 = vmatpush.bf16.msrb.mxu2 %v8223_v31  ;;  %v10086_v31 = vld [vmem:[%s10754_s12 + $0x37c] sm:$0xf]  ;;  %v7807_v58 = vor.u32 %v10126_v44, %v7804_v45  ;;  %v7724_v45 = vld [vmem:[%s10754_s12 + $0x42c] sm:$0xf0] }
  0xd8   : > { %2820 = vmatpush.bf16.msrb.mxu3 %v8383_v35  ;;  %v7827_v35 = vor.u32 %v10131_v16, %v7824_v17  ;;  %v10071_v16 = vld [vmem:[%s10754_s12 + $0x304] sm:$0xf]  ;;  %v7467_v17 = vor.u32 %v10041_v9, %v7464_v10  ;;  %v10106_v44 = vld [vmem:[%s10754_s12 + $0x41c] sm:$0xf]  ;;  %v7524_v9 = vld [vmem:[%s10754_s12 + $0x29c] sm:$0xf0] }
  0xd9   : > { %2782 = vmatpush.bf16.msrb.mxu0 %v7883_v61  ;;  %v2553_v61 = vadd.f32 %v11192_v0, %v2540_v42  ;;  %v7787_v0 = vor.u32 %v10121_v62, %v7784_v63  ;;  %v7424_v42 = vld [vmem:[%s10754_s12 + $0x1d4] sm:$0xf0]  ;;  %v7727_v62 = vor.u32 %v10106_v44, %v7724_v45  ;;  %v10026_v63 = vld [vmem:[%s10754_s12 + $0x19c] sm:$0xf]  ;;  %v8444_v45 = vld [vmem:[%s10754_s12 + $0x9cc] sm:$0xf0] }
  0xda   : > { %2795 = vmatpush.bf16.msrb.mxu1 %v8043_v1  ;;  %v10286_v44 = vld [vmem:[%s10754_s12 + $0x9bc] sm:$0xf] }
  0xdb   : > { %2808 = vmatpush.bf16.msrb.mxu2 %v8203_v47  ;;  %v7647_v47 = vor.u32 %v10086_v31, %v7644_v32  ;;  %v2566_v11 = vadd.f32 %v11197_v6, %v2553_v61  ;;  %v7767_v6 = vor.u32 %v10116_v12, %v7764_v13  ;;  %v9981_v12 = vld [vmem:[%s10754_s12 + $0x34] sm:$0xf]  ;;  %v7224_v13 = vld [vmem:[%s10754_s12 + $0x44] sm:$0xf0] }
  0xdc   : > { %2821 = vmatpush.bf16.msrb.mxu3 %v8363_v54  ;;  %v7624_v54 = vld [vmem:[%s10754_s12 + $0x364] sm:$0xf0] }
  0xdd   : > { %2783 = vmatpush.bf16.msrb.mxu0 %v7863_v15  ;;  %v7627_v1 = vor.u32 %v10081_v51, %v7624_v54  ;;  %v10061_v54 = vld [vmem:[%s10754_s12 + $0x2b4] sm:$0xf] }
  0xde   : > { %2796 = vmatpush.bf16.msrb.mxu1 %v8023_v18  ;;  %v7584_v18 = vld [vmem:[%s10754_s12 + $0x314] sm:$0xf0] }
  0xdf   : > { %2809 = vmatpush.bf16.msrb.mxu2 %v8183_v2  ;;  %v7327_v2 = vor.u32 %v10006_v55, %v7324_v56  ;;  %v7587_v31 = vor.u32 %v10071_v16, %v7584_v18  ;;  %v7544_v56 = vld [vmem:[%s10754_s12 + $0x2c4] sm:$0xf0]  ;;  %v10021_v16 = vld [vmem:[%s10754_s12 + $0x174] sm:$0xf] }
  0xe0   : > { %2822 = vmatpush.bf16.msrb.mxu3 %v8343_v7  ;;  %v10001_v7 = vld [vmem:[%s10754_s12 + $0xd4] sm:$0xf] }
  0xe1   : > { %2784 = vmatpush.bf16.msrb.mxu0 %v7843_v36  ;;  %v7307_v15 = vor.u32 %v10001_v7, %v7304_v8  ;;  %v2578_v23 = vpop.f32.mrf.mxu0  ;;  %v7564_v36 = vld [vmem:[%s10754_s12 + $0x2ec] sm:$0xf0]  ;;  %v7547_v7 = vor.u32 %v10061_v54, %v7544_v56  ;;  %v8264_v54 = vld [vmem:[%s10754_s12 + $0x864] sm:$0xf0] }
  0xe2   : > { %2797 = vmatpush.bf16.msrb.mxu1 %v8003_v41  ;;  %v2579_v26 = vadd.f32 %v2578_v23, %v2566_v11  ;;  %v2591_v28 = vpop.f32.mrf.mxu1  ;;  %v10031_v41 = vld [vmem:[%s10754_s12 + $0x1c4] sm:$0xf]  ;;  %v7567_v51 = vor.u32 %v10066_v33, %v7564_v36  ;;  %v8284_v33 = vld [vmem:[%s10754_s12 + $0x88c] sm:$0xf0]  ;;  %v7984_v36 = vld [vmem:[%s10754_s12 + $0x634] sm:$0xf0] }
  0xe3   : > { %2810 = vmatpush.bf16.msrb.mxu2 %v8163_v19  ;;  %v9996_v19 = vld [vmem:[%s10754_s12 + $0xac] sm:$0xf]  ;;  %v7427_v55 = vor.u32 %v10031_v41, %v7424_v42  ;;  %v10251_v11 = vld [vmem:[%s10754_s12 + $0x8a4] sm:$0xf]  ;;  %v7964_v56 = vld [vmem:[%s10754_s12 + $0x60c] sm:$0xf0] }
  0xe4   : > { %2823 = vmatpush.bf16.msrb.mxu3 %v8323_v25  ;;  %2785 = vmatmul.bf16.vlgmr.msrb.gmra.mxu0 %v10937_v49  ;;  %v7444_v25 = vld [vmem:[%s10754_s12 + $0x1fc] sm:$0xf0]  ;;  %v7287_v32 = vor.u32 %v9996_v19, %v7284_v22  ;;  %v2592_v34 = vadd.f32 %v2591_v28, %v2579_v26  ;;  %v10096_v19 = vld [vmem:[%s10754_s12 + $0x3cc] sm:$0xf]  ;;  %v8464_v26 = vld [vmem:[%s10754_s12 + $0x9f4] sm:$0xf0] }
  0xe5   : > { %2829 = vmatpush.bf16.msra.mxu0 %v7347_v48  ;;  %2798 = vmatmul.bf16.vlgmr.msrb.gmra.mxu1 %v10941_v52  ;;  %v7684_v22 = vld [vmem:[%s10754_s12 + $0x3dc] sm:$0xf0]  ;;  %v10211_v41 = vld [vmem:[%s10754_s12 + $0x764] sm:$0xf] }
  0xe6   : > { %2811 = vmatmul.bf16.vlgmr.msrb.gmra.mxu2 %v10933_v46  ;;  %2842 = vmatpush.bf16.msra.mxu1 %v7507_v53  ;;  %v7267_v53 = vor.u32 %v9991_v38, %v7264_v39  ;;  %v10016_v39 = vld [vmem:[%s10754_s12 + $0x14c] sm:$0xf] }
  0xe7   : > { %2855 = vmatpush.bf16.msra.mxu2 %v7667_v30  ;;  %2824 = vmatmul.bf16.vlgmr.msrb.gmra.mxu3 %v10939_v50  ;;  %v7744_v30 = vld [vmem:[%s10754_s12 + $0x454] sm:$0xf0] }
  0xe8   : > { %2868 = vmatpush.bf16.msra.mxu3 %v7827_v35  ;;  %v7447_v35 = vor.u32 %v10036_v24, %v7444_v25  ;;  %v7747_v40 = vor.u32 %v10111_v29, %v7744_v30  ;;  %v7227_v24 = vor.u32 %v9981_v12, %v7224_v13  ;;  %v10291_v25 = vld [vmem:[%s10754_s12 + $0x9e4] sm:$0xf]  ;;  %v10246_v30 = vld [vmem:[%s10754_s12 + $0x87c] sm:$0xf]  ;;  %v10276_v12 = vld [vmem:[%s10754_s12 + $0x96c] sm:$0xf] }
  0xe9   : > { %2830 = vmatpush.bf16.msra.mxu0 %v7327_v2  ;;  %v2604_v43 = vpop.f32.mrf.mxu2  ;;  %v2580_v61 = vpop.f32.mrf.mxu0  ;;  %v8467_v38 = vor.u32 %v10291_v25, %v8464_v26  ;;  %v8404_v13 = vld [vmem:[%s10754_s12 + $0x97c] sm:$0xf0]  ;;  %v10271_v26 = vld [vmem:[%s10754_s12 + $0x944] sm:$0xf] }
  0xea   : > { %2843 = vmatpush.bf16.msra.mxu1 %v7487_v4  ;;  %v2617_v48 = vpop.f32.mrf.mxu3  ;;  %v2593_v2 = vpop.f32.mrf.mxu1  ;;  %v7704_v4 = vld [vmem:[%s10754_s12 + $0x404] sm:$0xf0]  ;;  %v8124_v61 = vld [vmem:[%s10754_s12 + $0x74c] sm:$0xf0]  ;;  %v8084_v25 = vld [vmem:[%s10754_s12 + $0x6fc] sm:$0xf0] }
  0xeb   : > { %2856 = vmatpush.bf16.msra.mxu2 %v7647_v47  ;;  %v2605_v47 = vadd.f32 %v2604_v43, %v2592_v34  ;;  %v7687_v34 = vor.u32 %v10096_v19, %v7684_v22  ;;  %v8144_v43 = vld [vmem:[%s10754_s12 + $0x774] sm:$0xf0]  ;;  %v7924_v19 = vld [vmem:[%s10754_s12 + $0x5bc] sm:$0xf0] }
  0xec   : > { %2869 = vmatpush.bf16.msra.mxu3 %v7807_v58  ;;  %v9986_v58 = vld [vmem:[%s10754_s12 + $0x5c] sm:$0xf] }
  0xed   : > { %2831 = vmatpush.bf16.msra.mxu0 %v7307_v15  ;;  %v2618_v60 = vadd.f32 %v2617_v48, %v2605_v47  ;;  %v7247_v8 = vor.u32 %v9986_v58, %v7244_v59  ;;  %v7707_v15 = vor.u32 %v10101_v3, %v7704_v4  ;;  %v8287_v47 = vor.u32 %v10246_v30, %v8284_v33  ;;  %v10236_v3 = vld [vmem:[%s10754_s12 + $0x82c] sm:$0xf]  ;;  %v8244_v4 = vld [vmem:[%s10754_s12 + $0x83c] sm:$0xf0]  ;;  %v8204_v33 = vld [vmem:[%s10754_s12 + $0x7ec] sm:$0xf0] }
  0xee   : > { %2844 = vmatpush.bf16.msra.mxu1 %v7467_v17  ;;  %v7384_v17 = vld [vmem:[%s10754_s12 + $0x184] sm:$0xf0]  ;;  %v8147_v58 = vor.u32 %v10211_v41, %v8144_v43  ;;  %v8447_v59 = vor.u32 %v10286_v44, %v8444_v45  ;;  %v10266_v41 = vld [vmem:[%s10754_s12 + $0x91c] sm:$0xf] }
  0xef   : > { %2857 = vmatpush.bf16.msra.mxu2 %v7627_v1  ;;  %v7404_v1 = vld [vmem:[%s10754_s12 + $0x1ac] sm:$0xf0]  ;;  %v11265_v5 = vpack.c.bf16 %v2618_v60, %v2618_v60  ;;  %v7387_v29 = vor.u32 %v10021_v16, %v7384_v17  ;;  %v10206_v60 = vld [vmem:[%s10754_s12 + $0x73c] sm:$0xf]  ;;  %v10231_v16 = vld [vmem:[%s10754_s12 + $0x804] sm:$0xf] }
  0xf0   : > { %2870 = vmatpush.bf16.msra.mxu3 %v7787_v0  ;;  %v10056_v0 = vld [vmem:[%s10754_s12 + $0x28c] sm:$0xf]  ;;  %v7407_v10 = vor.u32 %v10026_v63, %v7404_v1  ;;  %v8424_v63 = vld [vmem:[%s10754_s12 + $0x9a4] sm:$0xf0]  ;;  %v8224_v17 = vld [vmem:[%s10754_s12 + $0x814] sm:$0xf0] }
  0xf1   : > { %2832 = vmatpush.bf16.msra.mxu0 %v7287_v32  ;;  %3100 = vrot.lane.b32.xlu0 %v11265_v5, %s10692_s30  ;;  %v2606_v18 = vpop.f32.mrf.mxu2  ;;  %v7204_v32 = vld [vmem:[%s10754_s12 + $0x1c] sm:$0xf0]  ;;  %v8227_v30 = vor.u32 %v10231_v16, %v8224_v17 }
  0xf2   : > { %2845 = vmatpush.bf16.msra.mxu1 %v7447_v35  ;;  %v2619_v23 = vpop.f32.mrf.mxu3  ;;  %v10171_v35 = vld [vmem:[%s10754_s12 + $0x624] sm:$0xf]  ;;  %v10156_v18 = vld [vmem:[%s10754_s12 + $0x5ac] sm:$0xf] }
  0xf3   : > { %2858 = vmatpush.bf16.msra.mxu2 %v7607_v14  ;;  %v8304_v14 = vld [vmem:[%s10754_s12 + $0x8b4] sm:$0xf0]  ;;  %v7987_v48 = vor.u32 %v10171_v35, %v7984_v36  ;;  %v8407_v23 = vor.u32 %v10276_v12, %v8404_v13  ;;  %v10181_v12 = vld [vmem:[%s10754_s12 + $0x674] sm:$0xf]  ;;  %v8024_v13 = vld [vmem:[%s10754_s12 + $0x684] sm:$0xf0] }
  0xf4   : > { %2871 = vmatpush.bf16.msra.mxu3 %v7767_v6  ;;  %v7527_v6 = vor.u32 %v10056_v0, %v7524_v9  ;;  %v8307_v28 = vor.u32 %v10251_v11, %v8304_v14  ;;  %v8127_v0 = vor.u32 %v10206_v60, %v8124_v61  ;;  %v8104_v11 = vld [vmem:[%s10754_s12 + $0x724] sm:$0xf0]  ;;  %v8247_v14 = vor.u32 %v10236_v3, %v8244_v4  ;;  %v7904_v35 = vld [vmem:[%s10754_s12 + $0x594] sm:$0xf0]  ;;  %v8044_v60 = vld [vmem:[%s10754_s12 + $0x6ac] sm:$0xf0] }
  0xf5   : > { %2833 = vmatpush.bf16.msra.mxu0 %v7267_v53  ;;  %v10261_v61 = vld [vmem:[%s10754_s12 + $0x8f4] sm:$0xf]  ;;  %v10216_v4 = vld [vmem:[%s10754_s12 + $0x78c] sm:$0xf] }
  0xf6   : > { %2846 = vmatpush.bf16.msra.mxu1 %v7427_v55  ;;  %v10166_v55 = vld [vmem:[%s10754_s12 + $0x5fc] sm:$0xf] }
  0xf7   : > { %2859 = vmatpush.bf16.msra.mxu2 %v7587_v31  ;;  %v9976_v31 = vld [vmem:[%s10754_s12 + $0xc] sm:$0xf]  ;;  %v7967_v2 = vor.u32 %v10166_v55, %v7964_v56 }
  0xf8   : > { %2872 = vmatpush.bf16.msra.mxu3 %v7747_v40  ;;  %v7364_v40 = vld [vmem:[%s10754_s12 + $0x15c] sm:$0xf0]  ;;  %v7207_v42 = vor.u32 %v9976_v31, %v7204_v32  ;;  %v7927_v31 = vor.u32 %v10156_v18, %v7924_v19  ;;  %v10226_v32 = vld [vmem:[%s10754_s12 + $0x7dc] sm:$0xf]  ;;  %v7830_v19 = vld [vmem:[%s10754_s12 + $0x4e8] sm:$0xf] }
  0xf9   : > { %2834 = vmatpush.bf16.msra.mxu0 %v7247_v8  ;;  %v7367_v53 = vor.u32 %v10016_v39, %v7364_v40  ;;  %v7944_v8 = vld [vmem:[%s10754_s12 + $0x5e4] sm:$0xf0]  ;;  %v10191_v39 = vld [vmem:[%s10754_s12 + $0x6c4] sm:$0xf]  ;;  %v8064_v40 = vld [vmem:[%s10754_s12 + $0x6d4] sm:$0xf0]  ;;  %v8207_v44 = vor.u32 %v10226_v32, %v8204_v33 }
  0xfa   : > { %2847 = vmatpush.bf16.msra.mxu1 %v7407_v10  ;;  %v10201_v10 = vld [vmem:[%s10754_s12 + $0x714] sm:$0xf]  ;;  %v8067_v55 = vor.u32 %v10191_v39, %v8064_v40  ;;  %v7350_v33 = vld [vmem:[%s10754_s12 + $0x128] sm:$0xf]  ;;  %v8004_v39 = vld [vmem:[%s10754_s12 + $0x65c] sm:$0xf0] }
  0xfb   : > { %2860 = vmatpush.bf16.msra.mxu2 %v7567_v51  ;;  %v10241_v51 = vld [vmem:[%s10754_s12 + $0x854] sm:$0xf]  ;;  %v8107_v22 = vor.u32 %v10201_v10, %v8104_v11  ;;  %v7670_v10 = vld [vmem:[%s10754_s12 + $0x3a8] sm:$0xf] }
  0xfc   : > { %2873 = vmatpush.bf16.msra.mxu3 %v7727_v62  ;;  %v10281_v62 = vld [vmem:[%s10754_s12 + $0x994] sm:$0xf]  ;;  %v8267_v1 = vor.u32 %v10241_v51, %v8264_v54  ;;  %v8184_v51 = vld [vmem:[%s10754_s12 + $0x7c4] sm:$0xf0]  ;;  %v7884_v54 = vld [vmem:[%s10754_s12 + $0x56c] sm:$0xf0] }
  0xfd   : > { %2835 = vmatpush.bf16.msra.mxu0 %v7227_v24  ;;  %v8427_v9 = vor.u32 %v10281_v62, %v8424_v63  ;;  %v8344_v62 = vld [vmem:[%s10754_s12 + $0x904] sm:$0xf0]  ;;  %v844_v63 = vperm.slane %v11186_v57, 1  ;;  %v10094_v57 = vld [vmem:[%s10754_s12 + $0x3b8] sm:$0xf0] }
  0xfe   : > { %2848 = vmatpush.bf16.msra.mxu1 %v7387_v29  ;;  %v8347_v11 = vor.u32 %v10261_v61, %v8344_v62  ;;  %v7510_v40 = vld [vmem:[%s10754_s12 + $0x268] sm:$0xf]  ;;  %v7490_v61 = vld [vmem:[%s10754_s12 + $0x240] sm:$0xf]  ;;  %v10049_v62 = vld [vmem:[%s10754_s12 + $0x250] sm:$0xf0] }
  0xff   : > { %2861 = vmatpush.bf16.msra.mxu2 %v7547_v7  ;;  %v10161_v7 = vld [vmem:[%s10754_s12 + $0x5d4] sm:$0xf] }
 0x100   : > { %2874 = vmatpush.bf16.msra.mxu3 %v7707_v15  ;;  %v7947_v15 = vor.u32 %v10161_v7, %v7944_v8  ;;  %v8164_v7 = vld [vmem:[%s10754_s12 + $0x79c] sm:$0xf0]  ;;  %v10141_v8 = vld [vmem:[%s10754_s12 + $0x534] sm:$0xf] }
 0x101   : > { %2836 = vmatpush.bf16.msra.mxu0 %v7207_v42  ;;  %v11318_v24 = vpop.f32.mrf.mxu0  ;;  %v8364_v42 = vld [vmem:[%s10754_s12 + $0x92c] sm:$0xf0]  ;;  %v8167_v17 = vor.u32 %v10216_v4, %v8164_v7  ;;  %v10079_v4 = vld [vmem:[%s10754_s12 + $0x340] sm:$0xf0]  ;;  %v7310_v7 = vld [vmem:[%s10754_s12 + $0xd8] sm:$0xf] }
 0x102   : > { %2849 = vmatpush.bf16.msra.mxu1 %v7367_v53  ;;  %v11323_v29 = vpop.f32.mrf.mxu1  ;;  %v10146_v53 = vld [vmem:[%s10754_s12 + $0x55c] sm:$0xf]  ;;  %v8367_v56 = vor.u32 %v10266_v41, %v8364_v42 }
 0x103   : > { %2862 = vmatpush.bf16.msra.mxu2 %v7527_v6  ;;  %v10196_v6 = vld [vmem:[%s10754_s12 + $0x6ec] sm:$0xf]  ;;  %v7887_v3 = vor.u32 %v10146_v53, %v7884_v54  ;;  %v10054_v42 = vld [vmem:[%s10754_s12 + $0x278] sm:$0xf0] }
 0x104   : > { %2875 = vmatpush.bf16.msra.mxu3 %v7687_v34  ;;  %2837 = vmatmul.bf16.vlgmr.msra.gmra.mxu0 %v10872_v21  ;;  %v10151_v34 = vld [vmem:[%s10754_s12 + $0x584] sm:$0xf]  ;;  %v8087_v36 = vor.u32 %v10196_v6, %v8084_v25  ;;  %v7671_v6 = vor.u32 %v10094_v57, %v7670_v10  ;;  %v7650_v25 = vld [vmem:[%s10754_s12 + $0x380] sm:$0xf]  ;;  %v10084_v54 = vld [vmem:[%s10754_s12 + $0x368] sm:$0xf0] }
 0x105   : > { %2881 = vmatpush.bf16.msrb.mxu0 %v7987_v48  ;;  %2850 = vmatmul.bf16.vlgmr.msra.gmra.mxu1 %v10887_v37  ;;  %v7907_v45 = vor.u32 %v10151_v34, %v7904_v35  ;;  %v10014_v34 = vld [vmem:[%s10754_s12 + $0x138] sm:$0xf0]  ;;  %v2631_v35 = vadd.f32 %v11318_v24, %v844_v63  ;;  %v7630_v24 = vld [vmem:[%s10754_s12 + $0x358] sm:$0xf] }
 0x106   : > { %2863 = vmatmul.bf16.vlgmr.msra.gmra.mxu2 %v10870_v20  ;;  %2894 = vmatpush.bf16.msrb.mxu1 %v8147_v58  ;;  %v10186_v58 = vld [vmem:[%s10754_s12 + $0x69c] sm:$0xf]  ;;  %v7790_v63 = vld [vmem:[%s10754_s12 + $0x498] sm:$0xf] }
 0x107   : > { %2907 = vmatpush.bf16.msrb.mxu2 %v8307_v28  ;;  %2876 = vmatmul.bf16.vlgmr.msra.gmra.mxu3 %v10877_v27  ;;  %v8384_v28 = vld [vmem:[%s10754_s12 + $0x954] sm:$0xf0] }
 0x108   : > { %2920 = vmatpush.bf16.msrb.mxu3 %v8467_v38  ;;  %v8387_v38 = vor.u32 %v10271_v26, %v8384_v28  ;;  %v10136_v26 = vld [vmem:[%s10754_s12 + $0x50c] sm:$0xf]  ;;  %v7844_v28 = vld [vmem:[%s10754_s12 + $0x51c] sm:$0xf0]  ;;  %v7470_v57 = vld [vmem:[%s10754_s12 + $0x218] sm:$0xf] }
 0x109   : > { %2882 = vmatpush.bf16.msrb.mxu0 %v7967_v2  ;;  %v11333_v43 = vpop.f32.mrf.mxu2  ;;  %v7847_v41 = vor.u32 %v10136_v26, %v7844_v28  ;;  %v10039_v28 = vld [vmem:[%s10754_s12 + $0x200] sm:$0xf0] }
 0x10a   : > { %2895 = vmatpush.bf16.msrb.mxu1 %v8127_v0  ;;  %v11336_v48 = vpop.f32.mrf.mxu3  ;;  %v7864_v0 = vld [vmem:[%s10754_s12 + $0x544] sm:$0xf0] }
 0x10b   : > { %2908 = vmatpush.bf16.msrb.mxu2 %v8287_v47  ;;  %v10221_v47 = vld [vmem:[%s10754_s12 + $0x7b4] sm:$0xf]  ;;  %v7867_v18 = vor.u32 %v10141_v8, %v7864_v0  ;;  %v10004_v8 = vld [vmem:[%s10754_s12 + $0xe8] sm:$0xf0] }
 0x10c   : > { %2921 = vmatpush.bf16.msrb.mxu3 %v8447_v59  ;;  %v2632_v59 = vpop.f32.mrf.mxu0  ;;  %v8187_v2 = vor.u32 %v10221_v47, %v8184_v51  ;;  %v7351_v51 = vor.u32 %v10014_v34, %v7350_v33  ;;  %v7570_v34 = vld [vmem:[%s10754_s12 + $0x2e0] sm:$0xf] }
 0x10d   : > { %2883 = vmatpush.bf16.msrb.mxu0 %v7947_v15  ;;  %v8324_v15 = vld [vmem:[%s10754_s12 + $0x8dc] sm:$0xf0]  ;;  %v7511_v59 = vor.u32 %v10054_v42, %v7510_v40  ;;  %v10034_v42 = vld [vmem:[%s10754_s12 + $0x1d8] sm:$0xf0] }
 0x10e   : > { %2896 = vmatpush.bf16.msrb.mxu1 %v8107_v22  ;;  %v10134_v22 = vld [vmem:[%s10754_s12 + $0x4f8] sm:$0xf0] }
 0x10f   : > { %2909 = vmatpush.bf16.msrb.mxu2 %v8267_v1  ;;  %v2645_v1 = vpop.f32.mrf.mxu1 }
 0x110   : > { %2922 = vmatpush.bf16.msrb.mxu3 %v8427_v9  ;;  %v8047_v9 = vor.u32 %v10186_v58, %v8044_v60  ;;  %v2644_v58 = vadd.f32 %v11323_v29, %v2631_v35  ;;  %v10124_v1 = vld [vmem:[%s10754_s12 + $0x4a8] sm:$0xf0]  ;;  %v10069_v35 = vld [vmem:[%s10754_s12 + $0x2f0] sm:$0xf0] }
 0x111   : > { %2884 = vmatpush.bf16.msrb.mxu0 %v7927_v31  ;;  %v2658_v16 = vpop.f32.mrf.mxu2  ;;  %v10089_v31 = vld [vmem:[%s10754_s12 + $0x390] sm:$0xf0]  ;;  %v7791_v10 = vor.u32 %v10124_v1, %v7790_v63  ;;  %v7410_v1 = vld [vmem:[%s10754_s12 + $0x1a0] sm:$0xf] }
 0x112   : > { %2897 = vmatpush.bf16.msrb.mxu1 %v8087_v36  ;;  %v7831_v36 = vor.u32 %v10134_v22, %v7830_v19  ;;  %v7651_v47 = vor.u32 %v10089_v31, %v7650_v25  ;;  %v2657_v0 = vadd.f32 %v11333_v43, %v2644_v58  ;;  %v7590_v43 = vld [vmem:[%s10754_s12 + $0x308] sm:$0xf]  ;;  %v10074_v16 = vld [vmem:[%s10754_s12 + $0x318] sm:$0xf0]  ;;  %v7450_v25 = vld [vmem:[%s10754_s12 + $0x1f0] sm:$0xf] }
 0x113   : > { %2910 = vmatpush.bf16.msrb.mxu2 %v8247_v14  ;;  %v10256_v14 = vld [vmem:[%s10754_s12 + $0x8cc] sm:$0xf]  ;;  %v10114_v31 = vld [vmem:[%s10754_s12 + $0x458] sm:$0xf0] }
 0x114   : > { %2923 = vmatpush.bf16.msrb.mxu3 %v8407_v23  ;;  %v2671_v23 = vpop.f32.mrf.mxu3  ;;  %v8327_v32 = vor.u32 %v10256_v14, %v8324_v15  ;;  %v7311_v15 = vor.u32 %v10004_v8, %v7310_v7  ;;  %v2670_v19 = vadd.f32 %v11336_v48, %v2657_v0  ;;  %v7591_v48 = vor.u32 %v10074_v16, %v7590_v43  ;;  %v7530_v0 = vld [vmem:[%s10754_s12 + $0x290] sm:$0xf]  ;;  %v7390_v16 = vld [vmem:[%s10754_s12 + $0x178] sm:$0xf] }
 0x115   : > { %2885 = vmatpush.bf16.msrb.mxu0 %v7907_v45  ;;  %v10129_v45 = vld [vmem:[%s10754_s12 + $0x4d0] sm:$0xf0] }
 0x116   : > { %2898 = vmatpush.bf16.msrb.mxu1 %v8067_v55  ;;  %v7330_v55 = vld [vmem:[%s10754_s12 + $0x100] sm:$0xf] }
 0x117   : > { %2911 = vmatpush.bf16.msrb.mxu2 %v8227_v30  ;;  %v8027_v30 = vor.u32 %v10181_v12, %v8024_v13  ;;  %v7770_v12 = vld [vmem:[%s10754_s12 + $0x470] sm:$0xf]  ;;  %v10119_v13 = vld [vmem:[%s10754_s12 + $0x480] sm:$0xf0] }
 0x118   : > { %2924 = vmatpush.bf16.msrb.mxu3 %v8387_v38  ;;  %v10176_v38 = vld [vmem:[%s10754_s12 + $0x64c] sm:$0xf] }
 0x119   : > { %2886 = vmatpush.bf16.msrb.mxu0 %v7887_v3  ;;  %v8007_v53 = vor.u32 %v10176_v38, %v8004_v39  ;;  %v7610_v3 = vld [vmem:[%s10754_s12 + $0x330] sm:$0xf]  ;;  %v9994_v38 = vld [vmem:[%s10754_s12 + $0x98] sm:$0xf0]  ;;  %v7451_v39 = vor.u32 %v10039_v28, %v7450_v25 }
 0x11a   : > { %2899 = vmatpush.bf16.msrb.mxu1 %v8047_v9  ;;  %v7491_v9 = vor.u32 %v10049_v62, %v7490_v61  ;;  %v7611_v14 = vor.u32 %v10079_v4, %v7610_v3  ;;  %v7250_v61 = vld [vmem:[%s10754_s12 + $0x60] sm:$0xf]  ;;  %v9989_v62 = vld [vmem:[%s10754_s12 + $0x70] sm:$0xf0]  ;;  %v7710_v3 = vld [vmem:[%s10754_s12 + $0x3f8] sm:$0xf] }
 0x11b   : > { %2912 = vmatpush.bf16.msrb.mxu2 %v8207_v44  ;;  %v7810_v44 = vld [vmem:[%s10754_s12 + $0x4c0] sm:$0xf]  ;;  %v10104_v4 = vld [vmem:[%s10754_s12 + $0x408] sm:$0xf0] }
 0x11c   : > { %2925 = vmatpush.bf16.msrb.mxu3 %v8367_v56  ;;  %v10009_v56 = vld [vmem:[%s10754_s12 + $0x110] sm:$0xf0]  ;;  %v7811_v60 = vor.u32 %v10129_v45, %v7810_v44  ;;  %v7730_v44 = vld [vmem:[%s10754_s12 + $0x420] sm:$0xf]  ;;  %v7711_v43 = vor.u32 %v10104_v4, %v7710_v3  ;;  %v8250_v4 = vld [vmem:[%s10754_s12 + $0x830] sm:$0xf] }
 0x11d   : > { %2887 = vmatpush.bf16.msrb.mxu0 %v7867_v18  ;;  %v7331_v29 = vor.u32 %v10009_v56, %v7330_v55  ;;  %v9999_v18 = vld [vmem:[%s10754_s12 + $0xc0] sm:$0xf0]  ;;  %v10109_v45 = vld [vmem:[%s10754_s12 + $0x430] sm:$0xf0]  ;;  %v10064_v55 = vld [vmem:[%s10754_s12 + $0x2c8] sm:$0xf0] }
 0x11e   : > { %2900 = vmatpush.bf16.msrb.mxu1 %v8027_v30  ;;  %v7750_v30 = vld [vmem:[%s10754_s12 + $0x448] sm:$0xf]  ;;  %v7731_v63 = vor.u32 %v10109_v45, %v7730_v44  ;;  %v10214_v44 = vld [vmem:[%s10754_s12 + $0x778] sm:$0xf0]  ;;  %v8450_v45 = vld [vmem:[%s10754_s12 + $0x9c0] sm:$0xf] }
 0x11f   : > { %2913 = vmatpush.bf16.msrb.mxu2 %v8187_v2  ;;  %v7631_v2 = vor.u32 %v10084_v54, %v7630_v24  ;;  %v7751_v40 = vor.u32 %v10114_v31, %v7750_v30  ;;  %v7550_v54 = vld [vmem:[%s10754_s12 + $0x2b8] sm:$0xf]  ;;  %v8290_v30 = vld [vmem:[%s10754_s12 + $0x880] sm:$0xf]  ;;  %v10249_v31 = vld [vmem:[%s10754_s12 + $0x890] sm:$0xf0] }
 0x120   : > { %2926 = vmatpush.bf16.msrb.mxu3 %v8347_v11  ;;  %v10044_v11 = vld [vmem:[%s10754_s12 + $0x228] sm:$0xf0]  ;;  %v7551_v8 = vor.u32 %v10064_v55, %v7550_v54  ;;  %v8270_v55 = vld [vmem:[%s10754_s12 + $0x858] sm:$0xf] }
 0x121   : > { %2888 = vmatpush.bf16.msrb.mxu0 %v7847_v41  ;;  %v2682_v22 = vpop.f32.mrf.mxu0  ;;  %v7471_v23 = vor.u32 %v10044_v11, %v7470_v57  ;;  %v7430_v41 = vld [vmem:[%s10754_s12 + $0x1c8] sm:$0xf]  ;;  %v10254_v11 = vld [vmem:[%s10754_s12 + $0x8b8] sm:$0xf0] }
 0x122   : > { %2901 = vmatpush.bf16.msrb.mxu1 %v8007_v53  ;;  %v2695_v26 = vpop.f32.mrf.mxu1  ;;  %v8310_v57 = vld [vmem:[%s10754_s12 + $0x8a8] sm:$0xf] }
 0x123   : > { %2914 = vmatpush.bf16.msrb.mxu2 %v8167_v17  ;;  %v7290_v17 = vld [vmem:[%s10754_s12 + $0xb0] sm:$0xf] }
 0x124   : > { %2927 = vmatpush.bf16.msrb.mxu3 %v8327_v32  ;;  %2889 = vmatmul.bf16.vlgmr.msrb.gmra.mxu0 %v10937_v49  ;;  %v2683_v32 = vadd.f32 %v2682_v22, %v2670_v19  ;;  %v7291_v33 = vor.u32 %v9999_v18, %v7290_v17  ;;  %v10024_v17 = vld [vmem:[%s10754_s12 + $0x188] sm:$0xf0]  ;;  %v7690_v18 = vld [vmem:[%s10754_s12 + $0x3d0] sm:$0xf]  ;;  %v10099_v19 = vld [vmem:[%s10754_s12 + $0x3e0] sm:$0xf0] }
 0x125   : > { %2933 = vmatpush.bf16.msra.mxu0 %v7351_v51  ;;  %2902 = vmatmul.bf16.vlgmr.msrb.gmra.mxu1 %v10941_v52  ;;  %v7571_v51 = vor.u32 %v10069_v35, %v7570_v34  ;;  %v9979_v34 = vld [vmem:[%s10754_s12 + $0x20] sm:$0xf0]  ;;  %v7691_v35 = vor.u32 %v10099_v19, %v7690_v18  ;;  %v7930_v18 = vld [vmem:[%s10754_s12 + $0x5b0] sm:$0xf] }
 0x126   : > { %2915 = vmatmul.bf16.vlgmr.msrb.gmra.mxu2 %v10933_v46  ;;  %2946 = vmatpush.bf16.msra.mxu1 %v7511_v59 }
 0x127   : > { %2959 = vmatpush.bf16.msra.mxu2 %v7671_v6  ;;  %2928 = vmatmul.bf16.vlgmr.msrb.gmra.mxu3 %v10939_v50  ;;  %v7771_v6 = vor.u32 %v10119_v13, %v7770_v12 }
 0x128   : > { %2972 = vmatpush.bf16.msra.mxu3 %v7831_v36  ;;  %v7270_v36 = vld [vmem:[%s10754_s12 + $0x88] sm:$0xf] }
 0x129   : > { %2934 = vmatpush.bf16.msra.mxu0 %v7331_v29  ;;  %v7271_v24 = vor.u32 %v9994_v38, %v7270_v36  ;;  %v2708_v53 = vpop.f32.mrf.mxu2  ;;  %v2684_v59 = vpop.f32.mrf.mxu0  ;;  %v10029_v29 = vld [vmem:[%s10754_s12 + $0x1b0] sm:$0xf0]  ;;  %v7990_v36 = vld [vmem:[%s10754_s12 + $0x628] sm:$0xf]  ;;  %v10174_v38 = vld [vmem:[%s10754_s12 + $0x638] sm:$0xf0] }
 0x12a   : > { %2947 = vmatpush.bf16.msra.mxu1 %v7491_v9  ;;  %v2721_v58 = vpop.f32.mrf.mxu3  ;;  %v7251_v9 = vor.u32 %v9989_v62, %v7250_v61  ;;  %v7411_v13 = vor.u32 %v10029_v29, %v7410_v1  ;;  %v7970_v59 = vld [vmem:[%s10754_s12 + $0x600] sm:$0xf]  ;;  %v8430_v1 = vld [vmem:[%s10754_s12 + $0x998] sm:$0xf] }
 0x12b   : > { %2960 = vmatpush.bf16.msra.mxu2 %v7651_v47  ;;  %v2696_v47 = vadd.f32 %v2695_v26, %v2683_v32  ;;  %v8311_v26 = vor.u32 %v10254_v11, %v8310_v57  ;;  %v7210_v32 = vld [vmem:[%s10754_s12 + $0x10] sm:$0xf]  ;;  %v8130_v62 = vld [vmem:[%s10754_s12 + $0x740] sm:$0xf]  ;;  %v10204_v57 = vld [vmem:[%s10754_s12 + $0x728] sm:$0xf0] }
 0x12c   : > { %2973 = vmatpush.bf16.msra.mxu3 %v7811_v60  ;;  %v7431_v60 = vor.u32 %v10034_v42, %v7430_v41  ;;  %v10019_v41 = vld [vmem:[%s10754_s12 + $0x160] sm:$0xf0]  ;;  %v8150_v42 = vld [vmem:[%s10754_s12 + $0x768] sm:$0xf]  ;;  %v8410_v11 = vld [vmem:[%s10754_s12 + $0x970] sm:$0xf] }
 0x12d   : > { %2935 = vmatpush.bf16.msra.mxu0 %v7311_v15  ;;  %v2709_v56 = vadd.f32 %v2708_v53, %v2696_v47  ;;  %v9984_v15 = vld [vmem:[%s10754_s12 + $0x48] sm:$0xf0]  ;;  %v10289_v47 = vld [vmem:[%s10754_s12 + $0x9d0] sm:$0xf0]  ;;  %v7991_v53 = vor.u32 %v10174_v38, %v7990_v36  ;;  %v10194_v36 = vld [vmem:[%s10754_s12 + $0x6d8] sm:$0xf0] }
 0x12e   : > { %2948 = vmatpush.bf16.msra.mxu1 %v7471_v23  ;;  %v8470_v23 = vld [vmem:[%s10754_s12 + $0x9e8] sm:$0xf]  ;;  %v8451_v61 = vor.u32 %v10289_v47, %v8450_v45  ;;  %v8370_v38 = vld [vmem:[%s10754_s12 + $0x920] sm:$0xf]  ;;  %v10224_v45 = vld [vmem:[%s10754_s12 + $0x7c8] sm:$0xf0] }
 0x12f   : > { %2961 = vmatpush.bf16.msra.mxu2 %v7631_v2  ;;  %v2697_v2 = vpop.f32.mrf.mxu1  ;;  %v2722_v7 = vadd.f32 %v2721_v58, %v2709_v56  ;;  %v10244_v56 = vld [vmem:[%s10754_s12 + $0x868] sm:$0xf0]  ;;  %v8151_v58 = vor.u32 %v10214_v44, %v8150_v42  ;;  %v8190_v44 = vld [vmem:[%s10754_s12 + $0x7b8] sm:$0xf] }
 0x130   : > { %2974 = vmatpush.bf16.msra.mxu3 %v7791_v10  ;;  %v10059_v10 = vld [vmem:[%s10754_s12 + $0x2a0] sm:$0xf0]  ;;  %v10284_v2 = vld [vmem:[%s10754_s12 + $0x9a8] sm:$0xf0]  ;;  %v8271_v29 = vor.u32 %v10244_v56, %v8270_v55  ;;  %v10189_v55 = vld [vmem:[%s10754_s12 + $0x6b0] sm:$0xf0] }
 0x131   : > { %2936 = vmatpush.bf16.msra.mxu0 %v7291_v33  ;;  %v11422_v12 = vpack.c.bf16 %v2722_v7, %v2722_v7  ;;  %v7531_v22 = vor.u32 %v10059_v10, %v7530_v0  ;;  %v2710_v25 = vpop.f32.mrf.mxu2  ;;  %v7391_v33 = vor.u32 %v10024_v17, %v7390_v16  ;;  %v10239_v7 = vld [vmem:[%s10754_s12 + $0x840] sm:$0xf0]  ;;  %v10164_v0 = vld [vmem:[%s10754_s12 + $0x5e8] sm:$0xf0]  ;;  %v8110_v10 = vld [vmem:[%s10754_s12 + $0x718] sm:$0xf] }
 0x132   : > { %2949 = vmatpush.bf16.msra.mxu1 %v7451_v39  ;;  %v10234_v16 = vld [vmem:[%s10754_s12 + $0x818] sm:$0xf0]  ;;  %v8111_v17 = vor.u32 %v10204_v57, %v8110_v10  ;;  %v8350_v56 = vld [vmem:[%s10754_s12 + $0x8f8] sm:$0xf]  ;;  %v11503_v10 = vld [vmem:[%s10759_s16] sm:$0x1f] }
 0x133   : > { %2962 = vmatpush.bf16.msra.mxu2 %v7611_v14  ;;  %13475 = vst [vmem:[#allocation6_spill] sm:$0xff] %v11422_v12  ;;  %v7230_v14 = vld [vmem:[%s10754_s12 + $0x38] sm:$0xf]  ;;  %3041 = vrot.lane.b32.xlu0 %v11422_v12, %s10692_s30  ;;  %v845_v57 = vperm.slane %v11503_v10, 2 }
 0x134   : > { %2975 = vmatpush.bf16.msra.mxu3 %v7771_v6  ;;  %v10294_v6 = vld [vmem:[%s10754_s12 + $0x9f8] sm:$0xf0]  ;;  %v7231_v28 = vor.u32 %v9984_v15, %v7230_v14  ;;  %v8251_v14 = vor.u32 %v10239_v7, %v8250_v4  ;;  %v8030_v7 = vld [vmem:[%s10754_s12 + $0x678] sm:$0xf] }
 0x135   : > { %2937 = vmatpush.bf16.msra.mxu0 %v7271_v24  ;;  %v8471_v39 = vor.u32 %v10294_v6, %v8470_v23  ;;  %v7211_v24 = vor.u32 %v9979_v34, %v7210_v32  ;;  %v8390_v23 = vld [vmem:[%s10754_s12 + $0x948] sm:$0xf]  ;;  %v10274_v6 = vld [vmem:[%s10754_s12 + $0x958] sm:$0xf0] }
 0x136   : > { %2950 = vmatpush.bf16.msra.mxu1 %v7431_v60  ;;  %v10169_v60 = vld [vmem:[%s10754_s12 + $0x610] sm:$0xf0]  ;;  %v7910_v32 = vld [vmem:[%s10754_s12 + $0x588] sm:$0xf] }
 0x137   : > { %2963 = vmatpush.bf16.msra.mxu2 %v7591_v48  ;;  %v2723_v48 = vpop.f32.mrf.mxu3  ;;  %v7971_v3 = vor.u32 %v10169_v60, %v7970_v59  ;;  %v8070_v34 = vld [vmem:[%s10754_s12 + $0x6c8] sm:$0xf]  ;;  %v8191_v59 = vor.u32 %v10224_v45, %v8190_v44 }
 0x138   : > { %2976 = vmatpush.bf16.msra.mxu3 %v7751_v40  ;;  %v7370_v40 = vld [vmem:[%s10754_s12 + $0x150] sm:$0xf]  ;;  %v10154_v48 = vld [vmem:[%s10754_s12 + $0x598] sm:$0xf0]  ;;  %v8071_v47 = vor.u32 %v10194_v36, %v8070_v34 }
 0x139   : > { %2938 = vmatpush.bf16.msra.mxu0 %v7251_v9  ;;  %v7371_v54 = vor.u32 %v10019_v41, %v7370_v40  ;;  %v8431_v9 = vor.u32 %v10284_v2, %v8430_v1  ;;  %v7911_v42 = vor.u32 %v10154_v48, %v7910_v32 }
 0x13a   : > { %2951 = vmatpush.bf16.msra.mxu1 %v7411_v13  ;;  %v10279_v13 = vld [vmem:[%s10754_s12 + $0x980] sm:$0xf0] }
 0x13b   : > { %2964 = vmatpush.bf16.msra.mxu2 %v7571_v51  ;;  %v8291_v51 = vor.u32 %v10249_v31, %v8290_v30  ;;  %v8411_v19 = vor.u32 %v10279_v13, %v8410_v11 }
 0x13c   : > { %2977 = vmatpush.bf16.msra.mxu3 %v7731_v63  ;;  %v10209_v63 = vld [vmem:[%s10754_s12 + $0x750] sm:$0xf0] }
 0x13d   : > { %2939 = vmatpush.bf16.msra.mxu0 %v7231_v28  ;;  %v10229_v28 = vld [vmem:[%s10754_s12 + $0x7f0] sm:$0xf0] }
 0x13e   : > { %2952 = vmatpush.bf16.msra.mxu1 %v7391_v33  ;;  %v8391_v33 = vor.u32 %v10274_v6, %v8390_v23 }
 0x13f   : > { %2965 = vmatpush.bf16.msra.mxu2 %v7551_v8  ;;  %v7950_v8 = vld [vmem:[%s10754_s12 + $0x5d8] sm:$0xf] }
 0x140   : > { %2978 = vmatpush.bf16.msra.mxu3 %v7711_v43  ;;  %v7951_v15 = vor.u32 %v10164_v0, %v7950_v8  ;;  %v8230_v43 = vld [vmem:[%s10754_s12 + $0x808] sm:$0xf]  ;;  %v10184_v8 = vld [vmem:[%s10754_s12 + $0x688] sm:$0xf0]  ;;  %v8330_v0 = vld [vmem:[%s10754_s12 + $0x8d0] sm:$0xf] }
 0x141   : > { %2940 = vmatpush.bf16.msra.mxu0 %v7211_v24  ;;  %v11476_v30 = vpop.f32.mrf.mxu0  ;;  %v10149_v24 = vld [vmem:[%s10754_s12 + $0x570] sm:$0xf0] }
 0x142   : > { %2953 = vmatpush.bf16.msra.mxu1 %v7371_v54  ;;  %v8050_v54 = vld [vmem:[%s10754_s12 + $0x6a0] sm:$0xf] }
 0x143   : > { %2966 = vmatpush.bf16.msra.mxu2 %v7531_v22  ;;  %v10199_v22 = vld [vmem:[%s10754_s12 + $0x700] sm:$0xf0]  ;;  %v8051_v2 = vor.u32 %v10189_v55, %v8050_v54 }
 0x144   : > { %2979 = vmatpush.bf16.msra.mxu3 %v7691_v35  ;;  %2941 = vmatmul.bf16.vlgmr.msra.gmra.mxu0 %v10872_v21  ;;  %v10159_v21 = vld [vmem:[%s10754_s12 + $0x5c0] sm:$0xf0]  ;;  %v11481_v35 = vpop.f32.mrf.mxu1 }
 0x145   : > { %2985 = vmatpush.bf16.msrb.mxu0 %v7991_v53  ;;  %2954 = vmatmul.bf16.vlgmr.msra.gmra.mxu1 %v10887_v37  ;;  %v8231_v37 = vor.u32 %v10234_v16, %v8230_v43  ;;  %v7931_v25 = vor.u32 %v10159_v21, %v7930_v18  ;;  %v7850_v43 = vld [vmem:[%s10754_s12 + $0x510] sm:$0xf]  ;;  %v10139_v16 = vld [vmem:[%s10754_s12 + $0x520] sm:$0xf0] }
 0x146   : > { %2967 = vmatmul.bf16.vlgmr.msra.gmra.mxu2 %v10870_v20  ;;  %2998 = vmatpush.bf16.msrb.mxu1 %v8151_v58  ;;  %v8131_v20 = vor.u32 %v10209_v63, %v8130_v62  ;;  %v10264_v58 = vld [vmem:[%s10754_s12 + $0x908] sm:$0xf0]  ;;  %v8170_v62 = vld [vmem:[%s10754_s12 + $0x790] sm:$0xf]  ;;  %v10219_v63 = vld [vmem:[%s10754_s12 + $0x7a0] sm:$0xf0] }
 0x147   : > { %3011 = vmatpush.bf16.msrb.mxu2 %v8311_v26  ;;  %2980 = vmatmul.bf16.vlgmr.msra.gmra.mxu3 %v10877_v27  ;;  %v8090_v27 = vld [vmem:[%s10754_s12 + $0x6f0] sm:$0xf]  ;;  %v8210_v26 = vld [vmem:[%s10754_s12 + $0x7e0] sm:$0xf]  ;;  %v8351_v4 = vor.u32 %v10264_v58, %v8350_v56  ;;  %v8171_v11 = vor.u32 %v10219_v63, %v8170_v62  ;;  %v10179_v21 = vld [vmem:[%s10754_s12 + $0x660] sm:$0xf0] }
 0x148   : > { %3024 = vmatpush.bf16.msrb.mxu3 %v8471_v39  ;;  %v8091_v31 = vor.u32 %v10199_v22, %v8090_v27  ;;  %v10269_v39 = vld [vmem:[%s10754_s12 + $0x930] sm:$0xf0]  ;;  %v8211_v40 = vor.u32 %v10229_v28, %v8210_v26  ;;  %v8010_v18 = vld [vmem:[%s10754_s12 + $0x650] sm:$0xf]  ;;  %v7851_v22 = vor.u32 %v10139_v16, %v7850_v43 }
 0x149   : > { %2986 = vmatpush.bf16.msrb.mxu0 %v7971_v3  ;;  %v2760_v41 = vpop.f32.mrf.mxu2  ;;  %v8371_v53 = vor.u32 %v10269_v39, %v8370_v38  ;;  %v2736_v1 = vpop.f32.mrf.mxu0  ;;  %v10144_v3 = vld [vmem:[%s10754_s12 + $0x548] sm:$0xf0]  ;;  %v8011_v23 = vor.u32 %v10179_v21, %v8010_v18 }
 0x14a   : > { %2999 = vmatpush.bf16.msrb.mxu1 %v8131_v20  ;;  %v2773_v60 = vpop.f32.mrf.mxu3 }
 0x14b   : > { %3012 = vmatpush.bf16.msrb.mxu2 %v8291_v51  ;;  %v7890_v51 = vld [vmem:[%s10754_s12 + $0x560] sm:$0xf] }
 0x14c   : > { %3025 = vmatpush.bf16.msrb.mxu3 %v8451_v61  ;;  %v7891_v61 = vor.u32 %v10149_v24, %v7890_v51  ;;  %v2749_v20 = vpop.f32.mrf.mxu1 }
 0x14d   : > { %2987 = vmatpush.bf16.msrb.mxu0 %v7951_v15  ;;  %v8031_v15 = vor.u32 %v10184_v8, %v8030_v7 }
 0x14e   : > { %3000 = vmatpush.bf16.msrb.mxu1 %v8111_v17 }
 0x14f   : > { %3013 = vmatpush.bf16.msrb.mxu2 %v8271_v29  ;;  %v7870_v29 = vld [vmem:[%s10754_s12 + $0x538] sm:$0xf] }
 0x150   : > { %3026 = vmatpush.bf16.msrb.mxu3 %v8431_v9  ;;  %v10259_v9 = vld [vmem:[%s10754_s12 + $0x8e0] sm:$0xf0] }
 0x151   : > { %2988 = vmatpush.bf16.msrb.mxu0 %v7931_v25  ;;  %v2762_v13 = vpop.f32.mrf.mxu2  ;;  %v8331_v17 = vor.u32 %v10259_v9, %v8330_v0 }
 0x152   : > { %3001 = vmatpush.bf16.msrb.mxu1 %v8091_v31  ;;  %v2775_v27 = vpop.f32.mrf.mxu3 }
 0x153   : > { %3014 = vmatpush.bf16.msrb.mxu2 %v8251_v14  ;;  %v7871_v14 = vor.u32 %v10144_v3, %v7870_v29 }
 0x154   : > { %3027 = vmatpush.bf16.msrb.mxu3 %v8411_v19  ;;  %v2735_v19 = vadd.f32 %v11476_v30, %v845_v57  ;;  %v847_v57 = vperm.slane %v11503_v10, 4 }
 0x155   : > { %2989 = vmatpush.bf16.msrb.mxu0 %v7911_v42 }
 0x156   : > { %3002 = vmatpush.bf16.msrb.mxu1 %v8071_v47  ;;  %v2748_v6 = vadd.f32 %v11481_v35, %v2735_v19 }
 0x157   : > { %3015 = vmatpush.bf16.msrb.mxu2 %v8231_v37 }
 0x158   : > { %3028 = vmatpush.bf16.msrb.mxu3 %v8391_v33  ;;  %v2761_v37 = vadd.f32 %v2760_v41, %v2748_v6  ;;  %v846_v41 = vperm.slane %v11503_v10, 3 }
 0x159   : > { %2990 = vmatpush.bf16.msrb.mxu0 %v7891_v61 }
 0x15a   : > { %3003 = vmatpush.bf16.msrb.mxu1 %v8051_v2  ;;  %v2774_v25 = vadd.f32 %v2773_v60, %v2761_v37 }
 0x15b   : > { %3016 = vmatpush.bf16.msrb.mxu2 %v8211_v40 }
 0x15c   : > { %3029 = vmatpush.bf16.msrb.mxu3 %v8371_v53 }
 0x15d   : > { %2991 = vmatpush.bf16.msrb.mxu0 %v7871_v14 }
 0x15e   : > { %3004 = vmatpush.bf16.msrb.mxu1 %v8031_v15 }
 0x15f   : > { %3017 = vmatpush.bf16.msrb.mxu2 %v8191_v59 }
 0x160   : > { %3030 = vmatpush.bf16.msrb.mxu3 %v8351_v4 }
 0x161   : > { %2992 = vmatpush.bf16.msrb.mxu0 %v7851_v22  ;;  %v2786_v26 = vpop.f32.mrf.mxu0 }
 0x162   : > { %3005 = vmatpush.bf16.msrb.mxu1 %v8011_v23  ;;  %v2787_v28 = vadd.f32 %v2786_v26, %v2774_v25  ;;  %v2799_v30 = vpop.f32.mrf.mxu1 }
 0x163   : > { %3018 = vmatpush.bf16.msrb.mxu2 %v8171_v11  ;;  %v3101_v38 = vpop.permute.xlu0 %3100 }
 0x164   : > { %3031 = vmatpush.bf16.msrb.mxu3 %v8331_v17  ;;  %2993 = vmatmul.bf16.vlgmr.msrb.gmra.mxu0 %v10937_v49  ;;  %v2800_v31 = vadd.f32 %v2799_v30, %v2787_v28 }
 0x165   : > { %3006 = vmatmul.bf16.vlgmr.msrb.gmra.mxu1 %v10941_v52 }
 0x166   : > { %3019 = vmatmul.bf16.vlgmr.msrb.gmra.mxu2 %v10933_v46 }
 0x167   : > { %3032 = vmatmul.bf16.vlgmr.msrb.gmra.mxu3 %v10939_v50 }
 0x169   : > { %v2812_v32 = vpop.f32.mrf.mxu2  ;;  %v2788_v34 = vpop.f32.mrf.mxu0 }
 0x16a   : > { %v2825_v48 = vpop.f32.mrf.mxu3  ;;  %v2813_v33 = vadd.f32 %v2812_v32, %v2800_v31  ;;  %v2801_v50 = vpop.f32.mrf.mxu1 }
 0x16c   : > { %v2826_v46 = vadd.f32 %v2825_v48, %v2813_v33 }
 0x16e   : > { %v11516_v35 = vpack.c.bf16 %v2826_v46, %v2826_v46 }
 0x170   : > { %v3106_v36 = vsel %vm3043_vm0, %v11516_v35, 0 }
 0x171   : > { %v2814_v49 = vpop.f32.mrf.mxu2  ;;  %3115 = vmatpush.bf16.xpose.msra.mxu2 %v3106_v36 }
 0x172   : > { %v2827_v52 = vpop.f32.mrf.mxu3 }
 0x178   : > { %8474 = vmatmul.msk.bf16.vlgmr.msra.gmra.mxu2 %vm3043_vm0, %v3101_v38 }
 0x181   : > { %v2838_v39 = vpop.f32.mrf.mxu0 }
 0x182   : > { %v2851_v40 = vpop.f32.mrf.mxu1  ;;  %v2839_v51 = vadd.f32 %v2838_v39, %v846_v41 }
 0x184   : > { %v2852_v24 = vadd.f32 %v2851_v40, %v2839_v51 }
 0x189   : > { %v2864_v42 = vpop.f32.mrf.mxu2  ;;  %v2840_v45 = vpop.f32.mrf.mxu0 }
 0x18a   : > { %v2877_v44 = vpop.f32.mrf.mxu3  ;;  %v2853_v47 = vpop.f32.mrf.mxu1  ;;  %v2865_v55 = vadd.f32 %v2864_v42, %v2852_v24 }
 0x18c   : > { %v2878_v56 = vadd.f32 %v2877_v44, %v2865_v55 }
 0x191   : > { %v2866_v53 = vpop.f32.mrf.mxu2 }
 0x192   : > { %v2879_v54 = vpop.f32.mrf.mxu3  ;;  %v13337_v53 = vrot.slane %v11265_v5, 1 }
 0x1a1   : > { %v2890_v58 = vpop.f32.mrf.mxu0 }
 0x1a2   : > { %v2891_v59 = vadd.f32 %v2890_v58, %v2878_v56  ;;  %v2903_v61 = vpop.f32.mrf.mxu1 }
 0x1a4   : > { %v2904_v62 = vadd.f32 %v2903_v61, %v2891_v59  ;;  %v8574_v61 = vld [vmem:[%s10764_s19 + $0x1c0] sm:$0xf] }
 0x1a5   : > { %v3042_v2 = vpop.permute.xlu0 %3041 }
 0x1a6   : > { %v3048_v29 = vsel %vm3043_vm0, %v3042_v2, 0  ;;  %v8576_v2 = vld [vmem:[%s10764_s19 + $0x1e0] sm:$0xf0] }
 0x1a7   : > { %3057 = vmatpush.bf16.xpose.msra.mxu0 %v3048_v29  ;;  %v8582_v29 = vld [vmem:[%s10764_s19 + $0x1c8] sm:$0xf] }
 0x1a9   : > { %v2916_v60 = vpop.f32.mrf.mxu2  ;;  %v2892_v4 = vpop.f32.mrf.mxu0 }
 0x1aa   : > { %v2929_v63 = vpop.f32.mrf.mxu3  ;;  %v2917_v1 = vadd.f32 %v2916_v60, %v2904_v62  ;;  %v2905_v8 = vpop.f32.mrf.mxu1  ;;  %v10355_v62 = vld [vmem:[%s10764_s19 + $0x1dc] sm:$0xf0] }
 0x1ab   : > { %v10352_v8 = vld [vmem:[%s10764_s19 + $0x1cc] sm:$0xf] }
 0x1ac   : > { %v2930_v3 = vadd.f32 %v2929_v63, %v2917_v1  ;;  %v10351_v63 = vld [vmem:[%s10764_s19 + $0x1c4] sm:$0xf]  ;;  %v11552_v1 = vor.u32 %v10355_v62, %v8574_v61  ;;  %v10358_v61 = vld [vmem:[%s10764_s19 + $0x1f4] sm:$0xf0] }
 0x1ad   : > { %v11557_v4 = vor.u32 %v10351_v63, %v8576_v2  ;;  %v10354_v2 = vld [vmem:[%s10764_s19 + $0x1dc] sm:$0xf] }
 0x1ae   : > { %v11523_v7 = vpack.c.bf16 %v2930_v3, %v2930_v3  ;;  %8472 = vmatmul.msk.bf16.vlgmr.msra.gmra.mxu0 %vm3043_vm0, %v11265_v5  ;;  %v10356_v3 = vld [vmem:[%s10764_s19 + $0x1e4] sm:$0xf0] }
 0x1af   : > { %3323 = vmatpush.bf16.msrb.mxu0 %v11552_v1 }
 0x1b0   : > { %v3082_v0 = vsel %vm3080_vm1, %v11523_v7, 0 }
 0x1b1   : > { %v2918_v20 = vpop.f32.mrf.mxu2  ;;  %3091 = vmatpush.bf16.msra.mxu1 %v3082_v0  ;;  %v8584_v0 = vld [vmem:[%s10764_s19 + $0x1e8] sm:$0xf0] }
 0x1b2   : > { %v2931_v9 = vpop.f32.mrf.mxu3  ;;  %v11559_v20 = vor.u32 %v10356_v3, %v8582_v29  ;;  %v8600_v29 = vld [vmem:[%s10764_s19 + $0x1f8] sm:$0xf0] }
 0x1b3   : > { %v8542_v9 = vld [vmem:[%s10764_s19 + $0x180] sm:$0xf]  ;;  %v11646_v3 = vor.u32 %v10354_v2, %v8600_v29 }
 0x1b4   : > { %3349 = vmatpush.bf16.msrb.mxu2 %v11559_v20  ;;  %v8710_v2 = vld [vmem:[%s10764_s19 + $0xc0] sm:$0xf] }
 0x1b5   : > { %3336 = vmatpush.bf16.msrb.mxu1 %v11557_v4  ;;  %v10323_v29 = vld [vmem:[%s10764_s19 + $0xdc] sm:$0xf0] }
 0x1c1   : > { %v2942_v11 = vpop.f32.mrf.mxu0 }
 0x1c2   : > { %v2943_v13 = vadd.f32 %v2942_v11, %v847_v57  ;;  %v2955_v15 = vpop.f32.mrf.mxu1  ;;  %v11565_v57 = vor.u32 %v10352_v8, %v8584_v0  ;;  %v10347_v11 = vld [vmem:[%s10764_s19 + $0x19c] sm:$0xf0]  ;;  %v8558_v8 = vld [vmem:[%s10764_s19 + $0x190] sm:$0xf] }
 0x1c3   : > { %v10349_v0 = vld [vmem:[%s10764_s19 + $0x1ac] sm:$0xf0] }
 0x1c4   : > { %v2956_v43 = vadd.f32 %v2955_v15, %v2943_v13  ;;  %13476 = vst [vmem:[#allocation7_spill] sm:$0xff] %v11565_v57  ;;  %v10343_v13 = vld [vmem:[%s10764_s19 + $0x184] sm:$0xf]  ;;  %v11572_v15 = vor.u32 %v10347_v11, %v8542_v9  ;;  %v10345_v9 = vld [vmem:[%s10764_s19 + $0x194] sm:$0xf]  ;;  %v11654_v11 = vor.u32 %v10349_v0, %v8558_v8 }
 0x1c5   : > { %v10319_v8 = vld [vmem:[%s10764_s19 + $0xc4] sm:$0xf] }
 0x1c6   : > { %3324 = vmatpush.bf16.msrb.mxu0 %v11572_v15  ;;  %v8712_v0 = vld [vmem:[%s10764_s19 + $0xe0] sm:$0xf0] }
 0x1c9   : > { %v2968_v14 = vpop.f32.mrf.mxu2  ;;  %v2944_v21 = vpop.f32.mrf.mxu0 }
 0x1ca   : > { %v2969_v16 = vadd.f32 %v2968_v14, %v2956_v43  ;;  %v2981_v17 = vpop.f32.mrf.mxu3  ;;  %v2957_v27 = vpop.f32.mrf.mxu1  ;;  %v8544_v14 = vld [vmem:[%s10764_s19 + $0x1a0] sm:$0xf0] }
 0x1cb   : > { %v11574_v43 = vor.u32 %v10343_v13, %v8544_v14  ;;  %v8510_v27 = vld [vmem:[%s10764_s19 + $0x140] sm:$0xf]  ;;  %v8560_v13 = vld [vmem:[%s10764_s19 + $0x1b0] sm:$0xf0]  ;;  %v8566_v14 = vld [vmem:[%s10764_s19 + $0x198] sm:$0xf] }
 0x1cc   : > { %v2982_v18 = vadd.f32 %v2981_v17, %v2969_v16  ;;  %v8550_v16 = vld [vmem:[%s10764_s19 + $0x188] sm:$0xf] }
 0x1cd   : > { %v10348_v17 = vld [vmem:[%s10764_s19 + $0x1a4] sm:$0xf0]  ;;  %3337 = vmatpush.bf16.msrb.mxu1 %v11574_v43 }
 0x1ce   : > { %v11580_v21 = vor.u32 %v10348_v17, %v8550_v16  ;;  %v10350_v16 = vld [vmem:[%s10764_s19 + $0x1b4] sm:$0xf0]  ;;  %v11659_v17 = vor.u32 %v10345_v9, %v8560_v13  ;;  %v8718_v9 = vld [vmem:[%s10764_s19 + $0xc8] sm:$0xf] }
 0x1cf   : > { %v10324_v13 = vld [vmem:[%s10764_s19 + $0xe4] sm:$0xf0] }
 0x1d0   : > { %3350 = vmatpush.bf16.msrb.mxu2 %v11580_v21 }
 0x1d1   : > { %v2970_v19 = vpop.f32.mrf.mxu2 }
 0x1d2   : > { %v2983_v22 = vpop.f32.mrf.mxu3  ;;  %v8552_v19 = vld [vmem:[%s10764_s19 + $0x1a8] sm:$0xf0] }
 0x1d3   : > { %v10339_v22 = vld [vmem:[%s10764_s19 + $0x15c] sm:$0xf0] }
 0x1e1   : > { %v2994_v23 = vpop.f32.mrf.mxu0 }
 0x1e2   : > { %v2995_v6 = vadd.f32 %v2994_v23, %v2982_v18  ;;  %v3007_v25 = vpop.f32.mrf.mxu1  ;;  %v10344_v18 = vld [vmem:[%s10764_s19 + $0x18c] sm:$0xf] }
 0x1e3   : > { %v11585_v23 = vor.u32 %v10344_v18, %v8552_v19  ;;  %v11661_v18 = vor.u32 %v10350_v16, %v8566_v14  ;;  %v10346_v19 = vld [vmem:[%s10764_s19 + $0x19c] sm:$0xf]  ;;  %v10320_v14 = vld [vmem:[%s10764_s19 + $0xcc] sm:$0xf] }
 0x1e4   : > { %v3008_v26 = vadd.f32 %v3007_v25, %v2995_v6  ;;  %v10335_v6 = vld [vmem:[%s10764_s19 + $0x144] sm:$0xf]  ;;  %v8518_v25 = vld [vmem:[%s10764_s19 + $0x148] sm:$0xf]  ;;  %v8720_v16 = vld [vmem:[%s10764_s19 + $0xe8] sm:$0xf0] }
 0x1e5   : > { %13477 = vst [vmem:[#allocation8_spill] sm:$0xff] %v11585_v23 }
 0x1e9   : > { %v3020_v37 = vpop.f32.mrf.mxu2  ;;  %v2996_v31 = vpop.f32.mrf.mxu0 }
 0x1ea   : > { %v3033_v28 = vpop.f32.mrf.mxu3  ;;  %v3021_v30 = vadd.f32 %v3020_v37, %v3008_v26  ;;  %v3009_v48 = vpop.f32.mrf.mxu1  ;;  %v8512_v37 = vld [vmem:[%s10764_s19 + $0x160] sm:$0xf0]  ;;  %v11591_v26 = vor.u32 %v10339_v22, %v8510_v27  ;;  %v8520_v31 = vld [vmem:[%s10764_s19 + $0x168] sm:$0xf0]  ;;  %v8568_v27 = vld [vmem:[%s10764_s19 + $0x1b8] sm:$0xf0] }
 0x1eb   : > { %v8526_v22 = vld [vmem:[%s10764_s19 + $0x150] sm:$0xf] }
 0x1ec   : > { %v11530_v10 = vadd.f32 %v3033_v28, %v3021_v30  ;;  %v10340_v28 = vld [vmem:[%s10764_s19 + $0x164] sm:$0xf0]  ;;  %v10336_v30 = vld [vmem:[%s10764_s19 + $0x14c] sm:$0xf]  ;;  %3325 = vmatpush.bf16.msrb.mxu0 %v11591_v26 }
 0x1ed   : > { %v11600_v48 = vor.u32 %v10340_v28, %v8518_v25  ;;  %v10337_v25 = vld [vmem:[%s10764_s19 + $0x154] sm:$0xf] }
 0x1ee   : > { %v8528_v28 = vld [vmem:[%s10764_s19 + $0x170] sm:$0xf0] }
 0x1ef   : > { %3351 = vmatpush.bf16.msrb.mxu2 %v11600_v48 }
 0x1f1   : > { %v3022_v32 = vpop.f32.mrf.mxu2 }
 0x1f2   : > { %v3035_v33 = vpop.f32.mrf.mxu3  ;;  %v11598_v32 = vor.u32 %v10335_v6, %v8512_v37  ;;  %v11667_v6 = vor.u32 %v10346_v19, %v8568_v27  ;;  %v10341_v37 = vld [vmem:[%s10764_s19 + $0x16c] sm:$0xf0] }
 0x1f3   : > { %v11603_v33 = vor.u32 %v10336_v30, %v8520_v31  ;;  %v11674_v30 = vor.u32 %v10341_v37, %v8526_v22  ;;  %v11676_v31 = vor.u32 %v10337_v25, %v8528_v28  ;;  %v11721_v22 = vor.u32 %v10323_v29, %v8710_v2  ;;  %v8678_v25 = vld [vmem:[%s10764_s19 + $0x80] sm:$0xf]  ;;  %v10303_v2 = vld [vmem:[%s10764_s19 + $0x44] sm:$0xf] }
 0x1f4   : > { %3338 = vmatpush.bf16.msrb.mxu1 %v11598_v32  ;;  %v11723_v37 = vor.u32 %v10319_v8, %v8712_v0  ;;  %v10315_v28 = vld [vmem:[%s10764_s19 + $0x9c] sm:$0xf0]  ;;  %v8648_v29 = vld [vmem:[%s10764_s19 + $0x60] sm:$0xf0] }
 0x1f5   : > { %13478 = vst [vmem:[#allocation9_spill] sm:$0xff] %v11603_v33 }
 0x1f6   : > { %13480 = vst [vmem:[#allocation11_spill] sm:$0xff] %v11676_v31 }
 0x1f7   : > { %13483 = vst [vmem:[#allocation14_spill] sm:$0xff] %v11721_v22 }
 0x1f8   : > { %13484 = vst [vmem:[#allocation15_spill] sm:$0xff] %v11723_v37 }
 0x1fb   : > { %v3117_v46 = vpop.f32.mrf.mxu2 }
 0x1fc   : > { %v3121_v34 = vsel %vm3063_vm2, %v3117_v46, -inf }
 0x1fd   : > { %3122 = vmax.xlane.f32.xlu1 %v3121_v34 }
 0x203   : > { %v3119_v50 = vpop.f32.mrf.mxu2 }
 0x22b   : > { %v3059_v36 = vpop.f32.mrf.mxu0 }
 0x22c   : > { %v3064_v49 = vsel %vm3063_vm2, %v3059_v36, -inf }
 0x22d   : > { %3065 = vmax.xlane.f32.xlu1 %v3064_v49  ;;  %v8478_v49 = vld [vmem:[%s10764_s19 + $0x100] sm:$0xf] }
 0x233   : > { %v3061_v52 = vpop.f32.mrf.mxu0 }
 0x234   : > { %v10331_v52 = vld [vmem:[%s10764_s19 + $0x11c] sm:$0xf0] }
 0x246   : > { %3692 = vrot.lane.b32.xlu1 %v11516_v35, %s10692_s30 }
 0x270   : > { %v3123_v38 = vpop.xlane.xlu1 %3122 }
 0x271   : > { %v3124_v39 = vsub.f32 %v3117_v46, %v3123_v38  ;;  %v10327_v38 = vld [vmem:[%s10764_s19 + $0x104] sm:$0xf] }
 0x273   : > { %v3125_v40 = vmul.f32 1.442695, %v3124_v39  ;;  %v11614_v39 = vor.u32 %v10331_v52, %v8478_v49  ;;  %v8536_v49 = vld [vmem:[%s10764_s19 + $0x178] sm:$0xf0]  ;;  %v8494_v52 = vld [vmem:[%s10764_s19 + $0x110] sm:$0xf] }
 0x275   : > { %10602 = vpow2.f32 %v3125_v40  ;;  %v8480_v40 = vld [vmem:[%s10764_s19 + $0x120] sm:$0xf0]  ;;  %3326 = vmatpush.bf16.msrb.mxu0 %v11614_v39 }
 0x27b   : > { %v10603_v41 = vpop.eup %10602 }
 0x27c   : > { %v3127_v42 = vsel %vm3063_vm2, %v10603_v41, 0.0 }
 0x27d   : > { %3128 = vadd.xlane.f32.xlu2 %v3127_v42  ;;  %v10332_v42 = vld [vmem:[%s10764_s19 + $0x124] sm:$0xf0] }
 0x295   : > { %3134 = vrot.lane.b32.xlu2 %v11523_v7, %s10692_s30 }
 0x2a0   : > { %v3066_v44 = vpop.xlane.xlu1 %3065 }
 0x2a1   : > { %v3067_v45 = vsub.f32 %v3059_v36, %v3066_v44  ;;  %v11619_v44 = vor.u32 %v10327_v38, %v8480_v40  ;;  %v10333_v38 = vld [vmem:[%s10764_s19 + $0x12c] sm:$0xf0] }
 0x2a3   : > { %v3068_v47 = vmul.f32 1.442695, %v3067_v45  ;;  %3339 = vmatpush.bf16.msrb.mxu1 %v11619_v44 }
 0x2a5   : > { %10604 = vpow2.f32 %v3068_v47  ;;  %v10328_v47 = vld [vmem:[%s10764_s19 + $0x10c] sm:$0xf] }
 0x2ab   : > { %v11539_v51 = vpop.eup %10604 }
 0x2ac   : > { %v3070_v24 = vsel %vm3063_vm2, %v11539_v51, 0.0 }
 0x2ad   : > { %3071 = vadd.xlane.f32.xlu0 %v3070_v24 }
 0x2c1   : > { %4109 = vrot.lane.b32.xlu0 %v13337_v53, %s10692_s30 }
 0x2f0   : > { %v3129_v54 = vpop.xlane.xlu2 %3128 }
 0x2f1   : > { %10606 = vrcp.f32 %v3129_v54  ;;  %v8590_v54 = vld [vmem:[%s10764_s19 + $0x1d0] sm:$0xf] }
 0x2f7   : > { %v10607_v55 = vpop.eup %10606 }
 0x2f8   : > { %v3131_v56 = vmul.f32 %v10607_v55, %v10603_v41  ;;  %v3135_v58 = vpop.permute.xlu2 %3134  ;;  %v8486_v41 = vld [vmem:[%s10764_s19 + $0x108] sm:$0xf]  ;;  %v10357_v55 = vld [vmem:[%s10764_s19 + $0x1ec] sm:$0xf0] }
 0x2f9   : > { %v3140_v59 = vsel %vm3080_vm1, %v3135_v58, 0  ;;  %v11621_v45 = vor.u32 %v10332_v42, %v8486_v41  ;;  %v11634_v58 = vor.u32 %v10357_v55, %v8590_v54  ;;  %v10329_v41 = vld [vmem:[%s10764_s19 + $0x114] sm:$0xf]  ;;  %v10334_v54 = vld [vmem:[%s10764_s19 + $0x134] sm:$0xf0] }
 0x2fa   : > { %v3132_v60 = vpack.c.bf16 %v3131_v56, %v3131_v56  ;;  %3149 = vmatpush.bf16.msra.mxu3 %v3140_v59  ;;  %v10353_v56 = vld [vmem:[%s10764_s19 + $0x1d4] sm:$0xf]  ;;  %v10330_v55 = vld [vmem:[%s10764_s19 + $0x11c] sm:$0xf] }
 0x2fb   : > { %3352 = vmatpush.bf16.msrb.mxu2 %v11621_v45  ;;  %v8592_v59 = vld [vmem:[%s10764_s19 + $0x1f0] sm:$0xf0]  ;;  %3375 = vmatpush.bf16.msra.mxu0 %v11634_v58 }
 0x2fc   : > { %v11639_v62 = vor.u32 %v10353_v56, %v8592_v59  ;;  %v8496_v42 = vld [vmem:[%s10764_s19 + $0x130] sm:$0xf0]  ;;  %v8504_v56 = vld [vmem:[%s10764_s19 + $0x138] sm:$0xf0] }
 0x2fd   : > { %8475 = vmatmul.msk.bf16.vlgmr.msra.gmra.mxu3 %vm3076_vm3, %v3132_v60  ;;  %v8598_v60 = vld [vmem:[%s10764_s19 + $0x1d8] sm:$0xf]  ;;  %v11700_v59 = vor.u32 %v10329_v41, %v8496_v42  ;;  %v10312_v41 = vld [vmem:[%s10764_s19 + $0x8c] sm:$0xf] }
 0x2fe   : > { %3362 = vmatpush.bf16.msrb.mxu3 %v11565_v57  ;;  %v11641_v63 = vor.u32 %v10358_v61, %v8598_v60  ;;  %v11705_v61 = vor.u32 %v10330_v55, %v8504_v56  ;;  %v8688_v42 = vld [vmem:[%s10764_s19 + $0xa8] sm:$0xf0]  ;;  %v8646_v55 = vld [vmem:[%s10764_s19 + $0x40] sm:$0xf] }
 0x2ff   : > { %3376 = vmatpush.bf16.msra.mxu0 %v11654_v11  ;;  %13481 = vst [vmem:[#allocation12_spill] sm:$0xff] %v11700_v59  ;;  %v10307_v56 = vld [vmem:[%s10764_s19 + $0x5c] sm:$0xf0]  ;;  %v11759_v0 = vor.u32 %v10312_v41, %v8688_v42 }
 0x300   : > { %3401 = vmatpush.bf16.msra.mxu2 %v11641_v63  ;;  %13482 = vst [vmem:[#allocation13_spill] sm:$0xff] %v11705_v61 }
 0x301   : > { %13490 = vst [vmem:[#allocation21_spill] sm:$0xff] %v11759_v0 }
 0x302   : > { %3363 = vmatpush.bf16.msrb.mxu3 %v11585_v23 }
 0x303   : > { %3377 = vmatpush.bf16.msra.mxu0 %v11674_v30 }
 0x304   : > { %3402 = vmatpush.bf16.msra.mxu2 %v11661_v18 }
 0x306   : > { %3364 = vmatpush.bf16.msrb.mxu3 %v11603_v33 }
 0x320   : > { %v3072_v46 = vpop.xlane.xlu0 %3071 }
 0x321   : > { %10608 = vrcp.f32 %v3072_v46  ;;  %v8534_v46 = vld [vmem:[%s10764_s19 + $0x158] sm:$0xf] }
 0x327   : > { %v10609_v34 = vpop.eup %10608 }
 0x328   : > { %v3074_v50 = vmul.f32 %v10609_v34, %v11539_v51  ;;  %v8488_v51 = vld [vmem:[%s10764_s19 + $0x128] sm:$0xf0]  ;;  %v10342_v34 = vld [vmem:[%s10764_s19 + $0x174] sm:$0xf0] }
 0x329   : > { %v11626_v24 = vor.u32 %v10328_v47, %v8488_v51  ;;  %v8502_v47 = vld [vmem:[%s10764_s19 + $0x118] sm:$0xf]  ;;  %v11693_v51 = vor.u32 %v10333_v38, %v8494_v52  ;;  %v8686_v52 = vld [vmem:[%s10764_s19 + $0x88] sm:$0xf] }
 0x32a   : > { %v3075_v36 = vpack.c.bf16 %v3074_v50, %v3074_v50  ;;  %v10338_v50 = vld [vmem:[%s10764_s19 + $0x15c] sm:$0xf]  ;;  %v11702_v60 = vor.u32 %v10334_v54, %v8502_v47  ;;  %v10316_v38 = vld [vmem:[%s10764_s19 + $0xa4] sm:$0xf0]  ;;  %v11747_v47 = vor.u32 %v10315_v28, %v8678_v25  ;;  %v11767_v25 = vor.u32 %v10307_v56, %v8646_v55 }
 0x32b   : > { %13479 = vst [vmem:[#allocation10_spill] sm:$0xff] %v11626_v24  ;;  %3365 = vmatpush.bf16.msrb.mxu3 %v11626_v24  ;;  %v11687_v40 = vor.u32 %v10338_v50, %v8536_v49  ;;  %3378 = vmatpush.bf16.msra.mxu0 %v11693_v51  ;;  %v11729_v50 = vor.u32 %v10324_v13, %v8718_v9  ;;  %v8654_v9 = vld [vmem:[%s10764_s19 + $0x48] sm:$0xf] }
 0x32c   : > { %8473 = vmatmul.msk.bf16.vlgmr.msra.gmra.mxu1 %vm3076_vm3, %v3075_v36  ;;  %v11682_v36 = vor.u32 %v10342_v34, %v8534_v46  ;;  %v10311_v46 = vld [vmem:[%s10764_s19 + $0x84] sm:$0xf]  ;;  %v11731_v49 = vor.u32 %v10320_v14, %v8720_v16  ;;  %13487 = vst [vmem:[#allocation18_spill] sm:$0xff] %v11747_v47  ;;  %v11757_v8 = vor.u32 %v10316_v38, %v8686_v52  ;;  %v10308_v13 = vld [vmem:[%s10764_s19 + $0x64] sm:$0xf0] }
 0x32d   : > { %3388 = vmatpush.bf16.msra.mxu1 %v11639_v62  ;;  %v8680_v34 = vld [vmem:[%s10764_s19 + $0xa0] sm:$0xf0]  ;;  %13485 = vst [vmem:[#allocation16_spill] sm:$0xff] %v11729_v50  ;;  %v10304_v14 = vld [vmem:[%s10764_s19 + $0x4c] sm:$0xf]  ;;  %v11769_v28 = vor.u32 %v10303_v2, %v8648_v29  ;;  %v11777_v41 = vor.u32 %v10308_v13, %v8654_v9 }
 0x32e   : > { %3403 = vmatpush.bf16.msra.mxu2 %v11682_v36  ;;  %13486 = vst [vmem:[#allocation17_spill] sm:$0xff] %v11731_v49  ;;  %v11749_v54 = vor.u32 %v10311_v46, %v8680_v34  ;;  %v8656_v16 = vld [vmem:[%s10764_s19 + $0x68] sm:$0xf0]  ;;  %v8614_v46 = vld [vmem:[%s10764_s19] sm:$0xf] }
 0x32f   : > { %3414 = vmatpush.bf16.msra.mxu3 %v11646_v3  ;;  %13489 = vst [vmem:[#allocation20_spill] sm:$0xff] %v11757_v8  ;;  %v10299_v34 = vld [vmem:[%s10764_s19 + $0x1c] sm:$0xf0]  ;;  %v10295_v52 = vld [vmem:[%s10764_s19 + $0x4] sm:$0xf]  ;;  %v11779_v42 = vor.u32 %v10304_v14, %v8656_v16 }
 0x330   : > { %13488 = vst [vmem:[#allocation19_spill] sm:$0xff] %v11749_v54  ;;  %v8616_v38 = vld [vmem:[%s10764_s19 + $0x20] sm:$0xf0]  ;;  %v8622_v55 = vld [vmem:[%s10764_s19 + $0x8] sm:$0xf] }
 0x331   : > { %3389 = vmatpush.bf16.msra.mxu1 %v11659_v17  ;;  %13491 = vst [vmem:[#allocation22_spill] sm:$0xff] %v11767_v25  ;;  %v10300_v56 = vld [vmem:[%s10764_s19 + $0x24] sm:$0xf0]  ;;  %v10296_v2 = vld [vmem:[%s10764_s19 + $0xc] sm:$0xf]  ;;  %v11789_v53 = vor.u32 %v10295_v52, %v8616_v38 }
 0x332   : > { %3404 = vmatpush.bf16.msra.mxu2 %v11702_v60  ;;  %13492 = vst [vmem:[#allocation23_spill] sm:$0xff] %v11769_v28  ;;  %v8624_v29 = vld [vmem:[%s10764_s19 + $0x28] sm:$0xf0]  ;;  %v8726_v9 = vld [vmem:[%s10764_s19 + $0xd0] sm:$0xf] }
 0x333   : > { %3415 = vmatpush.bf16.msra.mxu3 %v11667_v6  ;;  %13493 = vst [vmem:[#allocation24_spill] sm:$0xff] %v11777_v41  ;;  %v10325_v13 = vld [vmem:[%s10764_s19 + $0xec] sm:$0xf0]  ;;  %v10321_v14 = vld [vmem:[%s10764_s19 + $0xd4] sm:$0xf] }
 0x334   : > { %13494 = vst [vmem:[#allocation25_spill] sm:$0xff] %v11779_v42  ;;  %v8728_v16 = vld [vmem:[%s10764_s19 + $0xf0] sm:$0xf0]  ;;  %v10322_v52 = vld [vmem:[%s10764_s19 + $0xdc] sm:$0xf] }
 0x335   : > { %3390 = vmatpush.bf16.msra.mxu1 %v11676_v31  ;;  %13496 = vst [vmem:[#allocation27_spill] sm:$0xff] %v11789_v53  ;;  %v8736_v38 = vld [vmem:[%s10764_s19 + $0xf8] sm:$0xf0] }
 0x337   : > { %3416 = vmatpush.bf16.msra.mxu3 %v11687_v40 }
 0x339   : > { %3391 = vmatpush.bf16.msra.mxu1 %v11700_v59  ;;  %v10390_v59 = vld [vmem:[%s10764_s19 + $0x2f4] sm:$0xf0] }
 0x33b   : > { %3417 = vmatpush.bf16.msra.mxu3 %v11705_v61 }
 0x380   : > { %v3151_v19 = vpop.f32.mrf.mxu3 }
 0x381   : > { %v11719_v27 = vpack.c.bf16 %v3151_v19, %v3151_v19 }
 0x383   : > { %8604 = vmatmul.msk.bf16.vlgmr.msrb.gmra.mxu0 %vm3043_vm0, %v11719_v27  ;;  %8605 = vmatmul.msk.bf16.vlgmr.msrb.gmra.mxu1 %vm3043_vm0, %v11719_v27 }
 0x384   : > { %8606 = vmatmul.msk.bf16.vlgmr.msrb.gmra.mxu2 %vm3043_vm0, %v11719_v27  ;;  %8607 = vmatmul.msk.bf16.vlgmr.msrb.gmra.mxu3 %vm3043_vm0, %v11719_v27 }
 0x385   : > { %3590 = vmatpush.bf16.msrb.mxu0 %v11721_v22  ;;  %3603 = vmatpush.bf16.msrb.mxu1 %v11723_v37  ;;  %v10364_v37 = vld [vmem:[%s10764_s19 + $0x224] sm:$0xf0]  ;;  %v8762_v22 = vld [vmem:[%s10764_s19 + $0x228] sm:$0xf0] }
 0x386   : > { %3616 = vmatpush.bf16.msrb.mxu2 %v11729_v50  ;;  %3629 = vmatpush.bf16.msrb.mxu3 %v11731_v49  ;;  %v8754_v50 = vld [vmem:[%s10764_s19 + $0x220] sm:$0xf0] }
 0x388   : > { %v3153_v19 = vpop.f32.mrf.mxu3 }
 0x389   : > { %3591 = vmatpush.bf16.msrb.mxu0 %v11747_v47  ;;  %3604 = vmatpush.bf16.msrb.mxu1 %v11749_v54  ;;  %v11787_v19 = vor.u32 %v10299_v34, %v8614_v46  ;;  %v8734_v46 = vld [vmem:[%s10764_s19 + $0xd8] sm:$0xf]  ;;  %v10298_v54 = vld [vmem:[%s10764_s19 + $0x1c] sm:$0xf] }
 0x38a   : > { %3617 = vmatpush.bf16.msrb.mxu2 %v11757_v8  ;;  %3630 = vmatpush.bf16.msrb.mxu3 %v11759_v0  ;;  %v11797_v0 = vor.u32 %v10300_v56, %v8622_v55  ;;  %v10326_v34 = vld [vmem:[%s10764_s19 + $0xf4] sm:$0xf0]  ;;  %v8694_v55 = vld [vmem:[%s10764_s19 + $0x90] sm:$0xf] }
 0x38b   : > { %13495 = vst [vmem:[#allocation26_spill] sm:$0xff] %v11787_v19  ;;  %v10317_v56 = vld [vmem:[%s10764_s19 + $0xac] sm:$0xf0]  ;;  %v8638_v8 = vld [vmem:[%s10764_s19 + $0x18] sm:$0xf] }
 0x38c   : > { %13497 = vst [vmem:[#allocation28_spill] sm:$0xff] %v11797_v0 }
 0x38d   : > { %3592 = vmatpush.bf16.msrb.mxu0 %v11767_v25  ;;  %3605 = vmatpush.bf16.msrb.mxu1 %v11769_v28  ;;  %v11799_v25 = vor.u32 %v10296_v2, %v8624_v29  ;;  %v11807_v28 = vor.u32 %v10325_v13, %v8726_v9  ;;  %v10313_v2 = vld [vmem:[%s10764_s19 + $0x94] sm:$0xf]  ;;  %v8702_v9 = vld [vmem:[%s10764_s19 + $0x98] sm:$0xf] }
 0x38e   : > { %3618 = vmatpush.bf16.msrb.mxu2 %v11777_v41  ;;  %3631 = vmatpush.bf16.msrb.mxu3 %v11779_v42  ;;  %v11809_v41 = vor.u32 %v10321_v14, %v8728_v16  ;;  %v8696_v29 = vld [vmem:[%s10764_s19 + $0xb0] sm:$0xf0]  ;;  %v11817_v42 = vor.u32 %v10326_v34, %v8734_v46  ;;  %v10318_v13 = vld [vmem:[%s10764_s19 + $0xb4] sm:$0xf0]  ;;  %v10314_v14 = vld [vmem:[%s10764_s19 + $0x9c] sm:$0xf]  ;;  %v11835_v46 = vor.u32 %v10317_v56, %v8694_v55 }
 0x38f   : > { %13498 = vst [vmem:[#allocation29_spill] sm:$0xff] %v11799_v25  ;;  %v8704_v16 = vld [vmem:[%s10764_s19 + $0xb8] sm:$0xf0]  ;;  %v11837_v34 = vor.u32 %v10313_v2, %v8696_v29  ;;  %v8670_v55 = vld [vmem:[%s10764_s19 + $0x58] sm:$0xf] }
 0x390   : > { %13499 = vst [vmem:[#allocation30_spill] sm:$0xff] %v11807_v28  ;;  %v10310_v56 = vld [vmem:[%s10764_s19 + $0x74] sm:$0xf0]  ;;  %v10306_v2 = vld [vmem:[%s10764_s19 + $0x5c] sm:$0xf] }
 0x391   : > { %3593 = vmatpush.bf16.msrb.mxu0 %v11787_v19  ;;  %3606 = vmatpush.bf16.msrb.mxu1 %v11789_v53  ;;  %13500 = vst [vmem:[#allocation31_spill] sm:$0xff] %v11809_v41  ;;  %v11819_v19 = vor.u32 %v10322_v52, %v8736_v38  ;;  %v8662_v52 = vld [vmem:[%s10764_s19 + $0x50] sm:$0xf]  ;;  %v8672_v29 = vld [vmem:[%s10764_s19 + $0x78] sm:$0xf0] }
 0x392   : > { %3619 = vmatpush.bf16.msrb.mxu2 %v11797_v0  ;;  %3632 = vmatpush.bf16.msrb.mxu3 %v11799_v25  ;;  %13501 = vst [vmem:[#allocation32_spill] sm:$0xff] %v11817_v42  ;;  %v10309_v38 = vld [vmem:[%s10764_s19 + $0x6c] sm:$0xf0]  ;;  %v10305_v25 = vld [vmem:[%s10764_s19 + $0x54] sm:$0xf]  ;;  %v11867_v53 = vor.u32 %v10306_v2, %v8672_v29  ;;  %v3693_v2 = vpop.permute.xlu1 %3692 }
 0x393   : > { %13502 = vst [vmem:[#allocation33_spill] sm:$0xff] %v11819_v19  ;;  %8608 = vmatmul.msk.bf16.vlgmr.msra.gmra.mxu0 %vm3043_vm0, %v11719_v27  ;;  %8609 = vmatmul.msk.bf16.vlgmr.msra.gmra.mxu1 %vm3043_vm0, %v11719_v27  ;;  %v8664_v0 = vld [vmem:[%s10764_s19 + $0x70] sm:$0xf0] }
 0x394   : > { %8610 = vmatmul.msk.bf16.vlgmr.msra.gmra.mxu2 %vm3043_vm0, %v11719_v27  ;;  %8611 = vmatmul.msk.bf16.vlgmr.msra.gmra.mxu3 %vm3043_vm0, %v11719_v27  ;;  %13503 = vst [vmem:[#allocation34_spill] sm:$0xff] %v11835_v46  ;;  %v11845_v27 = vor.u32 %v10318_v13, %v8702_v9  ;;  %v8630_v9 = vld [vmem:[%s10764_s19 + $0x10] sm:$0xf] }
 0x395   : > { %3642 = vmatpush.bf16.msra.mxu0 %v11807_v28  ;;  %3655 = vmatpush.bf16.msra.mxu1 %v11809_v41  ;;  %13504 = vst [vmem:[#allocation35_spill] sm:$0xff] %v11837_v34  ;;  %v11847_v28 = vor.u32 %v10314_v14, %v8704_v16  ;;  %v11855_v41 = vor.u32 %v10309_v38, %v8662_v52  ;;  %v10301_v13 = vld [vmem:[%s10764_s19 + $0x2c] sm:$0xf0]  ;;  %v10297_v14 = vld [vmem:[%s10764_s19 + $0x14] sm:$0xf] }
 0x396   : > { %3668 = vmatpush.bf16.msra.mxu2 %v11817_v42  ;;  %3681 = vmatpush.bf16.msra.mxu3 %v11819_v19  ;;  %13505 = vst [vmem:[#allocation36_spill] sm:$0xff] %v11845_v27  ;;  %v11857_v42 = vor.u32 %v10305_v25, %v8664_v0  ;;  %v8632_v16 = vld [vmem:[%s10764_s19 + $0x30] sm:$0xf0]  ;;  %v11865_v19 = vor.u32 %v10310_v56, %v8670_v55 }
 0x397   : > { %13506 = vst [vmem:[#allocation37_spill] sm:$0xff] %v11847_v28  ;;  %v11875_v0 = vor.u32 %v10301_v13, %v8630_v9  ;;  %v11877_v25 = vor.u32 %v10297_v14, %v8632_v16  ;;  %v11891_v55 = vpack.c.bf16 %v11530_v10, %v11530_v10 }
 0x398   : > { %13507 = vst [vmem:[#allocation38_spill] sm:$0xff] %v11855_v41 }
 0x399   : > { %3643 = vmatpush.bf16.msra.mxu0 %v11835_v46  ;;  %3656 = vmatpush.bf16.msra.mxu1 %v11837_v34  ;;  %13508 = vst [vmem:[#allocation39_spill] sm:$0xff] %v11857_v42  ;;  %v10302_v46 = vld [vmem:[%s10764_s19 + $0x34] sm:$0xf0]  ;;  %v8640_v34 = vld [vmem:[%s10764_s19 + $0x38] sm:$0xf0] }
 0x39a   : > { %3669 = vmatpush.bf16.msra.mxu2 %v11845_v27  ;;  %3682 = vmatpush.bf16.msra.mxu3 %v11847_v28  ;;  %13509 = vst [vmem:[#allocation40_spill] sm:$0xff] %v11865_v19  ;;  %v11881_v52 = vor.u32 %v10302_v46, %v8638_v8  ;;  %v11883_v38 = vor.u32 %v10298_v54, %v8640_v34  ;;  %v3698_v54 = vsel %vm3043_vm0, %v3693_v2, 0  ;;  %v3729_v8 = vsel %vm3080_vm1, %v11891_v55, 0 }
 0x39b   : > { %13510 = vst [vmem:[#allocation41_spill] sm:$0xff] %v11867_v53 }
 0x39c   : > { %13511 = vst [vmem:[#allocation42_spill] sm:$0xff] %v11875_v0 }
 0x39d   : > { %3644 = vmatpush.bf16.msra.mxu0 %v11855_v41  ;;  %3657 = vmatpush.bf16.msra.mxu1 %v11857_v42  ;;  %13512 = vst [vmem:[#allocation43_spill] sm:$0xff] %v11877_v25 }
 0x39e   : > { %3670 = vmatpush.bf16.msra.mxu2 %v11865_v19  ;;  %3683 = vmatpush.bf16.msra.mxu3 %v11867_v53  ;;  %13513 = vst [vmem:[#allocation44_spill] sm:$0xff] %v11881_v52 }
 0x39f   : > { %13514 = vst [vmem:[#allocation45_spill] sm:$0xff] %v11883_v38 }
 0x3a0   : > { %13515 = vst [vmem:[#allocation46_spill] sm:$0xff] %v11891_v55 }
 0x3a1   : > { %3645 = vmatpush.bf16.msra.mxu0 %v11875_v0  ;;  %3658 = vmatpush.bf16.msra.mxu1 %v11877_v25 }
 0x3a2   : > { %3671 = vmatpush.bf16.msra.mxu2 %v11881_v52  ;;  %3684 = vmatpush.bf16.msra.mxu3 %v11883_v38 }
 0x3a9   : > { %v3093_v56 = vpop.f32.mrf.mxu1 }
 0x3aa   : > { %v3097_v29 = vpack.c.bf16 %v3093_v56, %v3093_v56 }
 0x3ac   : > { %8740 = vmatmul.msk.bf16.vlgmr.msrb.gmra.mxu0 %vm3043_vm0, %v3097_v29  ;;  %8741 = vmatmul.msk.bf16.vlgmr.msrb.gmra.mxu1 %vm3043_vm0, %v3097_v29 }
 0x3ad   : > { %8742 = vmatmul.msk.bf16.vlgmr.msrb.gmra.mxu2 %vm3043_vm0, %v3097_v29  ;;  %8743 = vmatmul.msk.bf16.vlgmr.msrb.gmra.mxu3 %vm3043_vm0, %v3097_v29 }
 0x3ae   : > { %3707 = vmatpush.bf16.xpose.msrb.mxu0 %v3698_v54  ;;  %3738 = vmatpush.bf16.msrb.mxu1 %v3729_v8 }
 0x3b1   : > { %v3095_v10 = vpop.f32.mrf.mxu1 }
 0x3bc   : > { %8744 = vmatmul.msk.bf16.vlgmr.msra.gmra.mxu0 %vm3043_vm0, %v3097_v29  ;;  %8745 = vmatmul.msk.bf16.vlgmr.msra.gmra.mxu1 %vm3043_vm0, %v3097_v29 }
 0x3bd   : > { %8746 = vmatmul.msk.bf16.vlgmr.msra.gmra.mxu2 %vm3043_vm0, %v3097_v29  ;;  %8747 = vmatmul.msk.bf16.vlgmr.msra.gmra.mxu3 %vm3043_vm0, %v3097_v29 }
 0x3cc   : > { %8748 = vmatmul.msk.bf16.vlgmr.msrb.gmra.mxu0 %vm3043_vm0, %v11422_v12 }
 0x400   : > { %v3328_v46 = vpop.f32.mrf.mxu0  ;;  %v3341_v34 = vpop.f32.mrf.mxu1 }
 0x407   : > { %v3354_v9 = vpop.f32.mrf.mxu2  ;;  %v3367_v13 = vpop.f32.mrf.mxu3 }
 0x408   : > { %v3330_v14 = vpop.f32.mrf.mxu0  ;;  %v3343_v16 = vpop.f32.mrf.mxu1 }
 0x40f   : > { %v3356_v56 = vpop.f32.mrf.mxu2  ;;  %v3369_v2 = vpop.f32.mrf.mxu3 }
 0x410   : > { %v3380_v54 = vpop.f32.mrf.mxu0  ;;  %v3393_v8 = vpop.f32.mrf.mxu1 }
 0x417   : > { %v3406_v10 = vpop.f32.mrf.mxu2  ;;  %v3419_v38 = vpop.f32.mrf.mxu3 }
 0x418   : > { %v3382_v52 = vpop.f32.mrf.mxu0  ;;  %v3395_v25 = vpop.f32.mrf.mxu1 }
 0x41f   : > { %v3408_v0 = vpop.f32.mrf.mxu2  ;;  %v3421_v55 = vpop.f32.mrf.mxu3 }
 0x429   : > { %v3595_v29 = vpop.f32.mrf.mxu0  ;;  %v3608_v53 = vpop.f32.mrf.mxu1 }
 0x42a   : > { %v11906_v19 = vadd.f32 %v3595_v29, %v3328_v46  ;;  %v11908_v42 = vadd.f32 %v3608_v53, %v3341_v34 }
 0x430   : > { %v3621_v41 = vpop.f32.mrf.mxu2  ;;  %v3634_v28 = vpop.f32.mrf.mxu3 }
 0x431   : > { %v11910_v14 = vadd.f32 %v3621_v41, %v3354_v9  ;;  %v11912_v16 = vadd.f32 %v3634_v28, %v3367_v13  ;;  %v3597_v56 = vpop.f32.mrf.mxu0  ;;  %v3610_v2 = vpop.f32.mrf.mxu1 }
 0x438   : > { %v3623_v27 = vpop.f32.mrf.mxu2  ;;  %v3636_v47 = vpop.f32.mrf.mxu3 }
 0x439   : > { %v3647_v52 = vpop.f32.mrf.mxu0  ;;  %v3660_v25 = vpop.f32.mrf.mxu1 }
 0x43a   : > { %v11914_v0 = vadd.f32 %v3647_v52, %v3380_v54  ;;  %v11916_v55 = vadd.f32 %v3660_v25, %v3393_v8  ;;  %v13396_v54 = vrot.slane %v11422_v12, 1  ;;  %v13397_v8 = vrot.slane %v11516_v35, 1 }
 0x440   : > { %v3673_v46 = vpop.f32.mrf.mxu2  ;;  %v3686_v29 = vpop.f32.mrf.mxu3 }
 0x441   : > { %v11918_v53 = vadd.f32 %v3673_v46, %v3406_v10  ;;  %v11920_v34 = vadd.f32 %v3686_v29, %v3419_v38  ;;  %v3649_v41 = vpop.f32.mrf.mxu0  ;;  %v3662_v9 = vpop.f32.mrf.mxu1  ;;  %v13398_v38 = vrot.slane %v11523_v7, 1  ;;  %v8848_v29 = vld [vmem:[%s10764_s19 + $0x2c0] sm:$0xf] }
 0x442   : > { %v10387_v41 = vld [vmem:[%s10764_s19 + $0x2dc] sm:$0xf0]  ;;  %v10383_v9 = vld [vmem:[%s10764_s19 + $0x2c4] sm:$0xf] }
 0x448   : > { %v3675_v28 = vpop.f32.mrf.mxu2  ;;  %v3688_v13 = vpop.f32.mrf.mxu3 }
 0x449   : > { %v3709_v56 = vpop.f32.mrf.mxu0  ;;  %v11942_v28 = vor.u32 %v10387_v41, %v8848_v29  ;;  %v8850_v13 = vld [vmem:[%s10764_s19 + $0x2e0] sm:$0xf0]  ;;  %v10379_v41 = vld [vmem:[%s10764_s19 + $0x29c] sm:$0xf0] }
 0x44a   : > { %v3713_v27 = vsel %vm3063_vm2, %v3709_v56, -inf }
 0x44b   : > { %3714 = vmax.xlane.f32.xlu2 %v3713_v27  ;;  %13516 = vst [vmem:[#allocation47_spill] sm:$0xff] %v11942_v28  ;;  %v10388_v27 = vld [vmem:[%s10764_s19 + $0x2e4] sm:$0xf0]  ;;  %3912 = vmatpush.bf16.msrb.mxu2 %v11942_v28  ;;  %v8784_v28 = vld [vmem:[%s10764_s19 + $0x240] sm:$0xf] }
 0x451   : > { %v3711_v47 = vpop.f32.mrf.mxu0 }
 0x452   : > { %v11947_v47 = vor.u32 %v10383_v9, %v8850_v13 }
 0x454   : > { %13517 = vst [vmem:[#allocation48_spill] sm:$0xff] %v11947_v47  ;;  %3925 = vmatpush.bf16.msrb.mxu3 %v11947_v47  ;;  %v10371_v47 = vld [vmem:[%s10764_s19 + $0x25c] sm:$0xf0] }
 0x463   : > { %4055 = vrot.lane.b32.xlu2 %v13396_v54, %s10692_s30  ;;  %v10375_v54 = vld [vmem:[%s10764_s19 + $0x284] sm:$0xf] }
 0x46b   : > { %4143 = vrot.lane.b32.xlu2 %v13398_v38, %s10692_s30  ;;  %v8826_v38 = vld [vmem:[%s10764_s19 + $0x2a8] sm:$0xf0] }
 0x473   : > { %4379 = vrot.lane.b32.xlu2 %v13397_v8, %s10692_s30  ;;  %v8818_v8 = vld [vmem:[%s10764_s19 + $0x2a0] sm:$0xf0] }
 0x474   : > { %v11964_v13 = vor.u32 %v10375_v54, %v8818_v8  ;;  %v8786_v54 = vld [vmem:[%s10764_s19 + $0x260] sm:$0xf0]  ;;  %v8792_v8 = vld [vmem:[%s10764_s19 + $0x248] sm:$0xf] }
 0x476   : > { %13521 = vst [vmem:[#allocation52_spill] sm:$0xff] %v11964_v13  ;;  %3926 = vmatpush.bf16.msrb.mxu3 %v11964_v13  ;;  %v8760_v13 = vld [vmem:[%s10764_s19 + $0x208] sm:$0xf] }
 0x4be   : > { %v3715_v10 = vpop.xlane.xlu2 %3714 }
 0x4bf   : > { %v3716_v2 = vsub.f32 %v3709_v56, %v3715_v10  ;;  %v8856_v56 = vld [vmem:[%s10764_s19 + $0x2c8] sm:$0xf] }
 0x4c0   : > { %v11949_v10 = vor.u32 %v10388_v27, %v8856_v56  ;;  %v8824_v56 = vld [vmem:[%s10764_s19 + $0x288] sm:$0xf] }
 0x4c1   : > { %v3717_v52 = vmul.f32 1.442695, %v3716_v2  ;;  %v10384_v2 = vld [vmem:[%s10764_s19 + $0x2cc] sm:$0xf]  ;;  %v10380_v27 = vld [vmem:[%s10764_s19 + $0x2a4] sm:$0xf0] }
 0x4c2   : > { %13518 = vst [vmem:[#allocation49_spill] sm:$0xff] %v11949_v10  ;;  %3938 = vmatpush.bf16.msra.mxu0 %v11949_v10  ;;  %v11981_v10 = vor.u32 %v10371_v47, %v8784_v28  ;;  %v10363_v28 = vld [vmem:[%s10764_s19 + $0x21c] sm:$0xf0]  ;;  %v10359_v47 = vld [vmem:[%s10764_s19 + $0x204] sm:$0xf] }
 0x4c3   : > { %10610 = vpow2.f32 %v3717_v52  ;;  %v8858_v52 = vld [vmem:[%s10764_s19 + $0x2e8] sm:$0xf0] }
 0x4c4   : > { %v11955_v29 = vor.u32 %v10384_v2, %v8858_v52  ;;  %v10376_v2 = vld [vmem:[%s10764_s19 + $0x28c] sm:$0xf]  ;;  %v11970_v52 = vor.u32 %v10380_v27, %v8824_v56  ;;  %13524 = vst [vmem:[#allocation55_spill] sm:$0xff] %v11981_v10  ;;  %v10372_v56 = vld [vmem:[%s10764_s19 + $0x264] sm:$0xf0] }
 0x4c5   : > { %v10368_v27 = vld [vmem:[%s10764_s19 + $0x24c] sm:$0xf] }
 0x4c6   : > { %13519 = vst [vmem:[#allocation50_spill] sm:$0xff] %v11955_v29  ;;  %3951 = vmatpush.bf16.msra.mxu1 %v11955_v29  ;;  %v8794_v29 = vld [vmem:[%s10764_s19 + $0x268] sm:$0xf0]  ;;  %3939 = vmatpush.bf16.msra.mxu0 %v11970_v52 }
 0x4c7   : > { %13522 = vst [vmem:[#allocation53_spill] sm:$0xff] %v11970_v52  ;;  %v11996_v49 = vor.u32 %v10368_v27, %v8794_v29  ;;  %v10360_v52 = vld [vmem:[%s10764_s19 + $0x20c] sm:$0xf]  ;;  %v12012_v29 = vor.u32 %v10359_v47, %v8754_v50  ;;  %v12014_v27 = vor.u32 %v10364_v37, %v8760_v13  ;;  %v10377_v50 = vld [vmem:[%s10764_s19 + $0x294] sm:$0xf] }
 0x4c8   : > { %v8834_v37 = vld [vmem:[%s10764_s19 + $0x2b0] sm:$0xf0]  ;;  %v8840_v13 = vld [vmem:[%s10764_s19 + $0x298] sm:$0xf]  ;;  %v10373_v47 = vld [vmem:[%s10764_s19 + $0x26c] sm:$0xf0] }
 0x4c9   : > { %v11935_v25 = vpop.eup %10610  ;;  %13527 = vst [vmem:[#allocation58_spill] sm:$0xff] %v11996_v49 }
 0x4ca   : > { %v3719_v46 = vsel %vm3063_vm2, %v11935_v25, 0.0  ;;  %13529 = vst [vmem:[#allocation60_spill] sm:$0xff] %v12012_v29 }
 0x4cb   : > { %3720 = vadd.xlane.f32.xlu1 %v3719_v46  ;;  %v8816_v46 = vld [vmem:[%s10764_s19 + $0x280] sm:$0xf]  ;;  %13530 = vst [vmem:[#allocation61_spill] sm:$0xff] %v12014_v27 }
 0x4cc   : > { %v11962_v9 = vor.u32 %v10379_v41, %v8816_v46  ;;  %v11975_v46 = vor.u32 %v10376_v2, %v8826_v38  ;;  %v10367_v41 = vld [vmem:[%s10764_s19 + $0x244] sm:$0xf]  ;;  %v11990_v2 = vor.u32 %v10372_v56, %v8792_v8  ;;  %v10389_v8 = vld [vmem:[%s10764_s19 + $0x2ec] sm:$0xf0]  ;;  %v10385_v56 = vld [vmem:[%s10764_s19 + $0x2d4] sm:$0xf] }
 0x4cd   : > { %v11988_v38 = vor.u32 %v10367_v41, %v8786_v54  ;;  %v8864_v41 = vld [vmem:[%s10764_s19 + $0x2d0] sm:$0xf] }
 0x4ce   : > { %13520 = vst [vmem:[#allocation51_spill] sm:$0xff] %v11962_v9  ;;  %3913 = vmatpush.bf16.msrb.mxu2 %v11962_v9  ;;  %v8752_v9 = vld [vmem:[%s10764_s19 + $0x200] sm:$0xf]  ;;  %3952 = vmatpush.bf16.msra.mxu1 %v11975_v46 }
 0x4cf   : > { %13523 = vst [vmem:[#allocation54_spill] sm:$0xff] %v11975_v46  ;;  %v12005_v54 = vor.u32 %v10363_v28, %v8752_v9  ;;  %v8866_v46 = vld [vmem:[%s10764_s19 + $0x2f0] sm:$0xf0]  ;;  %3927 = vmatpush.bf16.msrb.mxu3 %v11988_v38  ;;  %3940 = vmatpush.bf16.msra.mxu0 %v11990_v2  ;;  %v12019_v9 = vor.u32 %v10360_v52, %v8762_v22  ;;  %v10382_v22 = vld [vmem:[%s10764_s19 + $0x2b4] sm:$0xf0] }
 0x4d0   : > { %13525 = vst [vmem:[#allocation56_spill] sm:$0xff] %v11988_v38  ;;  %v12021_v28 = vor.u32 %v10389_v8, %v8864_v41  ;;  %v12023_v31 = vor.u32 %v10385_v56, %v8866_v46  ;;  %v8832_v38 = vld [vmem:[%s10764_s19 + $0x290] sm:$0xf]  ;;  %v12044_v52 = vor.u32 %v10382_v22, %v8840_v13  ;;  %v10369_v41 = vld [vmem:[%s10764_s19 + $0x254] sm:$0xf] }
 0x4d1   : > { %13526 = vst [vmem:[#allocation57_spill] sm:$0xff] %v11990_v2  ;;  %v10381_v2 = vld [vmem:[%s10764_s19 + $0x2ac] sm:$0xf0]  ;;  %v8802_v8 = vld [vmem:[%s10764_s19 + $0x270] sm:$0xf0] }
 0x4d2   : > { %3914 = vmatpush.bf16.msrb.mxu2 %v11981_v10  ;;  %13528 = vst [vmem:[#allocation59_spill] sm:$0xff] %v12005_v54  ;;  %v8872_v10 = vld [vmem:[%s10764_s19 + $0x2d8] sm:$0xf]  ;;  %3953 = vmatpush.bf16.msra.mxu1 %v11996_v49  ;;  %v8800_v46 = vld [vmem:[%s10764_s19 + $0x250] sm:$0xf] }
 0x4d3   : > { %13531 = vst [vmem:[#allocation62_spill] sm:$0xff] %v12019_v9  ;;  %v12025_v61 = vor.u32 %v10390_v59, %v8872_v10  ;;  %3928 = vmatpush.bf16.msrb.mxu3 %v12012_v29  ;;  %3941 = vmatpush.bf16.msra.mxu0 %v12014_v27  ;;  %v12038_v59 = vor.u32 %v10381_v2, %v8832_v38  ;;  %v8808_v56 = vld [vmem:[%s10764_s19 + $0x258] sm:$0xf] }
 0x4d4   : > { %13532 = vst [vmem:[#allocation63_spill] sm:$0xff] %v12021_v28  ;;  %v12042_v10 = vor.u32 %v10377_v50, %v8834_v37  ;;  %v12053_v38 = vor.u32 %v10373_v47, %v8800_v46  ;;  %v12057_v2 = vor.u32 %v10369_v41, %v8802_v8  ;;  %v10386_v37 = vld [vmem:[%s10764_s19 + $0x2dc] sm:$0xf] }
 0x4d5   : > { %13533 = vst [vmem:[#allocation64_spill] sm:$0xff] %v12023_v31  ;;  %v10378_v47 = vld [vmem:[%s10764_s19 + $0x29c] sm:$0xf] }
 0x4d6   : > { %13534 = vst [vmem:[#allocation65_spill] sm:$0xff] %v12025_v61  ;;  %3915 = vmatpush.bf16.msrb.mxu2 %v12005_v54  ;;  %3954 = vmatpush.bf16.msra.mxu1 %v12019_v9  ;;  %v10374_v9 = vld [vmem:[%s10764_s19 + $0x274] sm:$0xf0]  ;;  %v8842_v41 = vld [vmem:[%s10764_s19 + $0x2b8] sm:$0xf0] }
 0x4d7   : > { %13535 = vst [vmem:[#allocation66_spill] sm:$0xff] %v12038_v59  ;;  %3977 = vmatpush.bf16.msra.mxu3 %v12023_v31  ;;  %3990 = vmatpush.bf16.msrb.mxu0 %v12025_v61  ;;  %v12059_v50 = vor.u32 %v10374_v9, %v8808_v56  ;;  %v12073_v8 = vor.u32 %v10378_v47, %v8842_v41  ;;  %v10370_v56 = vld [vmem:[%s10764_s19 + $0x25c] sm:$0xf] }
 0x4d8   : > { %13536 = vst [vmem:[#allocation67_spill] sm:$0xff] %v12042_v10  ;;  %v10362_v41 = vld [vmem:[%s10764_s19 + $0x21c] sm:$0xf] }
 0x4d9   : > { %13537 = vst [vmem:[#allocation68_spill] sm:$0xff] %v12044_v52 }
 0x4da   : > { %3964 = vmatpush.bf16.msra.mxu2 %v12021_v28  ;;  %13538 = vst [vmem:[#allocation69_spill] sm:$0xff] %v12053_v38 }
 0x4db   : > { %3978 = vmatpush.bf16.msra.mxu3 %v12042_v10  ;;  %3991 = vmatpush.bf16.msrb.mxu0 %v12044_v52  ;;  %13539 = vst [vmem:[#allocation70_spill] sm:$0xff] %v12057_v2  ;;  %v8776_v52 = vld [vmem:[%s10764_s19 + $0x218] sm:$0xf] }
 0x4dc   : > { %13540 = vst [vmem:[#allocation71_spill] sm:$0xff] %v12059_v50 }
 0x4de   : > { %3965 = vmatpush.bf16.msra.mxu2 %v12038_v59 }
 0x4df   : > { %3979 = vmatpush.bf16.msra.mxu3 %v12057_v2  ;;  %3992 = vmatpush.bf16.msrb.mxu0 %v12059_v50  ;;  %v8810_v50 = vld [vmem:[%s10764_s19 + $0x278] sm:$0xf0] }
 0x4e0   : > { %v8778_v2 = vld [vmem:[%s10764_s19 + $0x238] sm:$0xf0] }
 0x4e2   : > { %3966 = vmatpush.bf16.msra.mxu2 %v12053_v38 }
 0x53e   : > { %v3721_v27 = vpop.xlane.xlu1 %3720 }
 0x53f   : > { %10612 = vrcp.f32 %v3721_v27  ;;  %v8874_v27 = vld [vmem:[%s10764_s19 + $0x2f8] sm:$0xf0] }
 0x540   : > { %v12067_v46 = vor.u32 %v10386_v37, %v8874_v27  ;;  %v8768_v37 = vld [vmem:[%s10764_s19 + $0x210] sm:$0xf] }
 0x541   : > { %v10365_v27 = vld [vmem:[%s10764_s19 + $0x22c] sm:$0xf0] }
 0x542   : > { %13541 = vst [vmem:[#allocation72_spill] sm:$0xff] %v12067_v46 }
 0x545   : > { %v10613_v13 = vpop.eup %10612 }
 0x546   : > { %v3723_v22 = vmul.f32 %v10613_v13, %v11935_v25  ;;  %v12078_v25 = vor.u32 %v10370_v56, %v8810_v50  ;;  %v10361_v13 = vld [vmem:[%s10764_s19 + $0x214] sm:$0xf]  ;;  %v12096_v50 = vor.u32 %v10362_v41, %v8778_v2  ;;  %v4056_v56 = vpop.permute.xlu2 %4055  ;;  %v13546_v2 = vrot.slane %v11523_v7, 1 }
 0x548   : > { %v3724_v9 = vpack.c.bf16 %v3723_v22, %v3723_v22  ;;  %13542 = vst [vmem:[#allocation73_spill] sm:$0xff] %v12078_v25  ;;  %v12084_v22 = vor.u32 %v10365_v27, %v8768_v37 }
 0x54a   : > { %8749 = vmatmul.msk.bf16.vlgmr.msrb.gmra.mxu1 %vm3076_vm3, %v3724_v9  ;;  %13543 = vst [vmem:[#allocation74_spill] sm:$0xff] %v12084_v22  ;;  %v8770_v9 = vld [vmem:[%s10764_s19 + $0x230] sm:$0xf0]  ;;  %3967 = vmatpush.bf16.msra.mxu2 %v12084_v22 }
 0x54b   : > { %4003 = vmatpush.bf16.msrb.mxu1 %v12067_v46  ;;  %v10366_v46 = vld [vmem:[%s10764_s19 + $0x234] sm:$0xf0]  ;;  %v12089_v61 = vor.u32 %v10361_v13, %v8770_v9  ;;  %v13547_v9 = vrot.slane %v11516_v35, 1 }
 0x54c   : > { %v12091_v47 = vor.u32 %v10366_v46, %v8776_v52  ;;  %v4061_v52 = vsel %vm3043_vm0, %v4056_v56, 0  ;;  %v4093_v46 = vsel %vm3080_vm1, %v13546_v2, 0  ;;  %v13548_v56 = vrot.slane %v11265_v5, 1 }
 0x54d   : > { %13544 = vst [vmem:[#allocation75_spill] sm:$0xff] %v12089_v61  ;;  %3980 = vmatpush.bf16.msra.mxu3 %v12089_v61  ;;  %v4116_v41 = vsel %vm3043_vm0, %v13547_v9, 0 }
 0x54e   : > { %13545 = vst [vmem:[#allocation76_spill] sm:$0xff] %v12091_v47  ;;  %3993 = vmatpush.bf16.msrb.mxu0 %v12091_v47 }
 0x54f   : > { %4004 = vmatpush.bf16.msrb.mxu1 %v12073_v8 }
 0x553   : > { %4005 = vmatpush.bf16.msrb.mxu1 %v12078_v25  ;;  %v4144_v25 = vpop.permute.xlu2 %4143 }
 0x554   : > { %v4149_v13 = vsel %vm3080_vm1, %v4144_v25, 0  ;;  %v4110_v25 = vpop.permute.xlu0 %4109 }
 0x557   : > { %4006 = vmatpush.bf16.msrb.mxu1 %v12096_v50 }
 0x5c7   : > { %v3740_v37 = vpop.f32.mrf.mxu1 }
 0x5c8   : > { %v3744_v27 = vpack.c.bf16 %v3740_v37, %v3740_v37 }
 0x5ca   : > { %8878 = vmatmul.msk.bf16.vlgmr.msrb.gmra.mxu2 %vm3043_vm0, %v3744_v27  ;;  %8879 = vmatmul.msk.bf16.vlgmr.msrb.gmra.mxu3 %vm3043_vm0, %v3744_v27 }
 0x5cb   : > { %8880 = vmatmul.msk.bf16.vlgmr.msra.gmra.mxu0 %vm3043_vm0, %v3744_v27  ;;  %8881 = vmatmul.msk.bf16.vlgmr.msra.gmra.mxu1 %vm3043_vm0, %v3744_v27 }
 0x5cc   : > { %4070 = vmatpush.bf16.xpose.msrb.mxu2 %v4061_v52  ;;  %4102 = vmatpush.bf16.msrb.mxu3 %v4093_v46 }
 0x5cd   : > { %4125 = vmatpush.bf16.xpose.msra.mxu0 %v4116_v41  ;;  %4158 = vmatpush.bf16.msra.mxu1 %v4149_v13 }
 0x5cf   : > { %v3742_v37 = vpop.f32.mrf.mxu1 }
 0x5da   : > { %8882 = vmatmul.msk.bf16.vlgmr.msra.gmra.mxu2 %vm3043_vm0, %v3744_v27  ;;  %8883 = vmatmul.msk.bf16.vlgmr.msra.gmra.mxu3 %vm3043_vm0, %v3744_v27 }
 0x5db   : > { %8884 = vmatmul.msk.bf16.vlgmr.msrb.gmra.mxu0 %vm3043_vm0, %v3744_v27  ;;  %8885 = vmatmul.msk.bf16.vlgmr.msrb.gmra.mxu1 %vm3043_vm0, %v3744_v27 }
 0x5dc   : > { %4172 = vmatpush.bf16.msra.mxu2 %v11552_v1  ;;  %4185 = vmatpush.bf16.msra.mxu3 %v11557_v4 }
 0x5dd   : > { %4198 = vmatpush.bf16.msrb.mxu0 %v11559_v20  ;;  %4211 = vmatpush.bf16.msrb.mxu1 %v11565_v57 }
 0x5e0   : > { %4173 = vmatpush.bf16.msra.mxu2 %v11572_v15  ;;  %4186 = vmatpush.bf16.msra.mxu3 %v11574_v43 }
 0x5e1   : > { %4199 = vmatpush.bf16.msrb.mxu0 %v11580_v21  ;;  %4212 = vmatpush.bf16.msrb.mxu1 %v11585_v23 }
 0x5e4   : > { %4174 = vmatpush.bf16.msra.mxu2 %v11591_v26  ;;  %4187 = vmatpush.bf16.msra.mxu3 %v11598_v32 }
 0x5e5   : > { %4200 = vmatpush.bf16.msrb.mxu0 %v11600_v48  ;;  %4213 = vmatpush.bf16.msrb.mxu1 %v11603_v33 }
 0x5e8   : > { %4175 = vmatpush.bf16.msra.mxu2 %v11614_v39  ;;  %4188 = vmatpush.bf16.msra.mxu3 %v11619_v44 }
 0x5e9   : > { %4201 = vmatpush.bf16.msrb.mxu0 %v11621_v45  ;;  %4214 = vmatpush.bf16.msrb.mxu1 %v11626_v24 }
 0x5ea   : > { %8886 = vmatmul.msk.bf16.vlgmr.msrb.gmra.mxu2 %vm3043_vm0, %v13548_v56 }
 0x5eb   : > { %8888 = vmatmul.msk.bf16.vlgmr.msra.gmra.mxu0 %vm3043_vm0, %v4110_v25 }
 0x5ec   : > { %4224 = vmatpush.bf16.msrb.mxu2 %v11634_v58 }
 0x5ed   : > { %4250 = vmatpush.bf16.msra.mxu0 %v11641_v63 }
 0x5f0   : > { %4225 = vmatpush.bf16.msrb.mxu2 %v11654_v11 }
 0x5f1   : > { %4251 = vmatpush.bf16.msra.mxu0 %v11661_v18 }
 0x5f4   : > { %4226 = vmatpush.bf16.msrb.mxu2 %v11674_v30 }
 0x5f5   : > { %4252 = vmatpush.bf16.msra.mxu0 %v11682_v36 }
 0x5f8   : > { %4227 = vmatpush.bf16.msrb.mxu2 %v11693_v51 }
 0x5f9   : > { %4253 = vmatpush.bf16.msra.mxu0 %v11702_v60 }
 0x648   : > { %v3943_v27 = vpop.f32.mrf.mxu0  ;;  %v3956_v52 = vpop.f32.mrf.mxu1 }
 0x649   : > { %v12146_v2 = vadd.f32 %v3943_v27, %v11910_v14  ;;  %v12149_v46 = vadd.f32 %v3956_v52, %v11912_v16 }
 0x64d   : > { %v3917_v13 = vpop.f32.mrf.mxu2  ;;  %v3930_v9 = vpop.f32.mrf.mxu3 }
 0x64e   : > { %v12152_v41 = vadd.f32 %v3917_v13, %v11906_v19  ;;  %v12155_v37 = vadd.f32 %v3930_v9, %v11908_v42 }
 0x650   : > { %v3945_v25 = vpop.f32.mrf.mxu0  ;;  %v3958_v56 = vpop.f32.mrf.mxu1 }
 0x655   : > { %v3919_v24 = vpop.f32.mrf.mxu2  ;;  %v3932_v33 = vpop.f32.mrf.mxu3 }
 0x658   : > { %v3995_v23 = vpop.f32.mrf.mxu0  ;;  %v4008_v57 = vpop.f32.mrf.mxu1 }
 0x659   : > { %v12158_v14 = vadd.f32 %v3995_v23, %v11918_v53  ;;  %v12161_v16 = vadd.f32 %v4008_v57, %v11920_v34 }
 0x65b   : > { %13549 = vst [vmem:[#allocation77_spill] sm:$0xff] %v12158_v14 }
 0x65c   : > { %13550 = vst [vmem:[#allocation78_spill] sm:$0xff] %v12161_v16 }
 0x65d   : > { %v3969_v27 = vpop.f32.mrf.mxu2  ;;  %v3982_v52 = vpop.f32.mrf.mxu3 }
 0x65e   : > { %v12164_v19 = vadd.f32 %v3969_v27, %v11914_v0  ;;  %v12167_v42 = vadd.f32 %v3982_v52, %v11916_v55  ;;  %v13455_v0 = vrot.slane %v11422_v12, 2 }
 0x660   : > { %v3997_v13 = vpop.f32.mrf.mxu0  ;;  %v4010_v9 = vpop.f32.mrf.mxu1 }
 0x665   : > { %v3971_v24 = vpop.f32.mrf.mxu2  ;;  %v3984_v33 = vpop.f32.mrf.mxu3 }
 0x668   : > { %v4127_v25 = vpop.f32.mrf.mxu0 }
 0x669   : > { %v4131_v56 = vsel %vm3063_vm2, %v4127_v25, -inf }
 0x66a   : > { %4132 = vmax.xlane.f32.xlu0 %v4131_v56 }
 0x66d   : > { %v4072_v23 = vpop.f32.mrf.mxu2 }
 0x66e   : > { %v4076_v57 = vsel %vm3063_vm2, %v4072_v23, -inf }
 0x66f   : > { %4077 = vmax.xlane.f32.xlu1 %v4076_v57 }
 0x670   : > { %v4129_v53 = vpop.f32.mrf.mxu0 }
 0x675   : > { %v4074_v34 = vpop.f32.mrf.mxu2 }
 0x67e   : > { %4591 = vrot.lane.b32.xlu0 %v13455_v0, %s10692_s30 }
 0x6dd   : > { %v4133_v55 = vpop.xlane.xlu0 %4132 }
 0x6de   : > { %v4134_v27 = vsub.f32 %v4127_v25, %v4133_v55 }
 0x6e0   : > { %v4135_v52 = vmul.f32 1.442695, %v4134_v27 }
 0x6e2   : > { %10614 = vpow2.f32 %v4135_v52  ;;  %v4078_v13 = vpop.xlane.xlu1 %4077 }
 0x6e3   : > { %v4079_v9 = vsub.f32 %v4072_v23, %v4078_v13 }
 0x6e5   : > { %v4080_v24 = vmul.f32 1.442695, %v4079_v9  ;;  %v13554_v9 = vld [vmem:[#allocation14_spill] sm:$0xff] }
 0x6e7   : > { %10616 = vpow2.f32 %v4080_v24  ;;  %v13555_v24 = vld [vmem:[#allocation15_spill] sm:$0xff] }
 0x6e8   : > { %v10615_v33 = vpop.eup %10614 }
 0x6e9   : > { %v4137_v56 = vsel %vm3063_vm2, %v10615_v33, 0.0 }
 0x6ea   : > { %4138 = vadd.xlane.f32.xlu1 %v4137_v56  ;;  %v13557_v56 = vld [vmem:[#allocation17_spill] sm:$0xff] }
 0x6ed   : > { %v10617_v57 = vpop.eup %10616 }
 0x6ee   : > { %v4082_v53 = vsel %vm3063_vm2, %v10617_v57, 0.0 }
 0x6f2   : > { %4083 = vadd.xlane.f32.xlu1 %v4082_v53  ;;  %v13558_v53 = vld [vmem:[#allocation18_spill] sm:$0xff] }
 0x75d   : > { %v4139_v34 = vpop.xlane.xlu1 %4138 }
 0x75e   : > { %10618 = vrcp.f32 %v4139_v34  ;;  %v13559_v34 = vld [vmem:[#allocation19_spill] sm:$0xff] }
 0x764   : > { %v10619_v16 = vpop.eup %10618 }
 0x765   : > { %v4141_v0 = vmul.f32 %v10619_v16, %v10615_v33  ;;  %v4084_v14 = vpop.xlane.xlu1 %4083  ;;  %v13551_v16 = vld [vmem:[#allocation13_spill] sm:$0xff]  ;;  %v13556_v33 = vld [vmem:[#allocation16_spill] sm:$0xff] }
 0x766   : > { %10620 = vrcp.f32 %v4084_v14  ;;  %v13552_v14 = vld [vmem:[#allocation11_spill] sm:$0xff] }
 0x767   : > { %v4142_v25 = vpack.c.bf16 %v4141_v0, %v4141_v0  ;;  %v13553_v0 = vld [vmem:[#allocation12_spill] sm:$0xff] }
 0x769   : > { %8889 = vmatmul.msk.bf16.vlgmr.msra.gmra.mxu1 %vm3076_vm3, %v4142_v25  ;;  %v13560_v25 = vld [vmem:[#allocation20_spill] sm:$0xff] }
 0x76a   : > { %4263 = vmatpush.bf16.msra.mxu1 %v11646_v3 }
 0x76c   : > { %v10621_v23 = vpop.eup %10620 }
 0x76d   : > { %v4086_v55 = vmul.f32 %v10621_v23, %v10617_v57  ;;  %v13561_v23 = vld [vmem:[#allocation21_spill] sm:$0xff] }
 0x76e   : > { %4264 = vmatpush.bf16.msra.mxu1 %v11667_v6 }
 0x76f   : > { %v4087_v27 = vpack.c.bf16 %v4086_v55, %v4086_v55  ;;  %v13562_v55 = vld [vmem:[#allocation22_spill] sm:$0xff] }
 0x771   : > { %8887 = vmatmul.msk.bf16.vlgmr.msrb.gmra.mxu3 %vm3076_vm3, %v4087_v27  ;;  %v13563_v27 = vld [vmem:[#allocation23_spill] sm:$0xff] }
 0x772   : > { %4237 = vmatpush.bf16.msrb.mxu3 %v11639_v62  ;;  %4265 = vmatpush.bf16.msra.mxu1 %v11687_v40 }
 0x776   : > { %4238 = vmatpush.bf16.msrb.mxu3 %v11659_v17  ;;  %4266 = vmatpush.bf16.msra.mxu1 %v13551_v16  ;;  %v13583_v16 = vld [vmem:[#allocation42_spill] sm:$0xff] }
 0x77a   : > { %4239 = vmatpush.bf16.msrb.mxu3 %v13552_v14 }
 0x77e   : > { %4240 = vmatpush.bf16.msrb.mxu3 %v13553_v0 }
 0x7e6   : > { %v4160_v52 = vpop.f32.mrf.mxu1 }
 0x7e7   : > { %v4164_v13 = vpack.c.bf16 %v4160_v52, %v4160_v52 }
 0x7e9   : > { %8890 = vmatmul.msk.bf16.vlgmr.msra.gmra.mxu2 %vm3043_vm0, %v4164_v13  ;;  %8891 = vmatmul.msk.bf16.vlgmr.msra.gmra.mxu3 %vm3043_vm0, %v4164_v13 }
 0x7ea   : > { %8892 = vmatmul.msk.bf16.vlgmr.msrb.gmra.mxu0 %vm3043_vm0, %v4164_v13  ;;  %8893 = vmatmul.msk.bf16.vlgmr.msrb.gmra.mxu1 %vm3043_vm0, %v4164_v13 }
 0x7eb   : > { %4279 = vmatpush.bf16.msra.mxu2 %v13554_v9  ;;  %4292 = vmatpush.bf16.msra.mxu3 %v13555_v24  ;;  %v13564_v9 = vld [vmem:[#allocation24_spill] sm:$0xff]  ;;  %v13565_v24 = vld [vmem:[#allocation25_spill] sm:$0xff] }
 0x7ec   : > { %4305 = vmatpush.bf16.msrb.mxu0 %v13556_v33  ;;  %4318 = vmatpush.bf16.msrb.mxu1 %v13557_v56  ;;  %v13566_v33 = vld [vmem:[#allocation26_spill] sm:$0xff]  ;;  %v4380_v56 = vpop.permute.xlu2 %4379 }
 0x7ee   : > { %v4162_v57 = vpop.f32.mrf.mxu1 }
 0x7ef   : > { %4280 = vmatpush.bf16.msra.mxu2 %v13558_v53  ;;  %4293 = vmatpush.bf16.msra.mxu3 %v13559_v34  ;;  %v13567_v57 = vld [vmem:[#allocation27_spill] sm:$0xff]  ;;  %v13568_v53 = vld [vmem:[#allocation28_spill] sm:$0xff]  ;;  %v13569_v34 = vld [vmem:[#allocation29_spill] sm:$0xff] }
 0x7f0   : > { %4306 = vmatpush.bf16.msrb.mxu0 %v13560_v25  ;;  %4319 = vmatpush.bf16.msrb.mxu1 %v13561_v23  ;;  %v13577_v23 = vld [vmem:[#allocation37_spill] sm:$0xff]  ;;  %v13578_v25 = vld [vmem:[#allocation38_spill] sm:$0xff] }
 0x7f3   : > { %4281 = vmatpush.bf16.msra.mxu2 %v13562_v55  ;;  %4294 = vmatpush.bf16.msra.mxu3 %v13563_v27  ;;  %v13570_v27 = vld [vmem:[#allocation30_spill] sm:$0xff]  ;;  %v13576_v55 = vld [vmem:[#allocation36_spill] sm:$0xff] }
 0x7f4   : > { %v4104_v52 = vpop.f32.mrf.mxu3  ;;  %4307 = vmatpush.bf16.msrb.mxu0 %v13564_v9  ;;  %4320 = vmatpush.bf16.msrb.mxu1 %v13565_v24  ;;  %v13571_v9 = vld [vmem:[#allocation31_spill] sm:$0xff] }
 0x7f7   : > { %4282 = vmatpush.bf16.msra.mxu2 %v13566_v33  ;;  %4295 = vmatpush.bf16.msra.mxu3 %v13567_v57  ;;  %v13572_v33 = vld [vmem:[#allocation32_spill] sm:$0xff]  ;;  %v13573_v57 = vld [vmem:[#allocation33_spill] sm:$0xff] }
 0x7f8   : > { %4308 = vmatpush.bf16.msrb.mxu0 %v13568_v53  ;;  %4321 = vmatpush.bf16.msrb.mxu1 %v13569_v34  ;;  %v13574_v53 = vld [vmem:[#allocation34_spill] sm:$0xff]  ;;  %v13575_v34 = vld [vmem:[#allocation35_spill] sm:$0xff] }
 0x7f9   : > { %8894 = vmatmul.msk.bf16.vlgmr.msrb.gmra.mxu2 %vm3043_vm0, %v4164_v13  ;;  %8895 = vmatmul.msk.bf16.vlgmr.msrb.gmra.mxu3 %vm3043_vm0, %v4164_v13 }
 0x7fa   : > { %8896 = vmatmul.msk.bf16.vlgmr.msra.gmra.mxu0 %vm3043_vm0, %v4164_v13  ;;  %8897 = vmatmul.msk.bf16.vlgmr.msra.gmra.mxu1 %vm3043_vm0, %v4164_v13  ;;  %v13579_v13 = vld [vmem:[#allocation39_spill] sm:$0xff] }
 0x7fb   : > { %4331 = vmatpush.bf16.msrb.mxu2 %v13570_v27  ;;  %4344 = vmatpush.bf16.msrb.mxu3 %v13571_v9  ;;  %v13580_v27 = vld [vmem:[#allocation40_spill] sm:$0xff]  ;;  %v13581_v9 = vld [vmem:[#allocation41_spill] sm:$0xff] }
 0x7fc   : > { %v4106_v24 = vpop.f32.mrf.mxu3  ;;  %4357 = vmatpush.bf16.msra.mxu0 %v13572_v33  ;;  %4370 = vmatpush.bf16.msra.mxu1 %v13573_v57  ;;  %v4108_v57 = vpack.c.bf16 %v4104_v52, %v4104_v52 }
 0x7fd   : > { %v13582_v24 = vld [vmem:[#allocation46_spill] sm:$0xff] }
 0x7fe   : > { %v4413_v33 = vrot.slane %v13582_v24, 1  ;;  %v13591_v24 = vld [vmem:[#allocation55_spill] sm:$0xff] }
 0x7ff   : > { %4332 = vmatpush.bf16.msrb.mxu2 %v13574_v53  ;;  %4345 = vmatpush.bf16.msrb.mxu3 %v13575_v34  ;;  %v13584_v53 = vld [vmem:[#allocation43_spill] sm:$0xff]  ;;  %v13585_v34 = vld [vmem:[#allocation44_spill] sm:$0xff] }
 0x800   : > { %4358 = vmatpush.bf16.msra.mxu0 %v13576_v55  ;;  %4371 = vmatpush.bf16.msra.mxu1 %v13577_v23  ;;  %v13586_v55 = vld [vmem:[#allocation45_spill] sm:$0xff]  ;;  %v4418_v52 = vsel %vm3080_vm1, %v4413_v33, 0 }
 0x801   : > { %v13593_v33 = vld [vmem:[#allocation49_spill] sm:$0xff] }
 0x803   : > { %4333 = vmatpush.bf16.msrb.mxu2 %v13578_v25  ;;  %4346 = vmatpush.bf16.msrb.mxu3 %v13579_v13 }
 0x804   : > { %4359 = vmatpush.bf16.msra.mxu0 %v13580_v27  ;;  %4372 = vmatpush.bf16.msra.mxu1 %v13581_v9  ;;  %v4385_v27 = vsel %vm3043_vm0, %v4380_v56, 0  ;;  %v13592_v9 = vld [vmem:[#allocation56_spill] sm:$0xff]  ;;  %v13594_v56 = vld [vmem:[#allocation50_spill] sm:$0xff] }
 0x807   : > { %4334 = vmatpush.bf16.msrb.mxu2 %v13583_v16  ;;  %4347 = vmatpush.bf16.msrb.mxu3 %v13584_v53  ;;  %v13587_v16 = vld [vmem:[#allocation47_spill] sm:$0xff]  ;;  %v13588_v53 = vld [vmem:[#allocation48_spill] sm:$0xff] }
 0x808   : > { %4360 = vmatpush.bf16.msra.mxu0 %v13585_v34  ;;  %4373 = vmatpush.bf16.msra.mxu1 %v13586_v55  ;;  %v13589_v34 = vld [vmem:[#allocation51_spill] sm:$0xff]  ;;  %v13590_v55 = vld [vmem:[#allocation52_spill] sm:$0xff] }
 0x809   : > { %8898 = vmatmul.msk.bf16.vlgmr.msra.gmra.mxu2 %vm3043_vm0, %v4108_v57  ;;  %8899 = vmatmul.msk.bf16.vlgmr.msra.gmra.mxu3 %vm3043_vm0, %v4108_v57 }
 0x80a   : > { %8900 = vmatmul.msk.bf16.vlgmr.msrb.gmra.mxu0 %vm3043_vm0, %v4108_v57  ;;  %8901 = vmatmul.msk.bf16.vlgmr.msrb.gmra.mxu1 %vm3043_vm0, %v4108_v57 }
 0x80b   : > { %4394 = vmatpush.bf16.xpose.msra.mxu2 %v4385_v27  ;;  %4427 = vmatpush.bf16.msra.mxu3 %v4418_v52  ;;  %v13595_v27 = vld [vmem:[#allocation53_spill] sm:$0xff]  ;;  %v13596_v52 = vld [vmem:[#allocation54_spill] sm:$0xff] }
 0x80c   : > { %4441 = vmatpush.bf16.msrb.mxu0 %v13587_v16  ;;  %4454 = vmatpush.bf16.msrb.mxu1 %v13588_v53 }
 0x810   : > { %4442 = vmatpush.bf16.msrb.mxu0 %v13589_v34  ;;  %4455 = vmatpush.bf16.msrb.mxu1 %v13590_v55 }
 0x814   : > { %4443 = vmatpush.bf16.msrb.mxu0 %v13591_v24  ;;  %4456 = vmatpush.bf16.msrb.mxu1 %v13592_v9 }
 0x818   : > { %4444 = vmatpush.bf16.msrb.mxu0 %v12005_v54  ;;  %4457 = vmatpush.bf16.msrb.mxu1 %v12012_v29  ;;  %v13597_v29 = vld [vmem:[#allocation57_spill] sm:$0xff] }
 0x819   : > { %8902 = vmatmul.msk.bf16.vlgmr.msrb.gmra.mxu2 %vm3043_vm0, %v4108_v57  ;;  %8903 = vmatmul.msk.bf16.vlgmr.msrb.gmra.mxu3 %vm3043_vm0, %v4108_v57 }
 0x81a   : > { %8904 = vmatmul.msk.bf16.vlgmr.msra.gmra.mxu0 %vm3043_vm0, %v4108_v57  ;;  %8905 = vmatmul.msk.bf16.vlgmr.msra.gmra.mxu1 %vm3043_vm0, %v4108_v57  ;;  %v13598_v57 = vld [vmem:[#allocation70_spill] sm:$0xff] }
 0x81b   : > { %4467 = vmatpush.bf16.msrb.mxu2 %v13593_v33  ;;  %4480 = vmatpush.bf16.msrb.mxu3 %v13594_v56  ;;  %v13599_v56 = vld [vmem:[#allocation61_spill] sm:$0xff] }
 0x81c   : > { %4493 = vmatpush.bf16.msra.mxu0 %v12021_v28  ;;  %4506 = vmatpush.bf16.msra.mxu1 %v12023_v31  ;;  %v13600_v28 = vld [vmem:[#allocation62_spill] sm:$0xff] }
 0x81f   : > { %4468 = vmatpush.bf16.msrb.mxu2 %v13595_v27  ;;  %4481 = vmatpush.bf16.msrb.mxu3 %v13596_v52 }
 0x820   : > { %4494 = vmatpush.bf16.msra.mxu0 %v12038_v59  ;;  %4507 = vmatpush.bf16.msra.mxu1 %v12042_v10  ;;  %v13601_v59 = vrot.slane %v11422_v12, 1  ;;  %v13602_v10 = vld [vmem:[#allocation65_spill] sm:$0xff] }
 0x823   : > { %4469 = vmatpush.bf16.msrb.mxu2 %v13597_v29  ;;  %4482 = vmatpush.bf16.msrb.mxu3 %v11996_v49  ;;  %v13603_v29 = vld [vmem:[#allocation68_spill] sm:$0xff]  ;;  %v13604_v49 = vld [vmem:[#allocation71_spill] sm:$0xff] }
 0x824   : > { %4495 = vmatpush.bf16.msra.mxu0 %v12053_v38  ;;  %4508 = vmatpush.bf16.msra.mxu1 %v13598_v57 }
 0x827   : > { %4470 = vmatpush.bf16.msrb.mxu2 %v13599_v56  ;;  %4483 = vmatpush.bf16.msrb.mxu3 %v13600_v28 }
 0x828   : > { %4496 = vmatpush.bf16.msra.mxu0 %v12084_v22  ;;  %4509 = vmatpush.bf16.msra.mxu1 %v12089_v61 }
 0x829   : > { %8906 = vmatmul.msk.bf16.vlgmr.msra.gmra.mxu2 %vm3043_vm0, %v13601_v59 }
 0x82b   : > { %4519 = vmatpush.bf16.msra.mxu2 %v13602_v10 }
 0x82f   : > { %4520 = vmatpush.bf16.msra.mxu2 %v13603_v29 }
 0x833   : > { %4521 = vmatpush.bf16.msra.mxu2 %v13604_v49 }
 0x837   : > { %4522 = vmatpush.bf16.msra.mxu2 %v12091_v47 }
 0x867   : > { %v4203_v57 = vpop.f32.mrf.mxu0  ;;  %v4216_v56 = vpop.f32.mrf.mxu1 }
 0x86c   : > { %v4177_v38 = vpop.f32.mrf.mxu2  ;;  %v4190_v28 = vpop.f32.mrf.mxu3 }
 0x86f   : > { %v4205_v52 = vpop.f32.mrf.mxu0  ;;  %v4218_v22 = vpop.f32.mrf.mxu1 }
 0x874   : > { %v4179_v27 = vpop.f32.mrf.mxu2  ;;  %v4192_v61 = vpop.f32.mrf.mxu3 }
 0x877   : > { %v4255_v31 = vpop.f32.mrf.mxu0  ;;  %v4268_v12 = vpop.f32.mrf.mxu1 }
 0x87c   : > { %v4229_v33 = vpop.f32.mrf.mxu2  ;;  %v4242_v59 = vpop.f32.mrf.mxu3 }
 0x87f   : > { %v4257_v54 = vpop.f32.mrf.mxu0  ;;  %v4270_v10 = vpop.f32.mrf.mxu1 }
 0x884   : > { %v4231_v9 = vpop.f32.mrf.mxu2  ;;  %v4244_v29 = vpop.f32.mrf.mxu3 }
 0x887   : > { %v4310_v24 = vpop.f32.mrf.mxu0  ;;  %v4323_v49 = vpop.f32.mrf.mxu1 }
 0x888   : > { %v12269_v55 = vadd.f32 %v4310_v24, %v4203_v57  ;;  %v12271_v47 = vadd.f32 %v4323_v49, %v4216_v56 }
 0x88c   : > { %v4284_v34 = vpop.f32.mrf.mxu2  ;;  %v4297_v53 = vpop.f32.mrf.mxu3 }
 0x88d   : > { %v12273_v52 = vadd.f32 %v4284_v34, %v4177_v38  ;;  %v12275_v22 = vadd.f32 %v4297_v53, %v4190_v28 }
 0x88f   : > { %v4312_v61 = vpop.f32.mrf.mxu0  ;;  %v4325_v27 = vpop.f32.mrf.mxu1 }
 0x894   : > { %v4286_v16 = vpop.f32.mrf.mxu2  ;;  %v4299_v13 = vpop.f32.mrf.mxu3 }
 0x897   : > { %v4362_v54 = vpop.f32.mrf.mxu0  ;;  %v4375_v10 = vpop.f32.mrf.mxu1 }
 0x898   : > { %v12277_v9 = vadd.f32 %v4362_v54, %v4255_v31  ;;  %v12279_v29 = vadd.f32 %v4375_v10, %v4268_v12  ;;  %v4589_v31 = vrot.slane %v11265_v5, 2  ;;  %v13606_v5 = vld [vmem:[#allocation73_spill] sm:$0xff] }
 0x89c   : > { %v4336_v24 = vpop.f32.mrf.mxu2  ;;  %v4349_v57 = vpop.f32.mrf.mxu3 }
 0x89d   : > { %v12281_v49 = vadd.f32 %v4336_v24, %v4229_v33  ;;  %v12283_v56 = vadd.f32 %v4349_v57, %v4242_v59 }
 0x89f   : > { %v4364_v38 = vpop.f32.mrf.mxu0  ;;  %v4377_v34 = vpop.f32.mrf.mxu1 }
 0x8a0   : > { %v13605_v34 = vld [vmem:[#allocation72_spill] sm:$0xff] }
 0x8a4   : > { %v4338_v28 = vpop.f32.mrf.mxu2  ;;  %v4351_v53 = vpop.f32.mrf.mxu3 }
 0x8a5   : > { %v13468_v53 = vrot.slane %v11523_v7, 2 }
 0x8ac   : > { %v4396_v61 = vpop.f32.mrf.mxu2 }
 0x8ad   : > { %v4400_v16 = vsel %vm3063_vm2, %v4396_v61, -inf }
 0x8ae   : > { %4401 = vmax.xlane.f32.xlu1 %v4400_v16 }
 0x8b4   : > { %v4398_v13 = vpop.f32.mrf.mxu2 }
 0x8b5   : > { %v4647_v13 = vrot.slane %v11516_v35, 2  ;;  %v13615_v35 = vrot.slane %v11523_v7, 2  ;;  %v13616_v7 = vld [vmem:[#allocation7_spill] sm:$0xff] }
 0x8c7   : > { %4645 = vrot.lane.b32.xlu1 %v4589_v31, %s10692_s30 }
 0x921   : > { %v4402_v12 = vpop.xlane.xlu1 %4401 }
 0x922   : > { %v4403_v27 = vsub.f32 %v4396_v61, %v4402_v12  ;;  %v4592_v61 = vpop.permute.xlu0 %4591 }
 0x923   : > { %v4597_v12 = vsel %vm3043_vm0, %v4592_v61, 0 }
 0x924   : > { %v4404_v54 = vmul.f32 1.442695, %v4403_v27  ;;  %v4629_v27 = vsel %vm3080_vm1, %v13468_v53, 0 }
 0x926   : > { %10622 = vpow2.f32 %v4404_v54  ;;  %v4652_v54 = vsel %vm3043_vm0, %v4647_v13, 0 }
 0x92c   : > { %v10623_v33 = vpop.eup %10622 }
 0x92d   : > { %v4406_v59 = vsel %vm3063_vm2, %v10623_v33, 0.0 }
 0x92e   : > { %4407 = vadd.xlane.f32.xlu2 %v4406_v59 }
 0x9a1   : > { %v4408_v10 = vpop.xlane.xlu2 %4407 }
 0x9a2   : > { %10624 = vrcp.f32 %v4408_v10 }
 0x9a8   : > { %v10625_v24 = vpop.eup %10624 }
 0x9a9   : > { %v4410_v57 = vmul.f32 %v10625_v24, %v10623_v33 }
 0x9ab   : > { %v4411_v38 = vpack.c.bf16 %v4410_v57, %v4410_v57 }
 0x9ad   : > { %8907 = vmatmul.msk.bf16.vlgmr.msra.gmra.mxu3 %vm3076_vm3, %v4411_v38 }
 0x9ae   : > { %4532 = vmatpush.bf16.msra.mxu3 %v13605_v34 }
 0x9b2   : > { %4533 = vmatpush.bf16.msra.mxu3 %v12073_v8 }
 0x9b6   : > { %4534 = vmatpush.bf16.msra.mxu3 %v13606_v5 }
 0x9ba   : > { %4535 = vmatpush.bf16.msra.mxu3 %v12096_v50 }
 0xa30   : > { %v4429_v28 = vpop.f32.mrf.mxu3 }
 0xa31   : > { %v4433_v16 = vpack.c.bf16 %v4429_v28, %v4429_v28  ;;  %v12388_v28 = vld [vmem:[#allocation2 + $0x10] sm:$0x3f] }
 0xa32   : > { %v4023_v61 = vadd.f32 %v12388_v28, %v12149_v46 }
 0xa33   : > { %8908 = vmatmul.msk.bf16.vlgmr.msrb.gmra.mxu0 %vm3043_vm0, %v4433_v16  ;;  %8909 = vmatmul.msk.bf16.vlgmr.msrb.gmra.mxu1 %vm3043_vm0, %v4433_v16 }
 0xa34   : > { %8910 = vmatmul.msk.bf16.vlgmr.msrb.gmra.mxu2 %vm3043_vm0, %v4433_v16  ;;  %8911 = vmatmul.msk.bf16.vlgmr.msrb.gmra.mxu3 %vm3043_vm0, %v4433_v16 }
 0xa35   : > { %4606 = vmatpush.bf16.xpose.msrb.mxu0 %v4597_v12  ;;  %4638 = vmatpush.bf16.msrb.mxu1 %v4629_v27 }
 0xa36   : > { %4661 = vmatpush.bf16.xpose.msrb.mxu2 %v4652_v54 }
 0xa38   : > { %v4431_v33 = vpop.f32.mrf.mxu3 }
 0xa43   : > { %8912 = vmatmul.msk.bf16.vlgmr.msra.gmra.mxu0 %vm3043_vm0, %v4433_v16  ;;  %8913 = vmatmul.msk.bf16.vlgmr.msra.gmra.mxu1 %vm3043_vm0, %v4433_v16 }
 0xa44   : > { %8914 = vmatmul.msk.bf16.vlgmr.msra.gmra.mxu2 %vm3043_vm0, %v4433_v16  ;;  %8915 = vmatmul.msk.bf16.vlgmr.msra.gmra.mxu3 %vm3043_vm0, %v4433_v16 }
 0xa45   : > { %4708 = vmatpush.bf16.msra.mxu0 %v11552_v1  ;;  %4721 = vmatpush.bf16.msra.mxu1 %v11557_v4  ;;  %v4646_v1 = vpop.permute.xlu1 %4645 }
 0xa46   : > { %4734 = vmatpush.bf16.msra.mxu2 %v11559_v20 }
 0xa49   : > { %4709 = vmatpush.bf16.msra.mxu0 %v11572_v15  ;;  %4722 = vmatpush.bf16.msra.mxu1 %v11574_v43  ;;  %v12334_v15 = vld [vmem:[%s10749_s9] sm:$0xff] }
 0xa4a   : > { %4735 = vmatpush.bf16.msra.mxu2 %v11580_v21  ;;  %v12369_v10 = vperm.slane %v12334_v15, 2  ;;  %v12372_v24 = vperm.slane %v12334_v15, 3 }
 0xa4d   : > { %4710 = vmatpush.bf16.msra.mxu0 %v11591_v26  ;;  %4723 = vmatpush.bf16.msra.mxu1 %v11598_v32  ;;  %v12339_v26 = vperm.slane %v12334_v15, 0  ;;  %v12342_v32 = vperm.slane %v12334_v15, 1 }
 0xa4e   : > { %4736 = vmatpush.bf16.msra.mxu2 %v11600_v48  ;;  %v12344_v48 = vld [vmem:[#allocation2 + $0x30] sm:$0x3f] }
 0xa51   : > { %4711 = vmatpush.bf16.msra.mxu0 %v11614_v39  ;;  %4724 = vmatpush.bf16.msra.mxu1 %v11619_v44  ;;  %v4020_v39 = vadd.f32 %v12344_v48, %v12152_v41  ;;  %v12348_v44 = vld [vmem:[#allocation2] sm:$0x3f] }
 0xa52   : > { %4737 = vmatpush.bf16.msra.mxu2 %v11621_v45  ;;  %v4021_v45 = vadd.f32 %v12348_v44, %v12155_v37 }
 0xa53   : > { %8916 = vmatmul.msk.bf16.vlgmr.msrb.gmra.mxu0 %vm3043_vm0, %v4589_v31 }
 0xa54   : > { %8918 = vmatmul.msk.bf16.vlgmr.msrb.gmra.mxu2 %vm3043_vm0, %v4646_v1  ;;  %v12398_v1 = vadd.f32 %v12372_v24, %v4023_v61 }
 0xa55   : > { %4760 = vmatpush.bf16.msrb.mxu0 %v11634_v58 }
 0xa56   : > { %4786 = vmatpush.bf16.msrb.mxu2 %v11641_v63 }
 0xa59   : > { %4761 = vmatpush.bf16.msrb.mxu0 %v11654_v11 }
 0xa5a   : > { %4787 = vmatpush.bf16.msrb.mxu2 %v11661_v18 }
 0xa5d   : > { %4762 = vmatpush.bf16.msrb.mxu0 %v11674_v30  ;;  %v12355_v30 = vadd.f32 %v12339_v26, %v4020_v39 }
 0xa5e   : > { %4788 = vmatpush.bf16.msrb.mxu2 %v11682_v36  ;;  %v12358_v36 = vadd.f32 %v12342_v32, %v4021_v45 }
 0xa61   : > { %4763 = vmatpush.bf16.msrb.mxu0 %v11693_v51 }
 0xa62   : > { %4789 = vmatpush.bf16.msrb.mxu2 %v11702_v60 }
 0xab0   : > { %v4446_v4 = vpop.f32.mrf.mxu0  ;;  %v4459_v20 = vpop.f32.mrf.mxu1 }
 0xab1   : > { %v4541_v43 = vadd.f32 %v4446_v4, %v12273_v52  ;;  %v4542_v21 = vadd.f32 %v4459_v20, %v12275_v22 }
 0xab3   : > { %v4557_v58 = vrot.slane %v4541_v43, 6  ;;  %v4558_v63 = vrot.slane %v4542_v21, 6 }
 0xab5   : > { %v4573_v11 = vadd.f32 %v12344_v48, %v4557_v58  ;;  %v4574_v18 = vadd.f32 %v12348_v44, %v4558_v63 }
 0xab7   : > { %v12361_v51 = vadd.f32 %v4573_v11, %v12339_v26  ;;  %v12364_v60 = vadd.f32 %v4574_v18, %v12342_v32  ;;  %v4472_v41 = vpop.f32.mrf.mxu2  ;;  %v4485_v37 = vpop.f32.mrf.mxu3  ;;  %v12419_v11 = vperm.slane %v12334_v15, 4  ;;  %v12422_v18 = vperm.slane %v12334_v15, 5 }
 0xab8   : > { %v4543_v52 = vadd.f32 %v4472_v41, %v12269_v55  ;;  %v4544_v22 = vadd.f32 %v4485_v37, %v12271_v47  ;;  %v4448_v31 = vpop.f32.mrf.mxu0  ;;  %v4461_v59 = vpop.f32.mrf.mxu1  ;;  %v12384_v55 = vld [vmem:[#allocation2 + $0x18] sm:$0x3f]  ;;  %v12424_v41 = vld [vmem:[#allocation2 + $0x8] sm:$0x3f] }
 0xab9   : > { %13607 = vst [vmem:[#allocation11_spill] sm:$0xff] %v12364_v60  ;;  %v12377_v57 = vsel %vm5124_vm4, %v12355_v30, %v12361_v51  ;;  %v12382_v38 = vsel %vm5124_vm4, %v12358_v36, %v12364_v60  ;;  %v4022_v47 = vadd.f32 %v12384_v55, %v12146_v2  ;;  %v4024_v37 = vadd.f32 %v12424_v41, %v12164_v19 }
 0xaba   : > { %v4559_v16 = vrot.slane %v4543_v52, 6  ;;  %v4560_v12 = vrot.slane %v4544_v22, 6  ;;  %v12428_v52 = vld [vmem:[#allocation2 + $0x20] sm:$0x3f] }
 0xabb   : > { %v12395_v33 = vadd.f32 %v12369_v10, %v4022_v47  ;;  %v4025_v22 = vadd.f32 %v12428_v52, %v12167_v42  ;;  %v12435_v47 = vadd.f32 %v12419_v11, %v4024_v37 }
 0xabc   : > { %v4575_v27 = vadd.f32 %v12384_v55, %v4559_v16  ;;  %v4576_v54 = vadd.f32 %v12388_v28, %v4560_v12 }
 0xabd   : > { %v12438_v61 = vadd.f32 %v12422_v18, %v4025_v22  ;;  %v12468_v22 = vld [vmem:[#allocation2 + $0x38] sm:$0x3f] }
 0xabe   : > { %v12401_v4 = vadd.f32 %v4575_v27, %v12369_v10  ;;  %v12404_v2 = vadd.f32 %v4576_v54, %v12372_v24 }
 0xabf   : > { %v4474_v20 = vpop.f32.mrf.mxu2  ;;  %v4487_v46 = vpop.f32.mrf.mxu3 }
 0xac0   : > { %13608 = vst [vmem:[#allocation12_spill] sm:$0xff] %v12404_v2  ;;  %v12409_v43 = vsel %vm5124_vm4, %v12395_v33, %v12401_v4  ;;  %v12414_v21 = vsel %vm5124_vm4, %v12398_v1, %v12404_v2  ;;  %v4498_v39 = vpop.f32.mrf.mxu0  ;;  %v4511_v45 = vpop.f32.mrf.mxu1 }
 0xac1   : > { %v4545_v58 = vadd.f32 %v4498_v39, %v12281_v49  ;;  %v4546_v63 = vadd.f32 %v4511_v45, %v12283_v56  ;;  %v12449_v39 = vperm.slane %v12334_v15, 6  ;;  %v12452_v45 = vperm.slane %v12334_v15, 7 }
 0xac3   : > { %v4561_v31 = vrot.slane %v4545_v58, 6  ;;  %v4562_v49 = vrot.slane %v4546_v63, 6 }
 0xac5   : > { %v4577_v56 = vadd.f32 %v12424_v41, %v4561_v31  ;;  %v4578_v59 = vadd.f32 %v12428_v52, %v4562_v49  ;;  %v13612_v31 = vld [vmem:[#allocation78_spill] sm:$0xff] }
 0xac6   : > { %v4027_v15 = vadd.f32 %v12468_v22, %v13612_v31 }
 0xac7   : > { %v12441_v16 = vadd.f32 %v4577_v56, %v12419_v11  ;;  %v12444_v19 = vadd.f32 %v4578_v59, %v12422_v18  ;;  %v4524_v12 = vpop.f32.mrf.mxu2  ;;  %v4537_v42 = vpop.f32.mrf.mxu3 }
 0xac8   : > { %v4547_v27 = vadd.f32 %v4524_v12, %v12277_v9  ;;  %v4548_v54 = vadd.f32 %v4537_v42, %v12279_v29  ;;  %v4500_v20 = vpop.f32.mrf.mxu0  ;;  %v4513_v46 = vpop.f32.mrf.mxu1  ;;  %v12464_v9 = vld [vmem:[#allocation2 + $0x28] sm:$0x3f]  ;;  %v13611_v29 = vld [vmem:[#allocation77_spill] sm:$0xff] }
 0xac9   : > { %13609 = vst [vmem:[#allocation37_spill] sm:$0xff] %v12441_v16  ;;  %v12457_v58 = vsel %vm5124_vm4, %v12435_v47, %v12441_v16  ;;  %v12462_v63 = vsel %vm5124_vm4, %v12438_v61, %v12444_v19  ;;  %v4026_v37 = vadd.f32 %v12464_v9, %v13611_v29  ;;  %v12478_v20 = vadd.f32 %v12452_v45, %v4027_v15 }
 0xaca   : > { %13610 = vst [vmem:[#allocation38_spill] sm:$0xff] %v12444_v19  ;;  %v4563_v49 = vrot.slane %v4547_v27, 6  ;;  %v4564_v56 = vrot.slane %v4548_v54, 6 }
 0xacb   : > { %v12475_v42 = vadd.f32 %v12449_v39, %v4026_v37 }
 0xacc   : > { %v4579_v59 = vadd.f32 %v12464_v9, %v4563_v49  ;;  %v4580_v12 = vadd.f32 %v12468_v22, %v4564_v56 }
 0xace   : > { %v12481_v46 = vadd.f32 %v4579_v59, %v12449_v39  ;;  %v12484_v29 = vadd.f32 %v4580_v12, %v12452_v45 }
 0xacf   : > { %v4526_v53 = vpop.f32.mrf.mxu2  ;;  %v4539_v31 = vpop.f32.mrf.mxu3 }
 0xad0   : > { %13613 = vst [vmem:[#allocation72_spill] sm:$0xff] %v12481_v46  ;;  %v12489_v27 = vsel %vm5124_vm4, %v12475_v42, %v12481_v46  ;;  %v12494_v54 = vsel %vm5124_vm4, %v12478_v20, %v12484_v29  ;;  %v4608_v37 = vpop.f32.mrf.mxu0 }
 0xad1   : > { %13614 = vst [vmem:[#allocation73_spill] sm:$0xff] %v12484_v29  ;;  %v4612_v15 = vsel %vm3063_vm2, %v4608_v37, -inf }
 0xad2   : > { %4613 = vmax.xlane.f32.xlu1 %v4612_v15 }
 0xad7   : > { %v4663_v49 = vpop.f32.mrf.mxu2 }
 0xad8   : > { %v4610_v56 = vpop.f32.mrf.mxu0  ;;  %v4667_v59 = vsel %vm3063_vm2, %v4663_v49, -inf }
 0xad9   : > { %4668 = vmax.xlane.f32.xlu0 %v4667_v59 }
 0xadf   : > { %v4665_v53 = vpop.f32.mrf.mxu2 }
 0xaeb   : > { %4915 = vrot.lane.b32.xlu1 %v4647_v13, %s10692_s30 }
 0xb45   : > { %v4614_v12 = vpop.xlane.xlu1 %4613 }
 0xb46   : > { %v4615_v31 = vsub.f32 %v4608_v37, %v4614_v12 }
 0xb48   : > { %v4616_v19 = vmul.f32 1.442695, %v4615_v31 }
 0xb4a   : > { %10626 = vpow2.f32 %v4616_v19 }
 0xb4c   : > { %v4669_v29 = vpop.xlane.xlu0 %4668 }
 0xb4d   : > { %v4670_v16 = vsub.f32 %v4663_v49, %v4669_v29 }
 0xb4f   : > { %v4671_v46 = vmul.f32 1.442695, %v4670_v16 }
 0xb50   : > { %v10627_v60 = vpop.eup %10626 }
 0xb51   : > { %10628 = vpow2.f32 %v4671_v46  ;;  %v4618_v15 = vsel %vm3063_vm2, %v10627_v60, 0.0 }
 0xb52   : > { %4619 = vadd.xlane.f32.xlu0 %v4618_v15  ;;  %v13619_v15 = vld [vmem:[#allocation10_spill] sm:$0xff] }
 0xb57   : > { %v10629_v56 = vpop.eup %10628 }
 0xb58   : > { %v4673_v59 = vsel %vm3063_vm2, %v10629_v56, 0.0 }
 0xb59   : > { %4674 = vadd.xlane.f32.xlu2 %v4673_v59 }
 0xb71   : > { %4679 = vrot.lane.b32.xlu2 %v13615_v35, %s10692_s30 }
 0xbc5   : > { %v4620_v13 = vpop.xlane.xlu0 %4619 }
 0xbc6   : > { %10630 = vrcp.f32 %v4620_v13 }
 0xbcc   : > { %v10631_v37 = vpop.eup %10630  ;;  %v4675_v19 = vpop.xlane.xlu2 %4674 }
 0xbcd   : > { %v4622_v53 = vmul.f32 %v10631_v37, %v10627_v60  ;;  %10632 = vrcp.f32 %v4675_v19  ;;  %v13617_v60 = vld [vmem:[#allocation8_spill] sm:$0xff]  ;;  %v13625_v37 = vld [vmem:[#allocation18_spill] sm:$0xff]  ;;  %v13626_v19 = vld [vmem:[#allocation19_spill] sm:$0xff] }
 0xbcf   : > { %v4623_v16 = vpack.c.bf16 %v4622_v53, %v4622_v53  ;;  %v13627_v53 = vld [vmem:[#allocation20_spill] sm:$0xff] }
 0xbd1   : > { %8917 = vmatmul.msk.bf16.vlgmr.msrb.gmra.mxu1 %vm3076_vm3, %v4623_v16  ;;  %v13628_v16 = vld [vmem:[#allocation21_spill] sm:$0xff] }
 0xbd2   : > { %4773 = vmatpush.bf16.msrb.mxu1 %v11639_v62  ;;  %v13618_v62 = vld [vmem:[#allocation9_spill] sm:$0xff] }
 0xbd3   : > { %v10633_v46 = vpop.eup %10632 }
 0xbd4   : > { %v4677_v29 = vmul.f32 %v10633_v46, %v10629_v56  ;;  %v4680_v49 = vpop.permute.xlu2 %4679  ;;  %v13629_v46 = vld [vmem:[#allocation22_spill] sm:$0xff] }
 0xbd5   : > { %v4685_v12 = vsel %vm3080_vm1, %v4680_v49, 0  ;;  %v13631_v49 = vld [vmem:[#allocation24_spill] sm:$0xff] }
 0xbd6   : > { %v4678_v31 = vpack.c.bf16 %v4677_v29, %v4677_v29  ;;  %4694 = vmatpush.bf16.msrb.mxu3 %v4685_v12  ;;  %4774 = vmatpush.bf16.msrb.mxu1 %v11659_v17  ;;  %v13620_v17 = vld [vmem:[#allocation13_spill] sm:$0xff]  ;;  %v13630_v29 = vld [vmem:[#allocation23_spill] sm:$0xff] }
 0xbd7   : > { %v13632_v12 = vld [vmem:[#allocation25_spill] sm:$0xff] }
 0xbd9   : > { %8919 = vmatmul.msk.bf16.vlgmr.msrb.gmra.mxu3 %vm3076_vm3, %v4678_v31  ;;  %v13633_v31 = vld [vmem:[#allocation26_spill] sm:$0xff] }
 0xbda   : > { %4747 = vmatpush.bf16.msra.mxu3 %v13616_v7  ;;  %4775 = vmatpush.bf16.msrb.mxu1 %v13552_v14  ;;  %v13634_v7 = vld [vmem:[#allocation27_spill] sm:$0xff] }
 0xbde   : > { %4748 = vmatpush.bf16.msra.mxu3 %v13617_v60  ;;  %4776 = vmatpush.bf16.msrb.mxu1 %v13553_v0  ;;  %v13621_v0 = vld [vmem:[#allocation14_spill] sm:$0xff]  ;;  %v13635_v60 = vld [vmem:[#allocation28_spill] sm:$0xff] }
 0xbe2   : > { %4749 = vmatpush.bf16.msra.mxu3 %v13618_v62  ;;  %v13636_v62 = vld [vmem:[#allocation29_spill] sm:$0xff] }
 0xbe6   : > { %4750 = vmatpush.bf16.msra.mxu3 %v13619_v15  ;;  %v13637_v15 = vld [vmem:[#allocation30_spill] sm:$0xff] }
 0xbea   : > { %4799 = vmatpush.bf16.msrb.mxu3 %v11646_v3  ;;  %v13622_v3 = vld [vmem:[#allocation15_spill] sm:$0xff] }
 0xbee   : > { %4800 = vmatpush.bf16.msrb.mxu3 %v11667_v6  ;;  %v13623_v6 = vld [vmem:[#allocation16_spill] sm:$0xff] }
 0xbf2   : > { %4801 = vmatpush.bf16.msrb.mxu3 %v11687_v40  ;;  %v13624_v40 = vld [vmem:[#allocation17_spill] sm:$0xff] }
 0xbf6   : > { %4802 = vmatpush.bf16.msrb.mxu3 %v13620_v17  ;;  %v13638_v17 = vld [vmem:[#allocation31_spill] sm:$0xff] }
 0xc4e   : > { %v4640_v56 = vpop.f32.mrf.mxu1 }
 0xc56   : > { %v4642_v59 = vpop.f32.mrf.mxu1 }
 0xc57   : > { %v13639_v59 = vld [vmem:[#allocation32_spill] sm:$0xff] }
 0xc5c   : > { %v4696_v35 = vpop.f32.mrf.mxu3 }
 0xc5d   : > { %v4700_v14 = vpack.c.bf16 %v4696_v35, %v4696_v35  ;;  %v13640_v35 = vld [vmem:[#allocation33_spill] sm:$0xff] }
 0xc5f   : > { %8920 = vmatmul.msk.bf16.vlgmr.msra.gmra.mxu0 %vm3043_vm0, %v4700_v14  ;;  %8921 = vmatmul.msk.bf16.vlgmr.msra.gmra.mxu1 %vm3043_vm0, %v4700_v14 }
 0xc60   : > { %8922 = vmatmul.msk.bf16.vlgmr.msra.gmra.mxu2 %vm3043_vm0, %v4700_v14  ;;  %8923 = vmatmul.msk.bf16.vlgmr.msra.gmra.mxu3 %vm3043_vm0, %v4700_v14 }
 0xc61   : > { %4815 = vmatpush.bf16.msra.mxu0 %v13621_v0  ;;  %4828 = vmatpush.bf16.msra.mxu1 %v13622_v3  ;;  %v13641_v0 = vld [vmem:[#allocation34_spill] sm:$0xff]  ;;  %v13642_v3 = vld [vmem:[#allocation35_spill] sm:$0xff] }
 0xc62   : > { %4841 = vmatpush.bf16.msra.mxu2 %v13623_v6  ;;  %4854 = vmatpush.bf16.msra.mxu3 %v13624_v40  ;;  %v13643_v6 = vld [vmem:[#allocation36_spill] sm:$0xff]  ;;  %v13644_v40 = vld [vmem:[#allocation39_spill] sm:$0xff] }
 0xc64   : > { %v4698_v13 = vpop.f32.mrf.mxu3 }
 0xc65   : > { %4816 = vmatpush.bf16.msra.mxu0 %v13625_v37  ;;  %4829 = vmatpush.bf16.msra.mxu1 %v13626_v19  ;;  %v13646_v13 = vld [vmem:[#allocation41_spill] sm:$0xff]  ;;  %v13647_v37 = vld [vmem:[#allocation46_spill] sm:$0xff] }
 0xc66   : > { %4842 = vmatpush.bf16.msra.mxu2 %v13627_v53  ;;  %4855 = vmatpush.bf16.msra.mxu3 %v13628_v16  ;;  %v4948_v19 = vrot.slane %v13647_v37, 2  ;;  %v4916_v53 = vpop.permute.xlu1 %4915  ;;  %v4644_v16 = vpack.c.bf16 %v4640_v56, %v4640_v56  ;;  %v13652_v56 = vld [vmem:[#allocation47_spill] sm:$0xff] }
 0xc67   : > { %v13667_v37 = vld [vmem:[#allocation67_spill] sm:$0xff] }
 0xc69   : > { %4817 = vmatpush.bf16.msra.mxu0 %v13629_v46  ;;  %4830 = vmatpush.bf16.msra.mxu1 %v13630_v29  ;;  %v13648_v46 = vld [vmem:[#allocation42_spill] sm:$0xff]  ;;  %v13649_v29 = vld [vmem:[#allocation43_spill] sm:$0xff] }
 0xc6a   : > { %4843 = vmatpush.bf16.msra.mxu2 %v13631_v49  ;;  %4856 = vmatpush.bf16.msra.mxu3 %v13632_v12  ;;  %v13650_v49 = vld [vmem:[#allocation44_spill] sm:$0xff]  ;;  %v13651_v12 = vld [vmem:[#allocation45_spill] sm:$0xff] }
 0xc6d   : > { %4818 = vmatpush.bf16.msra.mxu0 %v13633_v31  ;;  %4831 = vmatpush.bf16.msra.mxu1 %v13634_v7  ;;  %v13653_v31 = vld [vmem:[#allocation48_spill] sm:$0xff]  ;;  %v13654_v7 = vld [vmem:[#allocation51_spill] sm:$0xff] }
 0xc6e   : > { %4844 = vmatpush.bf16.msra.mxu2 %v13635_v60  ;;  %4857 = vmatpush.bf16.msra.mxu3 %v13636_v62  ;;  %v13655_v60 = vld [vmem:[#allocation52_spill] sm:$0xff]  ;;  %v13656_v62 = vld [vmem:[#allocation55_spill] sm:$0xff] }
 0xc6f   : > { %8924 = vmatmul.msk.bf16.vlgmr.msrb.gmra.mxu0 %vm3043_vm0, %v4700_v14  ;;  %8925 = vmatmul.msk.bf16.vlgmr.msrb.gmra.mxu1 %vm3043_vm0, %v4700_v14 }
 0xc70   : > { %8926 = vmatmul.msk.bf16.vlgmr.msrb.gmra.mxu2 %vm3043_vm0, %v4700_v14  ;;  %8927 = vmatmul.msk.bf16.vlgmr.msrb.gmra.mxu3 %vm3043_vm0, %v4700_v14  ;;  %v13645_v14 = vld [vmem:[#allocation40_spill] sm:$0xff] }
 0xc71   : > { %4867 = vmatpush.bf16.msrb.mxu0 %v13637_v15  ;;  %4880 = vmatpush.bf16.msrb.mxu1 %v13638_v17  ;;  %v13657_v15 = vld [vmem:[#allocation56_spill] sm:$0xff]  ;;  %v13658_v17 = vld [vmem:[#allocation59_spill] sm:$0xff] }
 0xc72   : > { %4893 = vmatpush.bf16.msrb.mxu2 %v13639_v59  ;;  %4906 = vmatpush.bf16.msrb.mxu3 %v13640_v35  ;;  %v13659_v59 = vld [vmem:[#allocation60_spill] sm:$0xff]  ;;  %v13660_v35 = vld [vmem:[#allocation49_spill] sm:$0xff] }
 0xc75   : > { %4868 = vmatpush.bf16.msrb.mxu0 %v13641_v0  ;;  %4881 = vmatpush.bf16.msrb.mxu1 %v13642_v3  ;;  %v13661_v0 = vld [vmem:[#allocation50_spill] sm:$0xff]  ;;  %v13662_v3 = vld [vmem:[#allocation63_spill] sm:$0xff] }
 0xc76   : > { %4894 = vmatpush.bf16.msrb.mxu2 %v13643_v6  ;;  %4907 = vmatpush.bf16.msrb.mxu3 %v13577_v23  ;;  %v4953_v23 = vsel %vm3080_vm1, %v4948_v19, 0  ;;  %v13663_v6 = vld [vmem:[#allocation64_spill] sm:$0xff]  ;;  %v13668_v19 = vld [vmem:[#allocation57_spill] sm:$0xff] }
 0xc79   : > { %4869 = vmatpush.bf16.msrb.mxu0 %v13578_v25  ;;  %4882 = vmatpush.bf16.msrb.mxu1 %v13644_v40  ;;  %v4921_v25 = vsel %vm3043_vm0, %v4916_v53, 0  ;;  %v13664_v40 = vld [vmem:[#allocation53_spill] sm:$0xff]  ;;  %v13669_v53 = vld [vmem:[#allocation58_spill] sm:$0xff] }
 0xc7a   : > { %4895 = vmatpush.bf16.msrb.mxu2 %v13645_v14  ;;  %4908 = vmatpush.bf16.msrb.mxu3 %v13646_v13  ;;  %v13665_v14 = vld [vmem:[#allocation54_spill] sm:$0xff] }
 0xc7b   : > { %v13666_v13 = vld [vmem:[#allocation66_spill] sm:$0xff] }
 0xc7d   : > { %4870 = vmatpush.bf16.msrb.mxu0 %v13648_v46  ;;  %4883 = vmatpush.bf16.msrb.mxu1 %v13649_v29  ;;  %v13671_v46 = vld [vmem:[#allocation70_spill] sm:$0xff]  ;;  %v13672_v29 = vld [vmem:[#allocation61_spill] sm:$0xff] }
 0xc7e   : > { %4896 = vmatpush.bf16.msrb.mxu2 %v13650_v49  ;;  %4909 = vmatpush.bf16.msrb.mxu3 %v13651_v12  ;;  %v13673_v49 = vld [vmem:[#allocation62_spill] sm:$0xff] }
 0xc7f   : > { %8928 = vmatmul.msk.bf16.vlgmr.msra.gmra.mxu0 %vm3043_vm0, %v4644_v16  ;;  %8929 = vmatmul.msk.bf16.vlgmr.msra.gmra.mxu1 %vm3043_vm0, %v4644_v16  ;;  %v13674_v12 = vld [vmem:[#allocation74_spill] sm:$0xff] }
 0xc80   : > { %8930 = vmatmul.msk.bf16.vlgmr.msra.gmra.mxu2 %vm3043_vm0, %v4644_v16  ;;  %8931 = vmatmul.msk.bf16.vlgmr.msra.gmra.mxu3 %vm3043_vm0, %v4644_v16 }
 0xc81   : > { %4930 = vmatpush.bf16.xpose.msra.mxu0 %v4921_v25  ;;  %4962 = vmatpush.bf16.msra.mxu1 %v4953_v23  ;;  %v13675_v25 = vld [vmem:[#allocation75_spill] sm:$0xff]  ;;  %v13676_v23 = vld [vmem:[#allocation6_spill] sm:$0xff] }
 0xc82   : > { %4976 = vmatpush.bf16.msra.mxu2 %v13652_v56  ;;  %4989 = vmatpush.bf16.msra.mxu3 %v13653_v31  ;;  %v13677_v56 = vrot.slane %v13676_v23, 2  ;;  %v13678_v31 = vld [vmem:[#allocation65_spill] sm:$0xff] }
 0xc86   : > { %4977 = vmatpush.bf16.msra.mxu2 %v13654_v7  ;;  %4990 = vmatpush.bf16.msra.mxu3 %v13655_v60  ;;  %v13679_v7 = vld [vmem:[#allocation68_spill] sm:$0xff]  ;;  %v13680_v60 = vld [vmem:[#allocation71_spill] sm:$0xff] }
 0xc8a   : > { %4978 = vmatpush.bf16.msra.mxu2 %v13656_v62  ;;  %4991 = vmatpush.bf16.msra.mxu3 %v13657_v15  ;;  %v13681_v62 = vld [vmem:[#allocation76_spill] sm:$0xff] }
 0xc8e   : > { %4979 = vmatpush.bf16.msra.mxu2 %v13658_v17  ;;  %4992 = vmatpush.bf16.msra.mxu3 %v13659_v59 }
 0xc8f   : > { %8932 = vmatmul.msk.bf16.vlgmr.msrb.gmra.mxu0 %vm3043_vm0, %v4644_v16  ;;  %8933 = vmatmul.msk.bf16.vlgmr.msrb.gmra.mxu1 %vm3043_vm0, %v4644_v16 }
 0xc90   : > { %8934 = vmatmul.msk.bf16.vlgmr.msrb.gmra.mxu2 %vm3043_vm0, %v4644_v16  ;;  %8935 = vmatmul.msk.bf16.vlgmr.msrb.gmra.mxu3 %vm3043_vm0, %v4644_v16  ;;  %v13670_v16 = vld [vmem:[#allocation69_spill] sm:$0xff] }
 0xc91   : > { %5002 = vmatpush.bf16.msrb.mxu0 %v13660_v35  ;;  %5015 = vmatpush.bf16.msrb.mxu1 %v13661_v0 }
 0xc92   : > { %5028 = vmatpush.bf16.msrb.mxu2 %v13662_v3  ;;  %5041 = vmatpush.bf16.msrb.mxu3 %v13663_v6 }
 0xc95   : > { %5003 = vmatpush.bf16.msrb.mxu0 %v13664_v40  ;;  %5016 = vmatpush.bf16.msrb.mxu1 %v13665_v14 }
 0xc96   : > { %5029 = vmatpush.bf16.msrb.mxu2 %v13666_v13  ;;  %5042 = vmatpush.bf16.msrb.mxu3 %v13667_v37 }
 0xc99   : > { %5004 = vmatpush.bf16.msrb.mxu0 %v13668_v19  ;;  %5017 = vmatpush.bf16.msrb.mxu1 %v13669_v53 }
 0xc9a   : > { %5030 = vmatpush.bf16.msrb.mxu2 %v13670_v16  ;;  %5043 = vmatpush.bf16.msrb.mxu3 %v13671_v46 }
 0xc9d   : > { %5005 = vmatpush.bf16.msrb.mxu0 %v13672_v29  ;;  %5018 = vmatpush.bf16.msrb.mxu1 %v13673_v49 }
 0xc9e   : > { %5031 = vmatpush.bf16.msrb.mxu2 %v13674_v12  ;;  %5044 = vmatpush.bf16.msrb.mxu3 %v13675_v25 }
 0xc9f   : > { %8936 = vmatmul.msk.bf16.vlgmr.msra.gmra.mxu0 %vm3043_vm0, %v13677_v56 }
 0xca1   : > { %5054 = vmatpush.bf16.msra.mxu0 %v13678_v31 }
 0xca5   : > { %5055 = vmatpush.bf16.msra.mxu0 %v13679_v7 }
 0xca9   : > { %5056 = vmatpush.bf16.msra.mxu0 %v13680_v60 }
 0xcad   : > { %5057 = vmatpush.bf16.msra.mxu0 %v13681_v62 }
 0xcdc   : > { %v4713_v15 = vpop.f32.mrf.mxu0  ;;  %v4726_v17 = vpop.f32.mrf.mxu1 }
 0xce3   : > { %v4739_v59 = vpop.f32.mrf.mxu2  ;;  %v4752_v35 = vpop.f32.mrf.mxu3 }
 0xce4   : > { %v4715_v0 = vpop.f32.mrf.mxu0  ;;  %v4728_v3 = vpop.f32.mrf.mxu1 }
 0xceb   : > { %v4741_v6 = vpop.f32.mrf.mxu2  ;;  %v4754_v40 = vpop.f32.mrf.mxu3 }
 0xcec   : > { %v4765_v14 = vpop.f32.mrf.mxu0  ;;  %v4778_v13 = vpop.f32.mrf.mxu1 }
 0xcf3   : > { %v4791_v37 = vpop.f32.mrf.mxu2  ;;  %v4804_v19 = vpop.f32.mrf.mxu3 }
 0xcf4   : > { %v4767_v53 = vpop.f32.mrf.mxu0  ;;  %v4780_v16 = vpop.f32.mrf.mxu1 }
 0xcfb   : > { %v4793_v46 = vpop.f32.mrf.mxu2  ;;  %v4806_v29 = vpop.f32.mrf.mxu3 }
 0xcfc   : > { %v4820_v49 = vpop.f32.mrf.mxu0  ;;  %v4833_v12 = vpop.f32.mrf.mxu1 }
 0xcfd   : > { %v12603_v25 = vadd.f32 %v4820_v49, %v4713_v15  ;;  %v12605_v23 = vadd.f32 %v4833_v12, %v4726_v17 }
 0xd03   : > { %v4846_v56 = vpop.f32.mrf.mxu2  ;;  %v4859_v31 = vpop.f32.mrf.mxu3 }
 0xd04   : > { %v4847_v7 = vadd.f32 %v4846_v56, %v4739_v59  ;;  %v4860_v60 = vadd.f32 %v4859_v31, %v4752_v35  ;;  %v4822_v62 = vpop.f32.mrf.mxu0  ;;  %v4835_v0 = vpop.f32.mrf.mxu1 }
 0xd0b   : > { %v4848_v3 = vpop.f32.mrf.mxu2  ;;  %v4861_v6 = vpop.f32.mrf.mxu3 }
 0xd0c   : > { %v4872_v40 = vpop.f32.mrf.mxu0  ;;  %v4885_v2 = vpop.f32.mrf.mxu1 }
 0xd0d   : > { %v12607_v53 = vadd.f32 %v4872_v40, %v4765_v14  ;;  %v12609_v16 = vadd.f32 %v4885_v2, %v4778_v13 }
 0xd13   : > { %v4898_v46 = vpop.f32.mrf.mxu2  ;;  %v4911_v29 = vpop.f32.mrf.mxu3 }
 0xd14   : > { %v12611_v15 = vadd.f32 %v4898_v46, %v4791_v37  ;;  %v12613_v17 = vadd.f32 %v4911_v29, %v4804_v19  ;;  %v4874_v49 = vpop.f32.mrf.mxu0  ;;  %v4887_v12 = vpop.f32.mrf.mxu1 }
 0xd1b   : > { %v4900_v59 = vpop.f32.mrf.mxu2  ;;  %v4913_v35 = vpop.f32.mrf.mxu3 }
 0xd1c   : > { %v4932_v56 = vpop.f32.mrf.mxu0 }
 0xd1d   : > { %v4936_v31 = vsel %vm3063_vm2, %v4932_v56, -inf }
 0xd1e   : > { %4937 = vmax.xlane.f32.xlu2 %v4936_v31 }
 0xd24   : > { %v4934_v62 = vpop.f32.mrf.mxu0 }
 0xd91   : > { %v4938_v0 = vpop.xlane.xlu2 %4937 }
 0xd92   : > { %v4939_v14 = vsub.f32 %v4932_v56, %v4938_v0 }
 0xd94   : > { %v4940_v3 = vmul.f32 1.442695, %v4939_v14 }
 0xd96   : > { %10634 = vpow2.f32 %v4940_v3 }
 0xd9c   : > { %v10635_v2 = vpop.eup %10634 }
 0xd9d   : > { %v4942_v13 = vsel %vm3063_vm2, %v10635_v2, 0.0 }
 0xd9e   : > { %4943 = vadd.xlane.f32.xlu0 %v4942_v13 }
 0xe11   : > { %v4944_v37 = vpop.xlane.xlu0 %4943 }
 0xe12   : > { %10636 = vrcp.f32 %v4944_v37 }
 0xe18   : > { %v10637_v19 = vpop.eup %10636 }
 0xe19   : > { %v4946_v6 = vmul.f32 %v10637_v19, %v10635_v2 }
 0xe1b   : > { %v4947_v40 = vpack.c.bf16 %v4946_v6, %v4946_v6 }
 0xe1d   : > { %8937 = vmatmul.msk.bf16.vlgmr.msra.gmra.mxu1 %vm3076_vm3, %v4947_v40 }
 0xe1e   : > { %5067 = vmatpush.bf16.msra.mxu1 %v13605_v34 }
 0xe22   : > { %5068 = vmatpush.bf16.msra.mxu1 %v12073_v8 }
 0xe26   : > { %5069 = vmatpush.bf16.msra.mxu1 %v13606_v5 }
 0xe2a   : > { %5070 = vmatpush.bf16.msra.mxu1 %v12096_v50 }
 0xe9a   : > { %v4964_v46 = vpop.f32.mrf.mxu1 }
 0xe9b   : > { %v4968_v29 = vpack.c.bf16 %v4964_v46, %v4964_v46 }
 0xe9d   : > { %8938 = vmatmul.msk.bf16.vlgmr.msra.gmra.mxu2 %vm3043_vm0, %v4968_v29  ;;  %8939 = vmatmul.msk.bf16.vlgmr.msra.gmra.mxu3 %vm3043_vm0, %v4968_v29 }
 0xe9e   : > { %8940 = vmatmul.msk.bf16.vlgmr.msrb.gmra.mxu0 %vm3043_vm0, %v4968_v29  ;;  %8941 = vmatmul.msk.bf16.vlgmr.msrb.gmra.mxu1 %vm3043_vm0, %v4968_v29 }
 0xea2   : > { %v4966_v49 = vpop.f32.mrf.mxu1 }
 0xead   : > { %8942 = vmatmul.msk.bf16.vlgmr.msrb.gmra.mxu2 %vm3043_vm0, %v4968_v29  ;;  %8943 = vmatmul.msk.bf16.vlgmr.msrb.gmra.mxu3 %vm3043_vm0, %v4968_v29 }
 0xeae   : > { %8944 = vmatmul.msk.bf16.vlgmr.msra.gmra.mxu0 %vm3043_vm0, %v4968_v29  ;;  %8945 = vmatmul.msk.bf16.vlgmr.msra.gmra.mxu1 %vm3043_vm0, %v4968_v29 }
 0xf1b   : > { %v5007_v8 = vpop.f32.mrf.mxu0  ;;  %v5020_v50 = vpop.f32.mrf.mxu1 }
 0xf1c   : > { %v5078_v34 = vadd.f32 %v5007_v8, %v4847_v7  ;;  %v5079_v5 = vadd.f32 %v5020_v50, %v4860_v60 }
 0xf1e   : > { %v5094_v12 = vrot.slane %v5078_v34, 4  ;;  %v5095_v59 = vrot.slane %v5079_v5, 4 }
 0xf20   : > { %v5110_v35 = vadd.f32 %v12384_v55, %v5094_v12  ;;  %v5111_v56 = vadd.f32 %v12388_v28, %v5095_v59  ;;  %v4981_v31 = vpop.f32.mrf.mxu2  ;;  %v4994_v62 = vpop.f32.mrf.mxu3 }
 0xf21   : > { %v5076_v0 = vadd.f32 %v4981_v31, %v12603_v25  ;;  %v5077_v14 = vadd.f32 %v4994_v62, %v12605_v23 }
 0xf22   : > { %v12635_v3 = vadd.f32 %v5110_v35, %v12369_v10  ;;  %v12638_v2 = vadd.f32 %v5111_v56, %v12372_v24 }
 0xf23   : > { %v5092_v7 = vrot.slane %v5076_v0, 4  ;;  %v5093_v60 = vrot.slane %v5077_v14, 4  ;;  %v5009_v13 = vpop.f32.mrf.mxu0  ;;  %v5022_v37 = vpop.f32.mrf.mxu1 }
 0xf24   : > { %v5136_v55 = vsel %vm5133_vm5, %v12409_v43, %v12635_v3  ;;  %v5137_v28 = vsel %vm5133_vm5, %v12414_v21, %v12638_v2 }
 0xf25   : > { %5144 = vst [vmem:[#allocation2 + $0x18] sm:$0x3f] %v5136_v55  ;;  %v5108_v25 = vadd.f32 %v12344_v48, %v5092_v7  ;;  %v5109_v10 = vadd.f32 %v12348_v44, %v5093_v60 }
 0xf26   : > { %5145 = vst [vmem:[#allocation2 + $0x10] sm:$0x3f] %v5137_v28 }
 0xf27   : > { %v12649_v24 = vadd.f32 %v5108_v25, %v12339_v26  ;;  %v12652_v23 = vadd.f32 %v5109_v10, %v12342_v32 }
 0xf28   : > { %v4983_v19 = vpop.f32.mrf.mxu2  ;;  %v4996_v6 = vpop.f32.mrf.mxu3 }
 0xf29   : > { %v5134_v43 = vsel %vm5133_vm5, %v12377_v57, %v12649_v24  ;;  %v5135_v21 = vsel %vm5133_vm5, %v12382_v38, %v12652_v23 }
 0xf2a   : > { %5142 = vst [vmem:[#allocation2 + $0x30] sm:$0x3f] %v5134_v43 }
 0xf2b   : > { %5143 = vst [vmem:[#allocation2] sm:$0x3f] %v5135_v21  ;;  %v5059_v48 = vpop.f32.mrf.mxu0  ;;  %v5072_v44 = vpop.f32.mrf.mxu1 }
 0xf2c   : > { %v5082_v26 = vadd.f32 %v5059_v48, %v12611_v15  ;;  %v5083_v40 = vadd.f32 %v5072_v44, %v12613_v17 }
 0xf2e   : > { %v5098_v32 = vrot.slane %v5082_v26, 4  ;;  %v5099_v46 = vrot.slane %v5083_v40, 4 }
 0xf30   : > { %v5114_v29 = vadd.f32 %v12464_v9, %v5098_v32  ;;  %v5115_v49 = vadd.f32 %v12468_v22, %v5099_v46  ;;  %v5033_v8 = vpop.f32.mrf.mxu2  ;;  %v5046_v57 = vpop.f32.mrf.mxu3 }
 0xf31   : > { %v5080_v50 = vadd.f32 %v5033_v8, %v12607_v53  ;;  %v5081_v38 = vadd.f32 %v5046_v57, %v12609_v16 }
 0xf32   : > { %v12667_v34 = vadd.f32 %v5114_v29, %v12449_v39  ;;  %v12670_v5 = vadd.f32 %v5115_v49, %v12452_v45 }
 0xf33   : > { %v5096_v15 = vrot.slane %v5080_v50, 4  ;;  %v5097_v17 = vrot.slane %v5081_v38, 4  ;;  %v5061_v12 = vpop.f32.mrf.mxu0  ;;  %v5074_v59 = vpop.f32.mrf.mxu1 }
 0xf34   : > { %v5140_v9 = vsel %vm5133_vm5, %v12489_v27, %v12667_v34  ;;  %v5141_v22 = vsel %vm5133_vm5, %v12494_v54, %v12670_v5 }
 0xf35   : > { %5148 = vst [vmem:[#allocation2 + $0x28] sm:$0x3f] %v5140_v9  ;;  %v5112_v53 = vadd.f32 %v12424_v41, %v5096_v15  ;;  %v5113_v39 = vadd.f32 %v12428_v52, %v5097_v17 }
 0xf36   : > { %5149 = vst [vmem:[#allocation2 + $0x38] sm:$0x3f] %v5141_v22 }
 0xf37   : > { %v12681_v45 = vadd.f32 %v5112_v53, %v12419_v11  ;;  %v12684_v16 = vadd.f32 %v5113_v39, %v12422_v18  ;;  %5153 = sbr.rel (%p8946_p5) target bundleno = 4490 (0x118a), region = 56 }
 0xf38   : > { %v5035_v35 = vpop.f32.mrf.mxu2  ;;  %v5048_v56 = vpop.f32.mrf.mxu3 }
 0xf39   : > { %v5138_v27 = vsel %vm5133_vm5, %v12457_v58, %v12681_v45  ;;  %v5139_v54 = vsel %vm5133_vm5, %v12462_v63, %v12684_v16 }
 0xf3a   : > { %5146 = vst [vmem:[#allocation2 + $0x8] sm:$0x3f] %v5138_v27 }
 0xf3b   : > { %5147 = vst [vmem:[#allocation2 + $0x20] sm:$0x3f] %v5139_v54 }
 0xf3c   : > { %v10398_v11 = vld [vmem:[%s13334_s5 + $0x38] sm:$0xff]  ;;  %v10397_v58 = vld [vmem:[%s13334_s5 + $0x30] sm:$0xff]  ;;  %v10396_v0 = vld [vmem:[%s13334_s5 + $0x28] sm:$0xff]  ;;  %v5157_v12 = vpack.c.bf16 %v12395_v33, %v12395_v33  ;;  %v5155_v59 = vpack.c.bf16 %v12355_v30, %v12355_v30  ;;  %v5158_v9 = vpack.c.bf16 %v12398_v1, %v12398_v1  ;;  %v5156_v22 = vpack.c.bf16 %v12358_v36, %v12358_v36 }
 0xf3d   : > { %v10406_v18 = vld [vmem:[%s13334_s5 + $0x78] sm:$0xff]  ;;  %5675 = vmatpush.bf16.msra.mxu0 %v10398_v11  ;;  %v10405_v63 = vld [vmem:[%s13334_s5 + $0x70] sm:$0xff]  ;;  %v10404_v14 = vld [vmem:[%s13334_s5 + $0x68] sm:$0xff] }
 0xf3e   : > { %v10414_v41 = vld [vmem:[%s13334_s5 + $0xb8] sm:$0xff]  ;;  %5688 = vmatpush.bf16.msra.mxu1 %v10406_v18  ;;  %v10413_v31 = vld [vmem:[%s13334_s5 + $0xb0] sm:$0xff]  ;;  %v10412_v7 = vld [vmem:[%s13334_s5 + $0xa8] sm:$0xff] }
 0xf3f   : > { %v10422_v52 = vld [vmem:[%s13334_s5 + $0xf8] sm:$0xff]  ;;  %5701 = vmatpush.bf16.msra.mxu2 %v10414_v41  ;;  %v10421_v62 = vld [vmem:[%s13334_s5 + $0xf0] sm:$0xff]  ;;  %v10420_v60 = vld [vmem:[%s13334_s5 + $0xe8] sm:$0xff] }
 0xf40   : > { %5714 = vmatpush.bf16.msra.mxu3 %v10422_v52  ;;  %v10395_v13 = vld [vmem:[%s13334_s5 + $0x20] sm:$0xff]  ;;  %v10394_v25 = vld [vmem:[%s13334_s5 + $0x18] sm:$0xff]  ;;  %v10393_v43 = vld [vmem:[%s13334_s5 + $0x10] sm:$0xff] }
 0xf41   : > { %5676 = vmatpush.bf16.msra.mxu0 %v10397_v58  ;;  %v10403_v37 = vld [vmem:[%s13334_s5 + $0x60] sm:$0xff]  ;;  %v10402_v10 = vld [vmem:[%s13334_s5 + $0x58] sm:$0xff]  ;;  %v10401_v21 = vld [vmem:[%s13334_s5 + $0x50] sm:$0xff] }
 0xf42   : > { %5689 = vmatpush.bf16.msra.mxu1 %v10405_v63  ;;  %v10411_v55 = vld [vmem:[%s13334_s5 + $0xa0] sm:$0xff]  ;;  %v10410_v19 = vld [vmem:[%s13334_s5 + $0x98] sm:$0xff]  ;;  %v10409_v48 = vld [vmem:[%s13334_s5 + $0x90] sm:$0xff] }
 0xf43   : > { %5702 = vmatpush.bf16.msra.mxu2 %v10413_v31  ;;  %v10419_v28 = vld [vmem:[%s13334_s5 + $0xe0] sm:$0xff]  ;;  %v10418_v6 = vld [vmem:[%s13334_s5 + $0xd8] sm:$0xff]  ;;  %v10417_v44 = vld [vmem:[%s13334_s5 + $0xd0] sm:$0xff] }
 0xf44   : > { %5715 = vmatpush.bf16.msra.mxu3 %v10421_v62  ;;  %v10392_v26 = vld [vmem:[%s13334_s5 + $0x8] sm:$0xff]  ;;  %v10391_v29 = vld [vmem:[%s13334_s5] sm:$0xff]  ;;  %v10430_v50 = vld [vmem:[%s13334_s5 + $0x138] sm:$0xff] }
 0xf45   : > { %5677 = vmatpush.bf16.msra.mxu0 %v10396_v0  ;;  %v10400_v40 = vld [vmem:[%s13334_s5 + $0x48] sm:$0xff]  ;;  %v10399_v49 = vld [vmem:[%s13334_s5 + $0x40] sm:$0xff]  ;;  %v10438_v38 = vld [vmem:[%s13334_s5 + $0x178] sm:$0xff] }
 0xf46   : > { %5690 = vmatpush.bf16.msra.mxu1 %v10404_v14  ;;  %v10408_v32 = vld [vmem:[%s13334_s5 + $0x88] sm:$0xff]  ;;  %v10407_v8 = vld [vmem:[%s13334_s5 + $0x80] sm:$0xff]  ;;  %v10446_v15 = vld [vmem:[%s13334_s5 + $0x1b8] sm:$0xff] }
 0xf47   : > { %5703 = vmatpush.bf16.msra.mxu2 %v10412_v7  ;;  %v10416_v46 = vld [vmem:[%s13334_s5 + $0xc8] sm:$0xff]  ;;  %v10415_v57 = vld [vmem:[%s13334_s5 + $0xc0] sm:$0xff]  ;;  %v10454_v17 = vld [vmem:[%s13334_s5 + $0x1f8] sm:$0xff] }
 0xf48   : > { %5716 = vmatpush.bf16.msra.mxu3 %v10420_v60  ;;  %v10429_v53 = vld [vmem:[%s13334_s5 + $0x130] sm:$0xff]  ;;  %v10428_v1 = vld [vmem:[%s13334_s5 + $0x128] sm:$0xff]  ;;  %v10427_v27 = vld [vmem:[%s13334_s5 + $0x120] sm:$0xff] }
 0xf49   : > { %5678 = vmatpush.bf16.msra.mxu0 %v10395_v13  ;;  %v10437_v33 = vld [vmem:[%s13334_s5 + $0x170] sm:$0xff]  ;;  %v10436_v39 = vld [vmem:[%s13334_s5 + $0x168] sm:$0xff]  ;;  %v10435_v54 = vld [vmem:[%s13334_s5 + $0x160] sm:$0xff] }
 0xf4a   : > { %5691 = vmatpush.bf16.msra.mxu1 %v10403_v37  ;;  %v10445_v30 = vld [vmem:[%s13334_s5 + $0x1b0] sm:$0xff]  ;;  %v10444_v35 = vld [vmem:[%s13334_s5 + $0x1a8] sm:$0xff]  ;;  %v10443_v11 = vld [vmem:[%s13334_s5 + $0x1a0] sm:$0xff] }
 0xf4b   : > { %5704 = vmatpush.bf16.msra.mxu2 %v10411_v55  ;;  %v10453_v36 = vld [vmem:[%s13334_s5 + $0x1f0] sm:$0xff]  ;;  %v10452_v56 = vld [vmem:[%s13334_s5 + $0x1e8] sm:$0xff]  ;;  %v10451_v18 = vld [vmem:[%s13334_s5 + $0x1e0] sm:$0xff] }
 0xf4c   : > { %5717 = vmatpush.bf16.msra.mxu3 %v10419_v28  ;;  %v10426_v41 = vld [vmem:[%s13334_s5 + $0x118] sm:$0xff]  ;;  %v10425_v31 = vld [vmem:[%s13334_s5 + $0x110] sm:$0xff]  ;;  %v10424_v7 = vld [vmem:[%s13334_s5 + $0x108] sm:$0xff] }
 0xf4d   : > { %5679 = vmatpush.bf16.msra.mxu0 %v10394_v25  ;;  %v10434_v52 = vld [vmem:[%s13334_s5 + $0x158] sm:$0xff]  ;;  %v10433_v62 = vld [vmem:[%s13334_s5 + $0x150] sm:$0xff]  ;;  %v10432_v60 = vld [vmem:[%s13334_s5 + $0x148] sm:$0xff] }
 0xf4e   : > { %5692 = vmatpush.bf16.msra.mxu1 %v10402_v10  ;;  %v10442_v58 = vld [vmem:[%s13334_s5 + $0x198] sm:$0xff]  ;;  %v10441_v0 = vld [vmem:[%s13334_s5 + $0x190] sm:$0xff]  ;;  %v10440_v13 = vld [vmem:[%s13334_s5 + $0x188] sm:$0xff] }
 0xf4f   : > { %5705 = vmatpush.bf16.msra.mxu2 %v10410_v19  ;;  %v10450_v63 = vld [vmem:[%s13334_s5 + $0x1d8] sm:$0xff]  ;;  %v10449_v14 = vld [vmem:[%s13334_s5 + $0x1d0] sm:$0xff]  ;;  %v10448_v37 = vld [vmem:[%s13334_s5 + $0x1c8] sm:$0xff] }
 0xf50   : > { %5718 = vmatpush.bf16.msra.mxu3 %v10418_v6  ;;  %v10423_v55 = vld [vmem:[%s13334_s5 + $0x100] sm:$0xff]  ;;  %v10462_v19 = vld [vmem:[%s13334_s5 + $0x238] sm:$0xff] }
 0xf51   : > { %5680 = vmatpush.bf16.msra.mxu0 %v10393_v43  ;;  %v10431_v28 = vld [vmem:[%s13334_s5 + $0x140] sm:$0xff]  ;;  %v10470_v6 = vld [vmem:[%s13334_s5 + $0x278] sm:$0xff] }
 0xf52   : > { %5693 = vmatpush.bf16.msra.mxu1 %v10401_v21  ;;  %v10439_v25 = vld [vmem:[%s13334_s5 + $0x180] sm:$0xff]  ;;  %v10478_v43 = vld [vmem:[%s13334_s5 + $0x2b8] sm:$0xff] }
 0xf53   : > { %5706 = vmatpush.bf16.msra.mxu2 %v10409_v48  ;;  %v10447_v10 = vld [vmem:[%s13334_s5 + $0x1c0] sm:$0xff]  ;;  %v10486_v21 = vld [vmem:[%s13334_s5 + $0x2f8] sm:$0xff]  ;;  %v5161_v48 = vpack.c.bf16 %v12475_v42, %v12475_v42  ;;  %v10469_v42 = vld [vmem:[%s13334_s5 + $0x270] sm:$0xff] }
 0xf54   : > { %5719 = vmatpush.bf16.msra.mxu3 %v10417_v44  ;;  %v5159_v44 = vpack.c.bf16 %v12435_v47, %v12435_v47  ;;  %v10477_v47 = vld [vmem:[%s13334_s5 + $0x2b0] sm:$0xff] }
 0xf55   : > { %5681 = vmatpush.bf16.msra.mxu0 %v10392_v26  ;;  %v5162_v26 = vpack.c.bf16 %v12478_v20, %v12478_v20  ;;  %v10460_v20 = vld [vmem:[%s13334_s5 + $0x228] sm:$0xff] }
 0xf56   : > { %5694 = vmatpush.bf16.msra.mxu1 %v10400_v40  ;;  %v5160_v40 = vpack.c.bf16 %v12438_v61, %v12438_v61  ;;  %v10485_v61 = vld [vmem:[%s13334_s5 + $0x2f0] sm:$0xff] }
 0xf57   : > { %5707 = vmatpush.bf16.msra.mxu2 %v10408_v32  ;;  %v10461_v32 = vld [vmem:[%s13334_s5 + $0x230] sm:$0xff] }
 0xf58   : > { %5720 = vmatpush.bf16.msra.mxu3 %v10416_v46  ;;  %v10468_v46 = vld [vmem:[%s13334_s5 + $0x268] sm:$0xff] }
 0xf59   : > { %5682 = vmatpush.bf16.msra.mxu0 %v10391_v29  ;;  %v10476_v29 = vld [vmem:[%s13334_s5 + $0x2a8] sm:$0xff] }
 0xf5a   : > { %5695 = vmatpush.bf16.msra.mxu1 %v10399_v49  ;;  %v10484_v49 = vld [vmem:[%s13334_s5 + $0x2e8] sm:$0xff] }
 0xf5b   : > { %5708 = vmatpush.bf16.msra.mxu2 %v10407_v8  ;;  %v10459_v8 = vld [vmem:[%s13334_s5 + $0x220] sm:$0xff] }
 0xf5c   : > { %5721 = vmatpush.bf16.msra.mxu3 %v10415_v57  ;;  %5683 = vmatmul.bf16.vlgmr.msra.gmra.mxu0 %v5155_v59  ;;  %v10467_v57 = vld [vmem:[%s13334_s5 + $0x260] sm:$0xff]  ;;  %v10482_v59 = vld [vmem:[%s13334_s5 + $0x2d8] sm:$0xff] }
 0xf5d   : > { %5727 = vmatpush.bf16.msrb.mxu0 %v10430_v50  ;;  %5696 = vmatmul.bf16.vlgmr.msra.gmra.mxu1 %v5156_v22  ;;  %v10475_v50 = vld [vmem:[%s13334_s5 + $0x2a0] sm:$0xff]  ;;  %v10465_v22 = vld [vmem:[%s13334_s5 + $0x250] sm:$0xff] }
 0xf5e   : > { %5740 = vmatpush.bf16.msrb.mxu1 %v10438_v38  ;;  %5709 = vmatmul.bf16.vlgmr.msra.gmra.mxu2 %v5157_v12  ;;  %v10483_v38 = vld [vmem:[%s13334_s5 + $0x2e0] sm:$0xff]  ;;  %v10474_v12 = vld [vmem:[%s13334_s5 + $0x298] sm:$0xff] }
 0xf5f   : > { %5753 = vmatpush.bf16.msrb.mxu2 %v10446_v15  ;;  %5722 = vmatmul.bf16.vlgmr.msra.gmra.mxu3 %v5158_v9  ;;  %v10458_v15 = vld [vmem:[%s13334_s5 + $0x218] sm:$0xff]  ;;  %v10457_v9 = vld [vmem:[%s13334_s5 + $0x210] sm:$0xff] }
 0xf60   : > { %5766 = vmatpush.bf16.msrb.mxu3 %v10454_v17  ;;  %v10466_v17 = vld [vmem:[%s13334_s5 + $0x258] sm:$0xff] }
 0xf61   : > { %5728 = vmatpush.bf16.msrb.mxu0 %v10429_v53  ;;  %v10473_v53 = vld [vmem:[%s13334_s5 + $0x290] sm:$0xff] }
 0xf62   : > { %5741 = vmatpush.bf16.msrb.mxu1 %v10437_v33  ;;  %v10481_v33 = vld [vmem:[%s13334_s5 + $0x2d0] sm:$0xff] }
 0xf63   : > { %5754 = vmatpush.bf16.msrb.mxu2 %v10445_v30  ;;  %v10456_v30 = vld [vmem:[%s13334_s5 + $0x208] sm:$0xff] }
 0xf64   : > { %5767 = vmatpush.bf16.msrb.mxu3 %v10453_v36  ;;  %v10464_v36 = vld [vmem:[%s13334_s5 + $0x248] sm:$0xff] }
 0xf65   : > { %5729 = vmatpush.bf16.msrb.mxu0 %v10428_v1  ;;  %v10472_v1 = vld [vmem:[%s13334_s5 + $0x288] sm:$0xff] }
 0xf66   : > { %5742 = vmatpush.bf16.msrb.mxu1 %v10436_v39  ;;  %v10480_v39 = vld [vmem:[%s13334_s5 + $0x2c8] sm:$0xff] }
 0xf67   : > { %5755 = vmatpush.bf16.msrb.mxu2 %v10444_v35  ;;  %v10455_v35 = vld [vmem:[%s13334_s5 + $0x200] sm:$0xff] }
 0xf68   : > { %5768 = vmatpush.bf16.msrb.mxu3 %v10452_v56  ;;  %v10463_v56 = vld [vmem:[%s13334_s5 + $0x240] sm:$0xff] }
 0xf69   : > { %5730 = vmatpush.bf16.msrb.mxu0 %v10427_v27  ;;  %v5785_v27 = vpack.c.bf16 %v12401_v4, %v12401_v4  ;;  %v10502_v4 = vld [vmem:[%s13334_s5 + $0x378] sm:$0xff] }
 0xf6a   : > { %5743 = vmatpush.bf16.msrb.mxu1 %v10435_v54  ;;  %v5783_v54 = vpack.c.bf16 %v12361_v51, %v12361_v51  ;;  %v10494_v51 = vld [vmem:[%s13334_s5 + $0x338] sm:$0xff] }
 0xf6b   : > { %5756 = vmatpush.bf16.msrb.mxu2 %v10443_v11  ;;  %v10471_v11 = vld [vmem:[%s13334_s5 + $0x280] sm:$0xff] }
 0xf6c   : > { %5769 = vmatpush.bf16.msrb.mxu3 %v10451_v18  ;;  %v10479_v18 = vld [vmem:[%s13334_s5 + $0x2c0] sm:$0xff] }
 0xf6d   : > { %5731 = vmatpush.bf16.msrb.mxu0 %v10426_v41  ;;  %v13682_v41 = vld [vmem:[#allocation12_spill] sm:$0xff] }
 0xf6e   : > { %5744 = vmatpush.bf16.msrb.mxu1 %v10434_v52  ;;  %v5786_v52 = vpack.c.bf16 %v13682_v41, %v13682_v41  ;;  %v10525_v41 = vld [vmem:[%s13334_s5 + $0x430] sm:$0xff] }
 0xf6f   : > { %5757 = vmatpush.bf16.msrb.mxu2 %v10442_v58  ;;  %v13683_v58 = vld [vmem:[#allocation11_spill] sm:$0xff] }
 0xf70   : > { %5770 = vmatpush.bf16.msrb.mxu3 %v10450_v63  ;;  %v5784_v63 = vpack.c.bf16 %v13683_v58, %v13683_v58  ;;  %v10541_v58 = vld [vmem:[%s13334_s5 + $0x4b0] sm:$0xff] }
 0xf71   : > { %5732 = vmatpush.bf16.msrb.mxu0 %v10425_v31  ;;  %v10510_v31 = vld [vmem:[%s13334_s5 + $0x3b8] sm:$0xff] }
 0xf72   : > { %5745 = vmatpush.bf16.msrb.mxu1 %v10433_v62  ;;  %v10518_v62 = vld [vmem:[%s13334_s5 + $0x3f8] sm:$0xff] }
 0xf73   : > { %5758 = vmatpush.bf16.msrb.mxu2 %v10441_v0  ;;  %v5930_v0 = vrot.slane %v5785_v27, 1 }
 0xf74   : > { %5771 = vmatpush.bf16.msrb.mxu3 %v10449_v14  ;;  %v5928_v14 = vrot.slane %v5783_v54, 1 }
 0xf75   : > { %5733 = vmatpush.bf16.msrb.mxu0 %v10424_v7  ;;  %v5931_v7 = vrot.slane %v5786_v52, 1  ;;  %v10533_v52 = vld [vmem:[%s13334_s5 + $0x470] sm:$0xff] }
 0xf76   : > { %5746 = vmatpush.bf16.msrb.mxu1 %v10432_v60  ;;  %v5929_v60 = vrot.slane %v5784_v63, 1  ;;  %v10549_v63 = vld [vmem:[%s13334_s5 + $0x4f0] sm:$0xff] }
 0xf77   : > { %5759 = vmatpush.bf16.msrb.mxu2 %v10440_v13  ;;  %v10493_v13 = vld [vmem:[%s13334_s5 + $0x330] sm:$0xff] }
 0xf78   : > { %5772 = vmatpush.bf16.msrb.mxu3 %v10448_v37  ;;  %v10501_v37 = vld [vmem:[%s13334_s5 + $0x370] sm:$0xff] }
 0xf79   : > { %5734 = vmatpush.bf16.msrb.mxu0 %v10423_v55  ;;  %v10509_v55 = vld [vmem:[%s13334_s5 + $0x3b0] sm:$0xff] }
 0xf7a   : > { %5747 = vmatpush.bf16.msrb.mxu1 %v10431_v28  ;;  %v10517_v28 = vld [vmem:[%s13334_s5 + $0x3f0] sm:$0xff] }
 0xf7b   : > { %5760 = vmatpush.bf16.msrb.mxu2 %v10439_v25  ;;  %v10492_v25 = vld [vmem:[%s13334_s5 + $0x328] sm:$0xff] }
 0xf7c   : > { %5773 = vmatpush.bf16.msrb.mxu3 %v10447_v10  ;;  %5735 = vmatmul.bf16.vlgmr.msrb.gmra.mxu0 %v5159_v44  ;;  %v10500_v10 = vld [vmem:[%s13334_s5 + $0x368] sm:$0xff]  ;;  %v10515_v44 = vld [vmem:[%s13334_s5 + $0x3e0] sm:$0xff] }
 0xf7d   : > { %6328 = vmatpush.bf16.msra.mxu0 %v10462_v19  ;;  %5748 = vmatmul.bf16.vlgmr.msrb.gmra.mxu1 %v5160_v40  ;;  %v10508_v19 = vld [vmem:[%s13334_s5 + $0x3a8] sm:$0xff]  ;;  %v10498_v40 = vld [vmem:[%s13334_s5 + $0x358] sm:$0xff] }
 0xf7e   : > { %6341 = vmatpush.bf16.msra.mxu1 %v10470_v6  ;;  %5761 = vmatmul.bf16.vlgmr.msrb.gmra.mxu2 %v5161_v48  ;;  %v10516_v6 = vld [vmem:[%s13334_s5 + $0x3e8] sm:$0xff]  ;;  %v10507_v48 = vld [vmem:[%s13334_s5 + $0x3a0] sm:$0xff] }
 0xf7f   : > { %6354 = vmatpush.bf16.msra.mxu2 %v10478_v43  ;;  %5774 = vmatmul.bf16.vlgmr.msrb.gmra.mxu3 %v5162_v26  ;;  %v10491_v43 = vld [vmem:[%s13334_s5 + $0x320] sm:$0xff]  ;;  %v10490_v26 = vld [vmem:[%s13334_s5 + $0x318] sm:$0xff] }
 0xf80   : > { %6367 = vmatpush.bf16.msra.mxu3 %v10486_v21  ;;  %v10499_v21 = vld [vmem:[%s13334_s5 + $0x360] sm:$0xff] }
 0xf81   : > { %6329 = vmatpush.bf16.msra.mxu0 %v10461_v32  ;;  %v10506_v32 = vld [vmem:[%s13334_s5 + $0x398] sm:$0xff] }
 0xf82   : > { %6342 = vmatpush.bf16.msra.mxu1 %v10469_v42  ;;  %v10514_v42 = vld [vmem:[%s13334_s5 + $0x3d8] sm:$0xff] }
 0xf83   : > { %6355 = vmatpush.bf16.msra.mxu2 %v10477_v47  ;;  %v10489_v47 = vld [vmem:[%s13334_s5 + $0x310] sm:$0xff] }
 0xf84   : > { %6368 = vmatpush.bf16.msra.mxu3 %v10485_v61  ;;  %v10497_v61 = vld [vmem:[%s13334_s5 + $0x350] sm:$0xff] }
 0xf85   : > { %6330 = vmatpush.bf16.msra.mxu0 %v10460_v20  ;;  %v10505_v20 = vld [vmem:[%s13334_s5 + $0x390] sm:$0xff] }
 0xf86   : > { %6343 = vmatpush.bf16.msra.mxu1 %v10468_v46  ;;  %v10513_v46 = vld [vmem:[%s13334_s5 + $0x3d0] sm:$0xff] }
 0xf87   : > { %6356 = vmatpush.bf16.msra.mxu2 %v10476_v29  ;;  %v10488_v29 = vld [vmem:[%s13334_s5 + $0x308] sm:$0xff] }
 0xf88   : > { %6369 = vmatpush.bf16.msra.mxu3 %v10484_v49  ;;  %v10496_v49 = vld [vmem:[%s13334_s5 + $0x348] sm:$0xff] }
 0xf89   : > { %6331 = vmatpush.bf16.msra.mxu0 %v10459_v8  ;;  %v10504_v8 = vld [vmem:[%s13334_s5 + $0x388] sm:$0xff] }
 0xf8a   : > { %6344 = vmatpush.bf16.msra.mxu1 %v10467_v57  ;;  %v10512_v57 = vld [vmem:[%s13334_s5 + $0x3c8] sm:$0xff] }
 0xf8b   : > { %6357 = vmatpush.bf16.msra.mxu2 %v10475_v50  ;;  %v10487_v50 = vld [vmem:[%s13334_s5 + $0x300] sm:$0xff] }
 0xf8c   : > { %6370 = vmatpush.bf16.msra.mxu3 %v10483_v38  ;;  %v10495_v38 = vld [vmem:[%s13334_s5 + $0x340] sm:$0xff] }
 0xf8d   : > { %6332 = vmatpush.bf16.msra.mxu0 %v10458_v15  ;;  %v13684_v15 = vld [vmem:[#allocation72_spill] sm:$0xff] }
 0xf8e   : > { %6345 = vmatpush.bf16.msra.mxu1 %v10466_v17  ;;  %v5789_v17 = vpack.c.bf16 %v13684_v15, %v13684_v15  ;;  %v10573_v15 = vld [vmem:[%s13334_s5 + $0x5b0] sm:$0xff] }
 0xf8f   : > { %6358 = vmatpush.bf16.msra.mxu2 %v10474_v12  ;;  %v13685_v12 = vld [vmem:[#allocation37_spill] sm:$0xff] }
 0xf90   : > { %6371 = vmatpush.bf16.msra.mxu3 %v10482_v59  ;;  %v5787_v59 = vpack.c.bf16 %v13685_v12, %v13685_v12  ;;  %v5934_v27 = vrot.slane %v5789_v17, 1  ;;  %v10581_v17 = vld [vmem:[%s13334_s5 + $0x5f0] sm:$0xff]  ;;  %v10556_v12 = vld [vmem:[%s13334_s5 + $0x528] sm:$0xff] }
 0xf91   : > { %6333 = vmatpush.bf16.msra.mxu0 %v10457_v9  ;;  %v10503_v9 = vld [vmem:[%s13334_s5 + $0x380] sm:$0xff] }
 0xf92   : > { %6346 = vmatpush.bf16.msra.mxu1 %v10465_v22  ;;  %v10511_v22 = vld [vmem:[%s13334_s5 + $0x3c0] sm:$0xff]  ;;  %v5932_v54 = vrot.slane %v5787_v59, 1  ;;  %v10564_v59 = vld [vmem:[%s13334_s5 + $0x568] sm:$0xff] }
 0xf93   : > { %6359 = vmatpush.bf16.msra.mxu2 %v10473_v53  ;;  %v13686_v53 = vld [vmem:[#allocation73_spill] sm:$0xff] }
 0xf94   : > { %6372 = vmatpush.bf16.msra.mxu3 %v10481_v33  ;;  %v5790_v33 = vpack.c.bf16 %v13686_v53, %v13686_v53 }
 0xf95   : > { %6334 = vmatpush.bf16.msra.mxu0 %v10456_v30  ;;  %v13687_v30 = vld [vmem:[#allocation38_spill] sm:$0xff] }
 0xf96   : > { %6347 = vmatpush.bf16.msra.mxu1 %v10464_v36  ;;  %v5788_v36 = vpack.c.bf16 %v13687_v30, %v13687_v30  ;;  %v10563_v30 = vld [vmem:[%s13334_s5 + $0x560] sm:$0xff] }
 0xf97   : > { %6360 = vmatpush.bf16.msra.mxu2 %v10472_v1  ;;  %v10526_v1 = vld [vmem:[%s13334_s5 + $0x438] sm:$0xff] }
 0xf98   : > { %6373 = vmatpush.bf16.msra.mxu3 %v10480_v39  ;;  %v10534_v39 = vld [vmem:[%s13334_s5 + $0x478] sm:$0xff] }
 0xf99   : > { %6335 = vmatpush.bf16.msra.mxu0 %v10455_v35  ;;  %v10542_v35 = vld [vmem:[%s13334_s5 + $0x4b8] sm:$0xff] }
 0xf9a   : > { %6348 = vmatpush.bf16.msra.mxu1 %v10463_v56  ;;  %v10550_v56 = vld [vmem:[%s13334_s5 + $0x4f8] sm:$0xff] }
 0xf9b   : > { %6361 = vmatpush.bf16.msra.mxu2 %v10471_v11  ;;  %v5935_v11 = vrot.slane %v5790_v33, 1  ;;  %v10555_v33 = vld [vmem:[%s13334_s5 + $0x520] sm:$0xff] }
 0xf9c   : > { %6374 = vmatpush.bf16.msra.mxu3 %v10479_v18  ;;  %6336 = vmatmul.bf16.vlgmr.msra.gmra.mxu0 %v5928_v14  ;;  %v5933_v18 = vrot.slane %v5788_v36, 1  ;;  %v10531_v14 = vld [vmem:[%s13334_s5 + $0x460] sm:$0xff] }
 0xf9d   : > { %6380 = vmatpush.bf16.msrb.mxu0 %v10494_v51  ;;  %6349 = vmatmul.bf16.vlgmr.msra.gmra.mxu1 %v5929_v60  ;;  %v10524_v51 = vld [vmem:[%s13334_s5 + $0x428] sm:$0xff]  ;;  %v10547_v60 = vld [vmem:[%s13334_s5 + $0x4e0] sm:$0xff] }
 0xf9e   : > { %6393 = vmatpush.bf16.msrb.mxu1 %v10502_v4  ;;  %6362 = vmatmul.bf16.vlgmr.msra.gmra.mxu2 %v5930_v0  ;;  %v10532_v4 = vld [vmem:[%s13334_s5 + $0x468] sm:$0xff]  ;;  %v10523_v0 = vld [vmem:[%s13334_s5 + $0x420] sm:$0xff] }
 0xf9f   : > { %6406 = vmatpush.bf16.msrb.mxu2 %v10510_v31  ;;  %6375 = vmatmul.bf16.vlgmr.msra.gmra.mxu3 %v5931_v7  ;;  %v10540_v31 = vld [vmem:[%s13334_s5 + $0x4a8] sm:$0xff]  ;;  %v10539_v7 = vld [vmem:[%s13334_s5 + $0x4a0] sm:$0xff] }
 0xfa0   : > { %6419 = vmatpush.bf16.msrb.mxu3 %v10518_v62  ;;  %v10548_v62 = vld [vmem:[%s13334_s5 + $0x4e8] sm:$0xff] }
 0xfa1   : > { %6381 = vmatpush.bf16.msrb.mxu0 %v10493_v13  ;;  %v10522_v13 = vld [vmem:[%s13334_s5 + $0x418] sm:$0xff] }
 0xfa2   : > { %6394 = vmatpush.bf16.msrb.mxu1 %v10501_v37  ;;  %v10530_v37 = vld [vmem:[%s13334_s5 + $0x458] sm:$0xff] }
 0xfa3   : > { %6407 = vmatpush.bf16.msrb.mxu2 %v10509_v55  ;;  %v10538_v55 = vld [vmem:[%s13334_s5 + $0x498] sm:$0xff] }
 0xfa4   : > { %6420 = vmatpush.bf16.msrb.mxu3 %v10517_v28  ;;  %v10546_v28 = vld [vmem:[%s13334_s5 + $0x4d8] sm:$0xff] }
 0xfa5   : > { %6382 = vmatpush.bf16.msrb.mxu0 %v10492_v25  ;;  %v10521_v25 = vld [vmem:[%s13334_s5 + $0x410] sm:$0xff] }
 0xfa6   : > { %6395 = vmatpush.bf16.msrb.mxu1 %v10500_v10  ;;  %v10529_v10 = vld [vmem:[%s13334_s5 + $0x450] sm:$0xff] }
 0xfa7   : > { %6408 = vmatpush.bf16.msrb.mxu2 %v10508_v19  ;;  %v10537_v19 = vld [vmem:[%s13334_s5 + $0x490] sm:$0xff] }
 0xfa8   : > { %6421 = vmatpush.bf16.msrb.mxu3 %v10516_v6  ;;  %v10545_v6 = vld [vmem:[%s13334_s5 + $0x4d0] sm:$0xff] }
 0xfa9   : > { %6383 = vmatpush.bf16.msrb.mxu0 %v10491_v43  ;;  %v10520_v43 = vld [vmem:[%s13334_s5 + $0x408] sm:$0xff] }
 0xfaa   : > { %6396 = vmatpush.bf16.msrb.mxu1 %v10499_v21  ;;  %v10528_v21 = vld [vmem:[%s13334_s5 + $0x448] sm:$0xff] }
 0xfab   : > { %6409 = vmatpush.bf16.msrb.mxu2 %v10507_v48  ;;  %v10536_v48 = vld [vmem:[%s13334_s5 + $0x488] sm:$0xff] }
 0xfac   : > { %6422 = vmatpush.bf16.msrb.mxu3 %v10515_v44  ;;  %v10544_v44 = vld [vmem:[%s13334_s5 + $0x4c8] sm:$0xff] }
 0xfad   : > { %6384 = vmatpush.bf16.msrb.mxu0 %v10490_v26  ;;  %v10519_v26 = vld [vmem:[%s13334_s5 + $0x400] sm:$0xff] }
 0xfae   : > { %6397 = vmatpush.bf16.msrb.mxu1 %v10498_v40  ;;  %v10527_v40 = vld [vmem:[%s13334_s5 + $0x440] sm:$0xff] }
 0xfaf   : > { %6410 = vmatpush.bf16.msrb.mxu2 %v10506_v32  ;;  %v6435_v32 = vpack.c.bf16 %v12635_v3, %v12635_v3  ;;  %v10558_v3 = vld [vmem:[%s13334_s5 + $0x538] sm:$0xff] }
 0xfb0   : > { %6423 = vmatpush.bf16.msrb.mxu3 %v10514_v42  ;;  %v6433_v42 = vpack.c.bf16 %v12649_v24, %v12649_v24  ;;  %v10566_v24 = vld [vmem:[%s13334_s5 + $0x578] sm:$0xff] }
 0xfb1   : > { %6385 = vmatpush.bf16.msrb.mxu0 %v10489_v47  ;;  %v10535_v47 = vld [vmem:[%s13334_s5 + $0x480] sm:$0xff] }
 0xfb2   : > { %6398 = vmatpush.bf16.msrb.mxu1 %v10497_v61  ;;  %v10543_v61 = vld [vmem:[%s13334_s5 + $0x4c0] sm:$0xff] }
 0xfb3   : > { %6411 = vmatpush.bf16.msrb.mxu2 %v10505_v20  ;;  %v6436_v20 = vpack.c.bf16 %v12638_v2, %v12638_v2  ;;  %v6580_v2 = vrot.slane %v6435_v32, 2 }
 0xfb4   : > { %6424 = vmatpush.bf16.msrb.mxu3 %v10513_v46  ;;  %v6434_v46 = vpack.c.bf16 %v12652_v23, %v12652_v23  ;;  %v6578_v23 = vrot.slane %v6433_v42, 2 }
 0xfb5   : > { %6386 = vmatpush.bf16.msrb.mxu0 %v10488_v29  ;;  %v10574_v29 = vld [vmem:[%s13334_s5 + $0x5b8] sm:$0xff] }
 0xfb6   : > { %6399 = vmatpush.bf16.msrb.mxu1 %v10496_v49  ;;  %v10582_v49 = vld [vmem:[%s13334_s5 + $0x5f8] sm:$0xff] }
 0xfb7   : > { %6412 = vmatpush.bf16.msrb.mxu2 %v10504_v8  ;;  %v6581_v8 = vrot.slane %v6436_v20, 2 }
 0xfb8   : > { %6425 = vmatpush.bf16.msrb.mxu3 %v10512_v57  ;;  %v6579_v57 = vrot.slane %v6434_v46, 2 }
 0xfb9   : > { %6387 = vmatpush.bf16.msrb.mxu0 %v10487_v50  ;;  %v10557_v50 = vld [vmem:[%s13334_s5 + $0x530] sm:$0xff] }
 0xfba   : > { %6400 = vmatpush.bf16.msrb.mxu1 %v10495_v38  ;;  %v10565_v38 = vld [vmem:[%s13334_s5 + $0x570] sm:$0xff] }
 0xfbb   : > { %6413 = vmatpush.bf16.msrb.mxu2 %v10503_v9  ;;  %v10572_v9 = vld [vmem:[%s13334_s5 + $0x5a8] sm:$0xff] }
 0xfbc   : > { %6426 = vmatpush.bf16.msrb.mxu3 %v10511_v22  ;;  %6388 = vmatmul.bf16.vlgmr.msrb.gmra.mxu0 %v5932_v54  ;;  %v10580_v22 = vld [vmem:[%s13334_s5 + $0x5e8] sm:$0xff]  ;;  %v10570_v54 = vld [vmem:[%s13334_s5 + $0x598] sm:$0xff] }
 0xfbd   : > { %6978 = vmatpush.bf16.msra.mxu0 %v10526_v1  ;;  %6401 = vmatmul.bf16.vlgmr.msrb.gmra.mxu1 %v5933_v18  ;;  %v10571_v1 = vld [vmem:[%s13334_s5 + $0x5a0] sm:$0xff] }
 0xfbe   : > { %6991 = vmatpush.bf16.msra.mxu1 %v10534_v39  ;;  %6414 = vmatmul.bf16.vlgmr.msrb.gmra.mxu2 %v5934_v27  ;;  %v10579_v39 = vld [vmem:[%s13334_s5 + $0x5e0] sm:$0xff]  ;;  %v10562_v27 = vld [vmem:[%s13334_s5 + $0x558] sm:$0xff] }
 0xfbf   : > { %7004 = vmatpush.bf16.msra.mxu2 %v10542_v35  ;;  %6427 = vmatmul.bf16.vlgmr.msrb.gmra.mxu3 %v5935_v11  ;;  %v10578_v11 = vld [vmem:[%s13334_s5 + $0x5d8] sm:$0xff] }
 0xfc0   : > { %7017 = vmatpush.bf16.msra.mxu3 %v10550_v56  ;;  %v10554_v56 = vld [vmem:[%s13334_s5 + $0x518] sm:$0xff] }
 0xfc1   : > { %6979 = vmatpush.bf16.msra.mxu0 %v10525_v41 }
 0xfc2   : > { %6992 = vmatpush.bf16.msra.mxu1 %v10533_v52 }
 0xfc3   : > { %7005 = vmatpush.bf16.msra.mxu2 %v10541_v58 }
 0xfc4   : > { %7018 = vmatpush.bf16.msra.mxu3 %v10549_v63  ;;  %v10553_v63 = vld [vmem:[%s13334_s5 + $0x510] sm:$0xff] }
 0xfc5   : > { %6980 = vmatpush.bf16.msra.mxu0 %v10524_v51  ;;  %v10561_v51 = vld [vmem:[%s13334_s5 + $0x550] sm:$0xff] }
 0xfc6   : > { %6993 = vmatpush.bf16.msra.mxu1 %v10532_v4 }
 0xfc7   : > { %7006 = vmatpush.bf16.msra.mxu2 %v10540_v31 }
 0xfc8   : > { %7019 = vmatpush.bf16.msra.mxu3 %v10548_v62  ;;  %v10569_v62 = vld [vmem:[%s13334_s5 + $0x590] sm:$0xff] }
 0xfc9   : > { %6981 = vmatpush.bf16.msra.mxu0 %v10523_v0  ;;  %v10577_v0 = vld [vmem:[%s13334_s5 + $0x5d0] sm:$0xff] }
 0xfca   : > { %6994 = vmatpush.bf16.msra.mxu1 %v10531_v14  ;;  %v10552_v14 = vld [vmem:[%s13334_s5 + $0x508] sm:$0xff] }
 0xfcb   : > { %7007 = vmatpush.bf16.msra.mxu2 %v10539_v7  ;;  %v10560_v7 = vld [vmem:[%s13334_s5 + $0x548] sm:$0xff] }
 0xfcc   : > { %7020 = vmatpush.bf16.msra.mxu3 %v10547_v60  ;;  %v10568_v60 = vld [vmem:[%s13334_s5 + $0x588] sm:$0xff] }
 0xfcd   : > { %6982 = vmatpush.bf16.msra.mxu0 %v10522_v13  ;;  %v10576_v13 = vld [vmem:[%s13334_s5 + $0x5c8] sm:$0xff] }
 0xfce   : > { %6995 = vmatpush.bf16.msra.mxu1 %v10530_v37 }
 0xfcf   : > { %7008 = vmatpush.bf16.msra.mxu2 %v10538_v55 }
 0xfd0   : > { %7021 = vmatpush.bf16.msra.mxu3 %v10546_v28  ;;  %v6437_v28 = vpack.c.bf16 %v12681_v45, %v12681_v45  ;;  %v10567_v45 = vld [vmem:[%s13334_s5 + $0x580] sm:$0xff] }
 0xfd1   : > { %6983 = vmatpush.bf16.msra.mxu0 %v10521_v25  ;;  %v6438_v25 = vpack.c.bf16 %v12684_v16, %v12684_v16  ;;  %v10575_v16 = vld [vmem:[%s13334_s5 + $0x5c0] sm:$0xff] }
 0xfd2   : > { %6996 = vmatpush.bf16.msra.mxu1 %v10529_v10  ;;  %v10551_v10 = vld [vmem:[%s13334_s5 + $0x500] sm:$0xff] }
 0xfd3   : > { %7009 = vmatpush.bf16.msra.mxu2 %v10537_v19  ;;  %v10559_v19 = vld [vmem:[%s13334_s5 + $0x540] sm:$0xff] }
 0xfd4   : > { %7022 = vmatpush.bf16.msra.mxu3 %v10545_v6  ;;  %v6439_v6 = vpack.c.bf16 %v12667_v34, %v12667_v34 }
 0xfd5   : > { %6984 = vmatpush.bf16.msra.mxu0 %v10520_v43  ;;  %v6440_v43 = vpack.c.bf16 %v12670_v5, %v12670_v5 }
 0xfd6   : > { %6997 = vmatpush.bf16.msra.mxu1 %v10528_v21  ;;  %v6582_v21 = vrot.slane %v6437_v28, 2  ;;  %v7083_v28 = vlaneseq }
 0xfd7   : > { %7010 = vmatpush.bf16.msra.mxu2 %v10536_v48  ;;  %v6583_v48 = vrot.slane %v6438_v25, 2 }
 0xfd8   : > { %7023 = vmatpush.bf16.msra.mxu3 %v10544_v44  ;;  %v6584_v44 = vrot.slane %v6439_v6, 2  ;;  %v7084_v6 = vand.u32 127, %v7083_v28 }
 0xfd9   : > { %6985 = vmatpush.bf16.msra.mxu0 %v10519_v26  ;;  %v5684_v53 = vpop.f32.mrf.mxu0  ;;  %v6585_v26 = vrot.slane %v6440_v43, 2 }
 0xfda   : > { %6998 = vmatpush.bf16.msra.mxu1 %v10527_v40  ;;  %v5697_v36 = vpop.f32.mrf.mxu1  ;;  %vm7085_vm6 = vcmp.lt.s32.totalorder %v7084_v6, 10 }
 0xfdb   : > { %7011 = vmatpush.bf16.msra.mxu2 %v10535_v47  ;;  %v5698_v35 = vadd.f32 %v5697_v36, %v5684_v53 }
 0xfdc   : > { %7024 = vmatpush.bf16.msra.mxu3 %v10543_v61  ;;  %6986 = vmatmul.bf16.vlgmr.msra.gmra.mxu0 %v6578_v23 }
 0xfdd   : > { %7030 = vmatpush.bf16.msrb.mxu0 %v10558_v3  ;;  %6999 = vmatmul.bf16.vlgmr.msra.gmra.mxu1 %v6579_v57 }
 0xfde   : > { %7043 = vmatpush.bf16.msrb.mxu1 %v10566_v24  ;;  %7012 = vmatmul.bf16.vlgmr.msra.gmra.mxu2 %v6580_v2 }
 0xfdf   : > { %7056 = vmatpush.bf16.msrb.mxu2 %v10574_v29  ;;  %7025 = vmatmul.bf16.vlgmr.msra.gmra.mxu3 %v6581_v8 }
 0xfe0   : > { %7069 = vmatpush.bf16.msrb.mxu3 %v10582_v49 }
 0xfe1   : > { %7031 = vmatpush.bf16.msrb.mxu0 %v10557_v50  ;;  %v5710_v18 = vpop.f32.mrf.mxu2  ;;  %v5686_v58 = vpop.f32.mrf.mxu0 }
 0xfe2   : > { %7044 = vmatpush.bf16.msrb.mxu1 %v10565_v38  ;;  %v5711_v41 = vadd.f32 %v5710_v18, %v5698_v35  ;;  %v5723_v52 = vpop.f32.mrf.mxu3  ;;  %v5699_v31 = vpop.f32.mrf.mxu1 }
 0xfe3   : > { %7057 = vmatpush.bf16.msrb.mxu2 %v10573_v15 }
 0xfe4   : > { %7070 = vmatpush.bf16.msrb.mxu3 %v10581_v17  ;;  %v5724_v4 = vadd.f32 %v5723_v52, %v5711_v41 }
 0xfe5   : > { %7032 = vmatpush.bf16.msrb.mxu0 %v10556_v12 }
 0xfe6   : > { %7045 = vmatpush.bf16.msrb.mxu1 %v10564_v59 }
 0xfe7   : > { %7058 = vmatpush.bf16.msrb.mxu2 %v10572_v9 }
 0xfe8   : > { %7071 = vmatpush.bf16.msrb.mxu3 %v10580_v22 }
 0xfe9   : > { %7033 = vmatpush.bf16.msrb.mxu0 %v10555_v33  ;;  %v5712_v37 = vpop.f32.mrf.mxu2 }
 0xfea   : > { %7046 = vmatpush.bf16.msrb.mxu1 %v10563_v30  ;;  %v5725_v55 = vpop.f32.mrf.mxu3  ;;  %v10647_v30 = vld [vmem:[%s13335_s6] ss:$0 sm:$0xff] }
 0xfeb   : > { %7059 = vmatpush.bf16.msrb.mxu2 %v10571_v1 }
 0xfec   : > { %7072 = vmatpush.bf16.msrb.mxu3 %v10579_v39 }
 0xfed   : > { %7034 = vmatpush.bf16.msrb.mxu0 %v10554_v56 }
 0xfee   : > { %7047 = vmatpush.bf16.msrb.mxu1 %v10562_v27 }
 0xfef   : > { %7060 = vmatpush.bf16.msrb.mxu2 %v10570_v54 }
 0xff0   : > { %7073 = vmatpush.bf16.msrb.mxu3 %v10578_v11 }
 0xff1   : > { %7035 = vmatpush.bf16.msrb.mxu0 %v10553_v63 }
 0xff2   : > { %7048 = vmatpush.bf16.msrb.mxu1 %v10561_v51 }
 0xff3   : > { %7061 = vmatpush.bf16.msrb.mxu2 %v10569_v62 }
 0xff4   : > { %7074 = vmatpush.bf16.msrb.mxu3 %v10577_v0 }
 0xff5   : > { %7036 = vmatpush.bf16.msrb.mxu0 %v10552_v14 }
 0xff6   : > { %7049 = vmatpush.bf16.msrb.mxu1 %v10560_v7 }
 0xff7   : > { %7062 = vmatpush.bf16.msrb.mxu2 %v10568_v60 }
 0xff8   : > { %7075 = vmatpush.bf16.msrb.mxu3 %v10576_v13 }
 0xff9   : > { %7037 = vmatpush.bf16.msrb.mxu0 %v10551_v10  ;;  %v5736_v34 = vpop.f32.mrf.mxu0 }
 0xffa   : > { %7050 = vmatpush.bf16.msrb.mxu1 %v10559_v19  ;;  %v5737_v5 = vadd.f32 %v5736_v34, %v5724_v4  ;;  %v5749_v40 = vpop.f32.mrf.mxu1 }
 0xffb   : > { %7063 = vmatpush.bf16.msrb.mxu2 %v10567_v45 }
 0xffc   : > { %7076 = vmatpush.bf16.msrb.mxu3 %v10575_v16  ;;  %7038 = vmatmul.bf16.vlgmr.msrb.gmra.mxu0 %v6582_v21  ;;  %v5750_v32 = vadd.f32 %v5749_v40, %v5737_v5 }
 0xffd   : > { %7051 = vmatmul.bf16.vlgmr.msrb.gmra.mxu1 %v6583_v48 }
 0xffe   : > { %7064 = vmatmul.bf16.vlgmr.msrb.gmra.mxu2 %v6584_v44 }
 0xfff   : > { %7077 = vmatmul.bf16.vlgmr.msrb.gmra.mxu3 %v6585_v26 }
0x1001   : > { %v5762_v42 = vpop.f32.mrf.mxu2  ;;  %v5738_v20 = vpop.f32.mrf.mxu0 }
0x1002   : > { %v5763_v47 = vadd.f32 %v5762_v42, %v5750_v32  ;;  %v5775_v61 = vpop.f32.mrf.mxu3  ;;  %v5751_v3 = vpop.f32.mrf.mxu1 }
0x1004   : > { %v5776_v46 = vadd.f32 %v5775_v61, %v5763_v47 }
0x1006   : > { %v5782_v56 = vadd.f32 %v10647_v30, %v5776_v46 }
0x1009   : > { %v5764_v24 = vpop.f32.mrf.mxu2 }
0x100a   : > { %v5777_v29 = vpop.f32.mrf.mxu3 }
0x1019   : > { %v6337_v49 = vpop.f32.mrf.mxu0 }
0x101a   : > { %v6350_v2 = vpop.f32.mrf.mxu1 }
0x101b   : > { %v6351_v23 = vadd.f32 %v6350_v2, %v6337_v49 }
0x1021   : > { %v6363_v8 = vpop.f32.mrf.mxu2  ;;  %v6339_v38 = vpop.f32.mrf.mxu0 }
0x1022   : > { %v6364_v57 = vadd.f32 %v6363_v8, %v6351_v23  ;;  %v6376_v50 = vpop.f32.mrf.mxu3  ;;  %v6352_v17 = vpop.f32.mrf.mxu1 }
0x1024   : > { %v6377_v15 = vadd.f32 %v6376_v50, %v6364_v57 }
0x1029   : > { %v6365_v12 = vpop.f32.mrf.mxu2 }
0x102a   : > { %v6378_v59 = vpop.f32.mrf.mxu3 }
0x1039   : > { %v6389_v9 = vpop.f32.mrf.mxu0 }
0x103a   : > { %v6390_v22 = vadd.f32 %v6389_v9, %v6377_v15  ;;  %v6402_v53 = vpop.f32.mrf.mxu1 }
0x103c   : > { %v6403_v33 = vadd.f32 %v6402_v53, %v6390_v22 }
0x1041   : > { %v6415_v36 = vpop.f32.mrf.mxu2  ;;  %v6391_v35 = vpop.f32.mrf.mxu0 }
0x1042   : > { %v6416_v1 = vadd.f32 %v6415_v36, %v6403_v33  ;;  %v6428_v39 = vpop.f32.mrf.mxu3  ;;  %v6404_v54 = vpop.f32.mrf.mxu1 }
0x1044   : > { %v6429_v27 = vadd.f32 %v6428_v39, %v6416_v1 }
0x1046   : > { %v6432_v11 = vadd.f32 %v6429_v27, %v5782_v56 }
0x1049   : > { %v6417_v18 = vpop.f32.mrf.mxu2 }
0x104a   : > { %v6430_v41 = vpop.f32.mrf.mxu3 }
0x1059   : > { %v6987_v52 = vpop.f32.mrf.mxu0 }
0x105a   : > { %v7000_v58 = vpop.f32.mrf.mxu1 }
0x105b   : > { %v7001_v14 = vadd.f32 %v7000_v58, %v6987_v52 }
0x1061   : > { %v7013_v63 = vpop.f32.mrf.mxu2  ;;  %v6989_v4 = vpop.f32.mrf.mxu0 }
0x1062   : > { %v7026_v51 = vpop.f32.mrf.mxu3  ;;  %v7002_v31 = vpop.f32.mrf.mxu1  ;;  %v7014_v7 = vadd.f32 %v7013_v63, %v7001_v14 }
0x1064   : > { %v7027_v60 = vadd.f32 %v7026_v51, %v7014_v7 }
0x1069   : > { %v7015_v62 = vpop.f32.mrf.mxu2 }
0x106a   : > { %v7028_v0 = vpop.f32.mrf.mxu3 }
0x1079   : > { %v7039_v13 = vpop.f32.mrf.mxu0 }
0x107a   : > { %v7052_v37 = vpop.f32.mrf.mxu1  ;;  %v7040_v55 = vadd.f32 %v7039_v13, %v7027_v60 }
0x107c   : > { %v7053_v25 = vadd.f32 %v7052_v37, %v7040_v55 }
0x1081   : > { %v7065_v10 = vpop.f32.mrf.mxu2  ;;  %v7041_v45 = vpop.f32.mrf.mxu0 }
0x1082   : > { %v7078_v19 = vpop.f32.mrf.mxu3  ;;  %v7066_v43 = vadd.f32 %v7065_v10, %v7053_v25  ;;  %v7054_v16 = vpop.f32.mrf.mxu1 }
0x1084   : > { %v7079_v21 = vadd.f32 %v7078_v19, %v7066_v43 }
0x1086   : > { %v7082_v48 = vadd.f32 %v7079_v21, %v6432_v11 }
0x1088   : > { %v7086_v44 = vsel %vm7085_vm6, %v7082_v48, -1e+30 }
0x1089   : > { %v7067_v26 = vpop.f32.mrf.mxu2  ;;  %v7087_v5 = vsel %vm5124_vm4, %v7086_v44, -inf }
0x108a   : > { %v7080_v34 = vpop.f32.mrf.mxu3  ;;  %7088 = vmax.xlane.f32.xlu0 %v7087_v5 }
0x10fd   : > { %v7089_v40 = vpop.xlane.xlu0 %7088 }
0x10fe   : > { %v7090_v32 = vsub.f32 %v7086_v44, %v7089_v40 }
0x1100   : > { %v7091_v42 = vmul.f32 1.442695, %v7090_v32 }
0x1102   : > { %10648 = vpow2.f32 %v7091_v42 }
0x1108   : > { %v10649_v47 = vpop.eup %10648 }
0x1109   : > { %v7093_v61 = vsel %vm5124_vm4, %v10649_v47, 0.0 }
0x110a   : > { %7094 = vadd.xlane.f32.xlu0 %v7093_v61 }
0x117d   : > { %v7095_v20 = vpop.xlane.xlu0 %7094 }
0x117e   : > { %10650 = vlog2.f32 %v7095_v20 }
0x1184   : > { %v10651_v46 = vpop.eup %10650 }
0x1185   : > { %v7097_v3 = vmul.f32 0.6931472, %v10651_v46 }
0x1187   : > { %v7098_v24 = vsub.f32 %v7090_v32, %v7097_v3 }
0x1189   : > { %7099 = vst [vmem:[#allocation3] sm:$0x3] %v7098_v24 }
0x118a PF: > { %p10590_p6 = scmp.eq.s32.totalorder %s10740_s25, 3  ;;  %s10693_s16 = smov [#allocation3]  }
0x118b   : > { %s7106_s17 = sshll.u32 %s10693_s16, 4  ;;  %s7108_s20 = sshll.u32 %s13336_s7, 4  ;;  %s7107_s17 = int_to_ptr.vmem [resolvable:$true] %s7106_s17  ;;  %s7109_s20 = int_to_ptr.hbm [resolvable:$true] %s7108_s20 }
0x118c   : > { %10587 = dma.vmem_to_hbm [thread:$0]  (%p10590_p6), %s7107_s17, 32, %s7109_s20, [#allocation4]  }
0x118d   : > { %10685 = dma.done.wait (%p10590_p6), [#allocation4], 32  }
0x118e   : > { %10687 = vsyncadd (%p10590_p6), [#allocation4], 4294967264 }
0x118f PF: > { %s18_s24 = sadd.s32 1, %s10690_s24  }
0x1190   : > { %p15_p7 = scmp.ge.s32.totalorder %s18_s24, 6  }
0x1192   :  { %17 = sbr.rel (!%p15_p7) target bundleno = 1 (0x1), region = 94 }
0x1197   :  { %7122 = vsyncpa [#allocation4], 1 }
0x1198   :  { %7124 = vsyncpa [#allocation4 + $0x1], 1 }

</bundles_post_ra>
